<compile_context>
chip_gen: v7x
topology: tpu7x:2x2x1
jax: 0.10.0
libtpu: 0.0.40
codegen_flags: <defaults>
</compile_context>

<pallas_src>
import numpy as np
import jax
import jax.numpy as jnp
from jax import lax
from jax.experimental import pallas as pl
from jax.experimental.pallas import tpu as pltpu


# ----------------------------- deterministic weights -----------------------------
def get_gaussian_kernel(k=3, mu=0, sigma=1, normalize=True):
    gaussian_1D = np.linspace(-1, 1, k)
    x, y = np.meshgrid(gaussian_1D, gaussian_1D)
    distance = (x ** 2 + y ** 2) ** 0.5
    gaussian_2D = np.exp(-(distance - mu) ** 2 / (2 * sigma ** 2))
    gaussian_2D = gaussian_2D / (2 * np.pi * sigma ** 2)
    if normalize:
        gaussian_2D /= np.sum(gaussian_2D)
    return gaussian_2D


def get_sobel_kernel(k=3):
    rng = np.linspace(-(k // 2), k // 2, k)
    x, y = np.meshgrid(rng, rng)
    denominator = x ** 2 + y ** 2
    denominator[:, k // 2] = 1
    sobel_2D_X = x / denominator
    sobel_2D_Y = sobel_2D_X.T
    return sobel_2D_X, sobel_2D_Y


GAUSS = get_gaussian_kernel(3, 0, 1)
SOBEL_X, SOBEL_Y = get_sobel_kernel(3)

# Rank-1 (separable) factors, verified against the exact 2-D kernels above.
GAUSS_1D = GAUSS[1, :] / np.sqrt(GAUSS[1, 1])
assert np.allclose(np.outer(GAUSS_1D, GAUSS_1D), GAUSS, atol=1e-12)
assert np.isclose(GAUSS_1D[0], GAUSS_1D[2])                     # symmetric [a, b, a]
SOBEL_SMOOTH = SOBEL_X[:, 2] / SOBEL_X[1, 2]                    # [0.5, 1.0, 0.5]
SOBEL_DERIV = SOBEL_X[1, :]                                     # [-1.0, 0.0, 1.0]
assert np.allclose(np.outer(SOBEL_SMOOTH, SOBEL_DERIV), SOBEL_X, atol=1e-12)
assert np.allclose(np.outer(SOBEL_DERIV, SOBEL_SMOOTH), SOBEL_Y, atol=1e-12)
assert np.allclose(SOBEL_SMOOTH, [0.5, 1.0, 0.5])
assert np.allclose(SOBEL_DERIV, [-1.0, 0.0, 1.0])

# The module's forward divides img by 255 before the gaussian; fold 1/255 into the
# horizontal gaussian taps (linear, equal up to ~1 ulp).
GH_A = float(GAUSS_1D[0]) / 255.0
GH_B = float(GAUSS_1D[1]) / 255.0
GV_A = float(GAUSS_1D[0])
GV_B = float(GAUSS_1D[1])

# get_thin_kernels(): kernel k has +1 at the center and -1 at the neighbour with
# offset (dy, dx) below, for angles 0, 45, ..., 315.
THIN_NEIGHBORS = [(0, 1), (-1, 1), (-1, 0), (-1, -1), (0, -1), (1, -1), (1, 0), (1, 1)]

TAN_22_5 = float(np.tan(np.deg2rad(22.5)))

HALO = 8  # halo rows on each side of a strip (8-row aligned blocks; 3 are required)


def _vmem_capacity_bytes():
    try:
        info = pltpu.get_tpu_info()
        for name in ("vmem_capacity_bytes", "vmem_size_bytes", "vmem_bytes"):
            v = getattr(info, name, None)
            if v:
                return int(v)
    except Exception:
        pass
    return 64 * 1024 * 1024  # conservative fallback: v7x per-TC VMEM


def _divisors(n):
    return [d for d in range(1, n + 1) if n % d == 0]


# --------------------------------- pallas kernel ---------------------------------
def make_canny(B, C, H, W, dtype=jnp.float32):
    in_item = int(np.dtype(dtype).itemsize)

    def footprint_bytes(bt, th):
        ph = th + 2 * HALO
        # double-buffered pipelined refs: input strip + two halo blocks + 6 outputs
        io = 2 * bt * (C * th + 2 * C * HALO) * W * in_item
        io += 2 * bt * (C + 5) * th * W * 4
        # allowance for whole-plane fused-op temporaries Mosaic materialises
        # (rolled/masked planes, gx/gy accumulators, mag/idx/remove, ...)
        tmp = 24 * ph * W * 4
        return io + tmp

    vmem_cap = _vmem_capacity_bytes()
    budget = int(vmem_cap * 0.85)        # leave headroom for compiler-internal scratch

    # Strip height: largest multiple-of-8 divisor of H whose footprint fits the budget.
    if H % 8 == 0:
        cands = sorted((d for d in _divisors(H) if d % 8 == 0), reverse=True)
    else:
        cands = [H]                       # cannot strip cleanly; single full-height block
    TH = cands[-1]
    for th in cands:
        if footprint_bytes(1, th) <= budget:
            TH = th
            break
    n_strips = H // TH
    multi = n_strips > 1

    # Batch images per grid step: grow while under budget until a step moves ~1 MiB.
    Bt = 1
    for d in sorted(_divisors(B)):
        if footprint_bytes(d, TH) > budget:
            break
        Bt = d
        if d * (2 * C + 5) * TH * W * 4 >= (1 << 20):
            break

    PH = TH + 2 * HALO                    # padded strip height
    vmem_limit = budget

    def kernel(*refs):
        if multi:
            prev_ref, cur_ref, next_ref = refs[:3]
            outs = refs[3:]
        else:
            cur_ref = refs[0]
            prev_ref = next_ref = None
            outs = refs[1:]
        blur_ref, gx_ref, gy_ref, mag_ref, ori_ref, thin_ref = outs

        si = pl.program_id(1)
        row0 = si * TH - HALO             # global image row of padded row 0

        # Validity masks on the padded strip (computed once per grid step).
        prow = lax.broadcasted_iota(jnp.int32, (PH, W), 0)
        grow = prow + row0
        row_valid = jnp.logical_and(grow >= 0, grow < H)
        col = lax.broadcasted_iota(jnp.int32, (PH, W), 1)
        col_ok = {1: col <= W - 2, -1: col >= 1}

        def shift_rows(x, dy):
            # out[r, c] = x[r + dy, c]; roll wrap-around only pollutes the outermost
            # padded rows, which are never consumed by later stages / stores.
            return pltpu.roll(x, shift=(-dy) % PH, axis=0)

        def shift_cols(x, dx):
            # out[r, c] = x[r, c + dx], zero outside the image (conv zero padding).
            r = pltpu.roll(x, shift=(-dx) % W, axis=1)
            return jnp.where(col_ok[dx], r, 0.0)

        out_rows = slice(HALO, HALO + TH)
        inv_c = 1.0 / float(C)

        for b in range(Bt):
            gx = None
            gy = None
            for c in range(C):
                cur = cur_ref[b, c]                                  # (TH, W)
                if multi:
                    top = prev_ref[b, c]                             # prev strip, last 8 rows
                    bot = next_ref[b, c]                             # next strip, first 8 rows
                else:
                    top = jnp.zeros((HALO, W), cur.dtype)
                    bot = jnp.zeros((HALO, W), cur.dtype)
                x = jnp.concatenate([top, cur, bot], axis=0).astype(jnp.float32)
                x = jnp.where(row_valid, x, 0.0)                     # zero outside the image

                # gaussian blur of img/255 (1/255 folded into the horizontal taps)
                xl = shift_cols(x, -1)
                xr = shift_cols(x, 1)
                bh = GH_A * (xl + xr) + GH_B * x
                blur = GV_A * (shift_rows(bh, -1) + shift_rows(bh, 1)) + GV_B * bh
                blur = jnp.where(row_valid, blur, 0.0)               # zero-pad for sobel stage
                blur_ref[b, c] = blur[out_rows]

                # sobel x / y: shared column shifts, symmetric / antisymmetric taps
                bl = shift_cols(blur, -1)
                br = shift_cols(blur, 1)
                t_d = br - bl                                        # [-1, 0, 1] horizontal
                t_s = 0.5 * (bl + br) + blur                         # [.5, 1, .5] horizontal
                gx_c = 0.5 * (shift_rows(t_d, -1) + shift_rows(t_d, 1)) + t_d
                gy_c = shift_rows(t_s, 1) - shift_rows(t_s, -1)
                gx = gx_c if gx is None else gx + gx_c
                gy = gy_c if gy is None else gy + gy_c

            gx = gx * inv_c
            gy = gy * inv_c
            mag = jnp.sqrt(gx * gx + gy * gy)
            mag = jnp.where(row_valid, mag, 0.0)                     # zero-pad for NMS stage
            gx_ref[b, 0] = gx[out_rows]
            gy_ref[b, 0] = gy[out_rows]
            mag_ref[b, 0] = mag[out_rows]

            # Quantized orientation via sector classification.  Matches
            # (round((atan2(gy,gx)*180/pi + 180)/45)*45) % 360 (incl. the gx<0, gy==0
            # case, where the reference also yields 0 after %360); only measure-zero
            # round-half-to-even ties at exact 22.5deg boundaries can differ.
            ax = jnp.abs(gx)
            ay = jnp.abs(gy)
            horiz = ay <= TAN_22_5 * ax
            vert = ax <= TAN_22_5 * ay
            idx_h = jnp.where(gx >= 0, 4.0, 0.0)
            idx_v = jnp.where(gy >= 0, 6.0, 2.0)
            idx_d = jnp.where(gx >= 0,
                              jnp.where(gy >= 0, 5.0, 3.0),
                              jnp.where(gy >= 0, 7.0, 1.0))
            idx = jnp.where(horiz, idx_h, jnp.where(vert, idx_v, idx_d))
            ori_ref[b, 0] = (idx * 45.0)[out_rows]

            # Directional NMS: shared up/down row shifts, one accumulated remove mask.
            up = shift_rows(mag, -1)
            down = shift_rows(mag, 1)
            base = {-1: up, 0: mag, 1: down}

            def neighbor(dy, dx):
                v = base[dy]
                return shift_cols(v, dx) if dx != 0 else v

            remove = None
            for pos_i in range(4):
                dy_p, dx_p = THIN_NEIGHBORS[pos_i]
                dy_n, dx_n = THIN_NEIGHBORS[pos_i + 4]
                d_pos = mag - neighbor(dy_p, dx_p)
                d_neg = mag - neighbor(dy_n, dx_n)
                not_max = jnp.minimum(d_pos, d_neg) <= 0.0
                oriented = jnp.logical_or(idx == float(pos_i), idx == float(pos_i + 4))
                rem_i = jnp.logical_and(not_max, oriented)
                remove = rem_i if remove is None else jnp.logical_or(remove, rem_i)
            thin = jnp.where(remove, 0.0, mag)
            thin_ref[b, 0] = thin[out_rows]

    out_shapes = (
        jax.ShapeDtypeStruct((B, C, H, W), jnp.float32),   # blurred
        jax.ShapeDtypeStruct((B, 1, H, W), jnp.float32),   # grad_x
        jax.ShapeDtypeStruct((B, 1, H, W), jnp.float32),   # grad_y
        jax.ShapeDtypeStruct((B, 1, H, W), jnp.float32),   # grad_magnitude
        jax.ShapeDtypeStruct((B, 1, H, W), jnp.float32),   # grad_orientation
        jax.ShapeDtypeStruct((B, 1, H, W), jnp.float32),   # thin_edges
    )
    cspec = pl.BlockSpec((Bt, C, TH, W), lambda bi, si: (bi, 0, si, 0))
    bspec = pl.BlockSpec((Bt, C, TH, W), lambda bi, si: (bi, 0, si, 0))
    ospec = pl.BlockSpec((Bt, 1, TH, W), lambda bi, si: (bi, 0, si, 0))

    if multi:
        nb = TH // 8
        nh = H // 8
        prev_spec = pl.BlockSpec(
            (Bt, C, HALO, W),
            lambda bi, si: (bi, 0, jnp.maximum(si * nb - 1, 0), 0))
        next_spec = pl.BlockSpec(
            (Bt, C, HALO, W),
            lambda bi, si: (bi, 0, jnp.minimum((si + 1) * nb, nh - 1), 0))
        in_specs = [prev_spec, cspec, next_spec]
    else:
        in_specs = [cspec]

    call = pl.pallas_call(
        kernel,
        out_shape=out_shapes,
        grid=(B // Bt, n_strips),
        in_specs=in_specs,
        out_specs=(bspec, ospec, ospec, ospec, ospec, ospec),
        compiler_params=pltpu.CompilerParams(
            dimension_semantics=("parallel", "parallel"),
            vmem_limit_bytes=int(vmem_limit),
        ),
    )

    if multi:
        return lambda img: call(img, img, img)
    return call


def canny_filter(img):
    # uint8 inputs are accepted natively (cast happens inside the kernel, after DMA).
    if img.dtype not in (jnp.uint8, jnp.float32):
        img = img.astype(jnp.float32)
    B, C, H, W = img.shape
    return make_canny(B, C, H, W, img.dtype)(img)


# ------------------------------------- main --------------------------------------
if __name__ == "__main__":
    B, C, H, W = 2, 4, 16, 16
    key = jax.random.PRNGKey(0)
    img = jax.random.uniform(key, (B, C, H, W), jnp.float32, 0.0, 255.0)

    blurred, grad_x, grad_y, grad_mag, grad_ori, thin_edges = jax.block_until_ready(
        canny_filter(img)
    )
    assert blurred.shape == (B, C, H, W)
    assert grad_x.shape == grad_y.shape == grad_mag.shape == (B, 1, H, W)
    assert grad_ori.shape == thin_edges.shape == (B, 1, H, W)
    print("KERNEL_OK")
</pallas_src>

<mosaic_0001>
module attributes {stable_mosaic.version = 11 : i64} {
  func.func @kernel(%arg0: i32, %arg1: i32, %arg2: memref<2x4x16x16xf32, #tpu.memory_space<vmem>>, %arg3: memref<2x4x16x16xf32, #tpu.memory_space<vmem>>, %arg4: memref<2x1x16x16xf32, #tpu.memory_space<vmem>>, %arg5: memref<2x1x16x16xf32, #tpu.memory_space<vmem>>, %arg6: memref<2x1x16x16xf32, #tpu.memory_space<vmem>>, %arg7: memref<2x1x16x16xf32, #tpu.memory_space<vmem>>, %arg8: memref<2x1x16x16xf32, #tpu.memory_space<vmem>>) attributes {dimension_semantics = [#tpu.dimension_semantics<parallel>, #tpu.dimension_semantics<parallel>], iteration_bounds = array<i64: 1, 1>, scalar_prefetch = 0 : i64, scratch_operands = 0 : i64, tpu.core_type = #tpu.core_type<tc>, window_params = [{transform_indices = @transform_0, window_bounds = array<i64: 2, 4, 16, 16>}, {transform_indices = @transform_1, window_bounds = array<i64: 2, 4, 16, 16>}, {transform_indices = @transform_2, window_bounds = array<i64: 2, 1, 16, 16>}, {transform_indices = @transform_3, window_bounds = array<i64: 2, 1, 16, 16>}, {transform_indices = @transform_4, window_bounds = array<i64: 2, 1, 16, 16>}, {transform_indices = @transform_5, window_bounds = array<i64: 2, 1, 16, 16>}, {transform_indices = @transform_6, window_bounds = array<i64: 2, 1, 16, 16>}]} {
    %c16_i32 = arith.constant 16 : i32
    %0 = arith.muli %arg1, %c16_i32 : i32
    %c8_i32 = arith.constant 8 : i32
    %1 = arith.subi %0, %c8_i32 : i32
    %2 = tpu.iota {dimensions = array<i32: 0>} : vector<32x16xi32>
    %3 = vector.broadcast %1 : i32 to vector<32x16xi32>
    %4 = arith.addi %2, %3 : vector<32x16xi32>
    %c0_i32 = arith.constant 0 : i32
    %5 = vector.broadcast %c0_i32 : i32 to vector<32x16xi32>
    %6 = arith.cmpi sge, %4, %5 : vector<32x16xi32>
    %c16_i32_0 = arith.constant 16 : i32
    %7 = vector.broadcast %c16_i32_0 : i32 to vector<32x16xi32>
    %8 = arith.cmpi slt, %4, %7 : vector<32x16xi32>
    %9 = arith.andi %6, %8 : vector<32x16xi1>
    %10 = tpu.iota {dimensions = array<i32: 1>} : vector<32x16xi32>
    %c14_i32 = arith.constant 14 : i32
    %11 = vector.broadcast %c14_i32 : i32 to vector<32x16xi32>
    %12 = arith.cmpi sle, %10, %11 : vector<32x16xi32>
    %c1_i32 = arith.constant 1 : i32
    %13 = vector.broadcast %c1_i32 : i32 to vector<32x16xi32>
    %14 = arith.cmpi sge, %10, %13 : vector<32x16xi32>
    %c0 = arith.constant 0 : index
    %c0_1 = arith.constant 0 : index
    %c0_2 = arith.constant 0 : index
    %c0_3 = arith.constant 0 : index
    %15 = vector.load %arg2[%c0, %c0_1, %c0_2, %c0_3] : memref<2x4x16x16xf32, #tpu.memory_space<vmem>>, vector<1x1x16x16xf32>
    %16 = vector.shape_cast %15 : vector<1x1x16x16xf32> to vector<16x16xf32>
    %cst = arith.constant 0.000000e+00 : f32
    %17 = vector.broadcast %cst : f32 to vector<8x16xf32>
    %cst_4 = arith.constant 0.000000e+00 : f32
    %18 = vector.broadcast %cst_4 : f32 to vector<8x16xf32>
    %19 = tpu.concatenate %17, %16, %18 in 0 : vector<8x16xf32>, vector<16x16xf32>, vector<8x16xf32> -> vector<32x16xf32>
    %cst_5 = arith.constant 0.000000e+00 : f32
    %20 = vector.broadcast %cst_5 : f32 to vector<32x16xf32>
    %21 = arith.select %9, %19, %20 : vector<32x16xi1>, vector<32x16xf32>
    %c1_i32_6 = arith.constant 1 : i32
    %22 = tpu.dynamic_rotate %21 by %c1_i32_6 dim 1 : vector<32x16xf32>, i32 -> vector<32x16xf32>
    %cst_7 = arith.constant 0.000000e+00 : f32
    %23 = vector.broadcast %cst_7 : f32 to vector<32x16xf32>
    %24 = arith.select %14, %22, %23 : vector<32x16xi1>, vector<32x16xf32>
    %c15_i32 = arith.constant 15 : i32
    %25 = tpu.dynamic_rotate %21 by %c15_i32 dim 1 : vector<32x16xf32>, i32 -> vector<32x16xf32>
    %cst_8 = arith.constant 0.000000e+00 : f32
    %26 = vector.broadcast %cst_8 : f32 to vector<32x16xf32>
    %27 = arith.select %12, %25, %26 : vector<32x16xi1>, vector<32x16xf32>
    %28 = arith.addf %24, %27 : vector<32x16xf32>
    %cst_9 = arith.constant 0.00107477885 : f32
    %29 = vector.broadcast %cst_9 : f32 to vector<32x16xf32>
    %30 = arith.mulf %29, %28 : vector<32x16xf32>
    %cst_10 = arith.constant 0.00177201082 : f32
    %31 = vector.broadcast %cst_10 : f32 to vector<32x16xf32>
    %32 = arith.mulf %31, %21 : vector<32x16xf32>
    %33 = arith.addf %30, %32 : vector<32x16xf32>
    %c1_i32_11 = arith.constant 1 : i32
    %34 = tpu.dynamic_rotate %33 by %c1_i32_11 dim 0 : vector<32x16xf32>, i32 -> vector<32x16xf32>
    %c31_i32 = arith.constant 31 : i32
    %35 = tpu.dynamic_rotate %33 by %c31_i32 dim 0 : vector<32x16xf32>, i32 -> vector<32x16xf32>
    %36 = arith.addf %34, %35 : vector<32x16xf32>
    %cst_12 = arith.constant 0.274068624 : f32
    %37 = vector.broadcast %cst_12 : f32 to vector<32x16xf32>
    %38 = arith.mulf %37, %36 : vector<32x16xf32>
    %cst_13 = arith.constant 0.451862752 : f32
    %39 = vector.broadcast %cst_13 : f32 to vector<32x16xf32>
    %40 = arith.mulf %39, %33 : vector<32x16xf32>
    %41 = arith.addf %38, %40 : vector<32x16xf32>
    %cst_14 = arith.constant 0.000000e+00 : f32
    %42 = vector.broadcast %cst_14 : f32 to vector<32x16xf32>
    %43 = arith.select %9, %41, %42 : vector<32x16xi1>, vector<32x16xf32>
    %44 = vector.extract_strided_slice %43 {offsets = [8, 0], sizes = [16, 16], strides = [1, 1]} : vector<32x16xf32> to vector<16x16xf32>
    %c0_15 = arith.constant 0 : index
    %c0_16 = arith.constant 0 : index
    %c0_17 = arith.constant 0 : index
    %c0_18 = arith.constant 0 : index
    %45 = vector.load %arg3[%c0_15, %c0_16, %c0_17, %c0_18] : memref<2x4x16x16xf32, #tpu.memory_space<vmem>>, vector<1x1x16x16xf32>
    %46 = vector.shape_cast %45 : vector<1x1x16x16xf32> to vector<16x16xf32>
    %47 = vector.shape_cast %44 : vector<16x16xf32> to vector<1x1x16x16xf32>
    tpu.vector_store %arg3[%c0_15, %c0_16, %c0_17, %c0_18], %47 {strides = array<i32>} : memref<2x4x16x16xf32, #tpu.memory_space<vmem>>, vector<1x1x16x16xf32>,
    %c1_i32_19 = arith.constant 1 : i32
    %48 = tpu.dynamic_rotate %43 by %c1_i32_19 dim 1 : vector<32x16xf32>, i32 -> vector<32x16xf32>
    %cst_20 = arith.constant 0.000000e+00 : f32
    %49 = vector.broadcast %cst_20 : f32 to vector<32x16xf32>
    %50 = arith.select %14, %48, %49 : vector<32x16xi1>, vector<32x16xf32>
    %c15_i32_21 = arith.constant 15 : i32
    %51 = tpu.dynamic_rotate %43 by %c15_i32_21 dim 1 : vector<32x16xf32>, i32 -> vector<32x16xf32>
    %cst_22 = arith.constant 0.000000e+00 : f32
    %52 = vector.broadcast %cst_22 : f32 to vector<32x16xf32>
    %53 = arith.select %12, %51, %52 : vector<32x16xi1>, vector<32x16xf32>
    %54 = arith.subf %53, %50 : vector<32x16xf32>
    %55 = arith.addf %50, %53 : vector<32x16xf32>
    %cst_23 = arith.constant 5.000000e-01 : f32
    %56 = vector.broadcast %cst_23 : f32 to vector<32x16xf32>
    %57 = arith.mulf %56, %55 : vector<32x16xf32>
    %58 = arith.addf %57, %43 : vector<32x16xf32>
    %c1_i32_24 = arith.constant 1 : i32
    %59 = tpu.dynamic_rotate %54 by %c1_i32_24 dim 0 : vector<32x16xf32>, i32 -> vector<32x16xf32>
    %c31_i32_25 = arith.constant 31 : i32
    %60 = tpu.dynamic_rotate %54 by %c31_i32_25 dim 0 : vector<32x16xf32>, i32 -> vector<32x16xf32>
    %61 = arith.addf %59, %60 : vector<32x16xf32>
    %cst_26 = arith.constant 5.000000e-01 : f32
    %62 = vector.broadcast %cst_26 : f32 to vector<32x16xf32>
    %63 = arith.mulf %62, %61 : vector<32x16xf32>
    %64 = arith.addf %63, %54 : vector<32x16xf32>
    %c31_i32_27 = arith.constant 31 : i32
    %65 = tpu.dynamic_rotate %58 by %c31_i32_27 dim 0 : vector<32x16xf32>, i32 -> vector<32x16xf32>
    %c1_i32_28 = arith.constant 1 : i32
    %66 = tpu.dynamic_rotate %58 by %c1_i32_28 dim 0 : vector<32x16xf32>, i32 -> vector<32x16xf32>
    %67 = arith.subf %65, %66 : vector<32x16xf32>
    %c0_29 = arith.constant 0 : index
    %c1 = arith.constant 1 : index
    %c0_30 = arith.constant 0 : index
    %c0_31 = arith.constant 0 : index
    %68 = vector.load %arg2[%c0_29, %c1, %c0_30, %c0_31] : memref<2x4x16x16xf32, #tpu.memory_space<vmem>>, vector<1x1x16x16xf32>
    %69 = vector.shape_cast %68 : vector<1x1x16x16xf32> to vector<16x16xf32>
    %cst_32 = arith.constant 0.000000e+00 : f32
    %70 = vector.broadcast %cst_32 : f32 to vector<8x16xf32>
    %cst_33 = arith.constant 0.000000e+00 : f32
    %71 = vector.broadcast %cst_33 : f32 to vector<8x16xf32>
    %72 = tpu.concatenate %70, %69, %71 in 0 : vector<8x16xf32>, vector<16x16xf32>, vector<8x16xf32> -> vector<32x16xf32>
    %cst_34 = arith.constant 0.000000e+00 : f32
    %73 = vector.broadcast %cst_34 : f32 to vector<32x16xf32>
    %74 = arith.select %9, %72, %73 : vector<32x16xi1>, vector<32x16xf32>
    %c1_i32_35 = arith.constant 1 : i32
    %75 = tpu.dynamic_rotate %74 by %c1_i32_35 dim 1 : vector<32x16xf32>, i32 -> vector<32x16xf32>
    %cst_36 = arith.constant 0.000000e+00 : f32
    %76 = vector.broadcast %cst_36 : f32 to vector<32x16xf32>
    %77 = arith.select %14, %75, %76 : vector<32x16xi1>, vector<32x16xf32>
    %c15_i32_37 = arith.constant 15 : i32
    %78 = tpu.dynamic_rotate %74 by %c15_i32_37 dim 1 : vector<32x16xf32>, i32 -> vector<32x16xf32>
    %cst_38 = arith.constant 0.000000e+00 : f32
    %79 = vector.broadcast %cst_38 : f32 to vector<32x16xf32>
    %80 = arith.select %12, %78, %79 : vector<32x16xi1>, vector<32x16xf32>
    %81 = arith.addf %77, %80 : vector<32x16xf32>
    %cst_39 = arith.constant 0.00107477885 : f32
    %82 = vector.broadcast %cst_39 : f32 to vector<32x16xf32>
    %83 = arith.mulf %82, %81 : vector<32x16xf32>
    %cst_40 = arith.constant 0.00177201082 : f32
    %84 = vector.broadcast %cst_40 : f32 to vector<32x16xf32>
    %85 = arith.mulf %84, %74 : vector<32x16xf32>
    %86 = arith.addf %83, %85 : vector<32x16xf32>
    %c1_i32_41 = arith.constant 1 : i32
    %87 = tpu.dynamic_rotate %86 by %c1_i32_41 dim 0 : vector<32x16xf32>, i32 -> vector<32x16xf32>
    %c31_i32_42 = arith.constant 31 : i32
    %88 = tpu.dynamic_rotate %86 by %c31_i32_42 dim 0 : vector<32x16xf32>, i32 -> vector<32x16xf32>
    %89 = arith.addf %87, %88 : vector<32x16xf32>
    %cst_43 = arith.constant 0.274068624 : f32
    %90 = vector.broadcast %cst_43 : f32 to vector<32x16xf32>
    %91 = arith.mulf %90, %89 : vector<32x16xf32>
    %cst_44 = arith.constant 0.451862752 : f32
    %92 = vector.broadcast %cst_44 : f32 to vector<32x16xf32>
    %93 = arith.mulf %92, %86 : vector<32x16xf32>
    %94 = arith.addf %91, %93 : vector<32x16xf32>
    %cst_45 = arith.constant 0.000000e+00 : f32
    %95 = vector.broadcast %cst_45 : f32 to vector<32x16xf32>
    %96 = arith.select %9, %94, %95 : vector<32x16xi1>, vector<32x16xf32>
    %97 = vector.extract_strided_slice %96 {offsets = [8, 0], sizes = [16, 16], strides = [1, 1]} : vector<32x16xf32> to vector<16x16xf32>
    %c0_46 = arith.constant 0 : index
    %c1_47 = arith.constant 1 : index
    %c0_48 = arith.constant 0 : index
    %c0_49 = arith.constant 0 : index
    %98 = vector.load %arg3[%c0_46, %c1_47, %c0_48, %c0_49] : memref<2x4x16x16xf32, #tpu.memory_space<vmem>>, vector<1x1x16x16xf32>
    %99 = vector.shape_cast %98 : vector<1x1x16x16xf32> to vector<16x16xf32>
    %100 = vector.shape_cast %97 : vector<16x16xf32> to vector<1x1x16x16xf32>
    tpu.vector_store %arg3[%c0_46, %c1_47, %c0_48, %c0_49], %100 {strides = array<i32>} : memref<2x4x16x16xf32, #tpu.memory_space<vmem>>, vector<1x1x16x16xf32>,
    %c1_i32_50 = arith.constant 1 : i32
    %101 = tpu.dynamic_rotate %96 by %c1_i32_50 dim 1 : vector<32x16xf32>, i32 -> vector<32x16xf32>
    %cst_51 = arith.constant 0.000000e+00 : f32
    %102 = vector.broadcast %cst_51 : f32 to vector<32x16xf32>
    %103 = arith.select %14, %101, %102 : vector<32x16xi1>, vector<32x16xf32>
    %c15_i32_52 = arith.constant 15 : i32
    %104 = tpu.dynamic_rotate %96 by %c15_i32_52 dim 1 : vector<32x16xf32>, i32 -> vector<32x16xf32>
    %cst_53 = arith.constant 0.000000e+00 : f32
    %105 = vector.broadcast %cst_53 : f32 to vector<32x16xf32>
    %106 = arith.select %12, %104, %105 : vector<32x16xi1>, vector<32x16xf32>
    %107 = arith.subf %106, %103 : vector<32x16xf32>
    %108 = arith.addf %103, %106 : vector<32x16xf32>
    %cst_54 = arith.constant 5.000000e-01 : f32
    %109 = vector.broadcast %cst_54 : f32 to vector<32x16xf32>
    %110 = arith.mulf %109, %108 : vector<32x16xf32>
    %111 = arith.addf %110, %96 : vector<32x16xf32>
    %c1_i32_55 = arith.constant 1 : i32
    %112 = tpu.dynamic_rotate %107 by %c1_i32_55 dim 0 : vector<32x16xf32>, i32 -> vector<32x16xf32>
    %c31_i32_56 = arith.constant 31 : i32
    %113 = tpu.dynamic_rotate %107 by %c31_i32_56 dim 0 : vector<32x16xf32>, i32 -> vector<32x16xf32>
    %114 = arith.addf %112, %113 : vector<32x16xf32>
    %cst_57 = arith.constant 5.000000e-01 : f32
    %115 = vector.broadcast %cst_57 : f32 to vector<32x16xf32>
    %116 = arith.mulf %115, %114 : vector<32x16xf32>
    %117 = arith.addf %116, %107 : vector<32x16xf32>
    %c31_i32_58 = arith.constant 31 : i32
    %118 = tpu.dynamic_rotate %111 by %c31_i32_58 dim 0 : vector<32x16xf32>, i32 -> vector<32x16xf32>
    %c1_i32_59 = arith.constant 1 : i32
    %119 = tpu.dynamic_rotate %111 by %c1_i32_59 dim 0 : vector<32x16xf32>, i32 -> vector<32x16xf32>
    %120 = arith.subf %118, %119 : vector<32x16xf32>
    %121 = arith.addf %64, %117 : vector<32x16xf32>
    %122 = arith.addf %67, %120 : vector<32x16xf32>
    %c0_60 = arith.constant 0 : index
    %c2 = arith.constant 2 : index
    %c0_61 = arith.constant 0 : index
    %c0_62 = arith.constant 0 : index
    %123 = vector.load %arg2[%c0_60, %c2, %c0_61, %c0_62] : memref<2x4x16x16xf32, #tpu.memory_space<vmem>>, vector<1x1x16x16xf32>
    %124 = vector.shape_cast %123 : vector<1x1x16x16xf32> to vector<16x16xf32>
    %cst_63 = arith.constant 0.000000e+00 : f32
    %125 = vector.broadcast %cst_63 : f32 to vector<8x16xf32>
    %cst_64 = arith.constant 0.000000e+00 : f32
    %126 = vector.broadcast %cst_64 : f32 to vector<8x16xf32>
    %127 = tpu.concatenate %125, %124, %126 in 0 : vector<8x16xf32>, vector<16x16xf32>, vector<8x16xf32> -> vector<32x16xf32>
    %cst_65 = arith.constant 0.000000e+00 : f32
    %128 = vector.broadcast %cst_65 : f32 to vector<32x16xf32>
    %129 = arith.select %9, %127, %128 : vector<32x16xi1>, vector<32x16xf32>
    %c1_i32_66 = arith.constant 1 : i32
    %130 = tpu.dynamic_rotate %129 by %c1_i32_66 dim 1 : vector<32x16xf32>, i32 -> vector<32x16xf32>
    %cst_67 = arith.constant 0.000000e+00 : f32
    %131 = vector.broadcast %cst_67 : f32 to vector<32x16xf32>
    %132 = arith.select %14, %130, %131 : vector<32x16xi1>, vector<32x16xf32>
    %c15_i32_68 = arith.constant 15 : i32
    %133 = tpu.dynamic_rotate %129 by %c15_i32_68 dim 1 : vector<32x16xf32>, i32 -> vector<32x16xf32>
    %cst_69 = arith.constant 0.000000e+00 : f32
    %134 = vector.broadcast %cst_69 : f32 to vector<32x16xf32>
    %135 = arith.select %12, %133, %134 : vector<32x16xi1>, vector<32x16xf32>
    %136 = arith.addf %132, %135 : vector<32x16xf32>
    %cst_70 = arith.constant 0.00107477885 : f32
    %137 = vector.broadcast %cst_70 : f32 to vector<32x16xf32>
    %138 = arith.mulf %137, %136 : vector<32x16xf32>
    %cst_71 = arith.constant 0.00177201082 : f32
    %139 = vector.broadcast %cst_71 : f32 to vector<32x16xf32>
    %140 = arith.mulf %139, %129 : vector<32x16xf32>
    %141 = arith.addf %138, %140 : vector<32x16xf32>
    %c1_i32_72 = arith.constant 1 : i32
    %142 = tpu.dynamic_rotate %141 by %c1_i32_72 dim 0 : vector<32x16xf32>, i32 -> vector<32x16xf32>
    %c31_i32_73 = arith.constant 31 : i32
    %143 = tpu.dynamic_rotate %141 by %c31_i32_73 dim 0 : vector<32x16xf32>, i32 -> vector<32x16xf32>
    %144 = arith.addf %142, %143 : vector<32x16xf32>
    %cst_74 = arith.constant 0.274068624 : f32
    %145 = vector.broadcast %cst_74 : f32 to vector<32x16xf32>
    %146 = arith.mulf %145, %144 : vector<32x16xf32>
    %cst_75 = arith.constant 0.451862752 : f32
    %147 = vector.broadcast %cst_75 : f32 to vector<32x16xf32>
    %148 = arith.mulf %147, %141 : vector<32x16xf32>
    %149 = arith.addf %146, %148 : vector<32x16xf32>
    %cst_76 = arith.constant 0.000000e+00 : f32
    %150 = vector.broadcast %cst_76 : f32 to vector<32x16xf32>
    %151 = arith.select %9, %149, %150 : vector<32x16xi1>, vector<32x16xf32>
    %152 = vector.extract_strided_slice %151 {offsets = [8, 0], sizes = [16, 16], strides = [1, 1]} : vector<32x16xf32> to vector<16x16xf32>
    %c0_77 = arith.constant 0 : index
    %c2_78 = arith.constant 2 : index
    %c0_79 = arith.constant 0 : index
    %c0_80 = arith.constant 0 : index
    %153 = vector.load %arg3[%c0_77, %c2_78, %c0_79, %c0_80] : memref<2x4x16x16xf32, #tpu.memory_space<vmem>>, vector<1x1x16x16xf32>
    %154 = vector.shape_cast %153 : vector<1x1x16x16xf32> to vector<16x16xf32>
    %155 = vector.shape_cast %152 : vector<16x16xf32> to vector<1x1x16x16xf32>
    tpu.vector_store %arg3[%c0_77, %c2_78, %c0_79, %c0_80], %155 {strides = array<i32>} : memref<2x4x16x16xf32, #tpu.memory_space<vmem>>, vector<1x1x16x16xf32>,
    %c1_i32_81 = arith.constant 1 : i32
    %156 = tpu.dynamic_rotate %151 by %c1_i32_81 dim 1 : vector<32x16xf32>, i32 -> vector<32x16xf32>
    %cst_82 = arith.constant 0.000000e+00 : f32
    %157 = vector.broadcast %cst_82 : f32 to vector<32x16xf32>
    %158 = arith.select %14, %156, %157 : vector<32x16xi1>, vector<32x16xf32>
    %c15_i32_83 = arith.constant 15 : i32
    %159 = tpu.dynamic_rotate %151 by %c15_i32_83 dim 1 : vector<32x16xf32>, i32 -> vector<32x16xf32>
    %cst_84 = arith.constant 0.000000e+00 : f32
    %160 = vector.broadcast %cst_84 : f32 to vector<32x16xf32>
    %161 = arith.select %12, %159, %160 : vector<32x16xi1>, vector<32x16xf32>
    %162 = arith.subf %161, %158 : vector<32x16xf32>
    %163 = arith.addf %158, %161 : vector<32x16xf32>
    %cst_85 = arith.constant 5.000000e-01 : f32
    %164 = vector.broadcast %cst_85 : f32 to vector<32x16xf32>
    %165 = arith.mulf %164, %163 : vector<32x16xf32>
    %166 = arith.addf %165, %151 : vector<32x16xf32>
    %c1_i32_86 = arith.constant 1 : i32
    %167 = tpu.dynamic_rotate %162 by %c1_i32_86 dim 0 : vector<32x16xf32>, i32 -> vector<32x16xf32>
    %c31_i32_87 = arith.constant 31 : i32
    %168 = tpu.dynamic_rotate %162 by %c31_i32_87 dim 0 : vector<32x16xf32>, i32 -> vector<32x16xf32>
    %169 = arith.addf %167, %168 : vector<32x16xf32>
    %cst_88 = arith.constant 5.000000e-01 : f32
    %170 = vector.broadcast %cst_88 : f32 to vector<32x16xf32>
    %171 = arith.mulf %170, %169 : vector<32x16xf32>
    %172 = arith.addf %171, %162 : vector<32x16xf32>
    %c31_i32_89 = arith.constant 31 : i32
    %173 = tpu.dynamic_rotate %166 by %c31_i32_89 dim 0 : vector<32x16xf32>, i32 -> vector<32x16xf32>
    %c1_i32_90 = arith.constant 1 : i32
    %174 = tpu.dynamic_rotate %166 by %c1_i32_90 dim 0 : vector<32x16xf32>, i32 -> vector<32x16xf32>
    %175 = arith.subf %173, %174 : vector<32x16xf32>
    %176 = arith.addf %121, %172 : vector<32x16xf32>
    %177 = arith.addf %122, %175 : vector<32x16xf32>
    %c0_91 = arith.constant 0 : index
    %c3 = arith.constant 3 : index
    %c0_92 = arith.constant 0 : index
    %c0_93 = arith.constant 0 : index
    %178 = vector.load %arg2[%c0_91, %c3, %c0_92, %c0_93] : memref<2x4x16x16xf32, #tpu.memory_space<vmem>>, vector<1x1x16x16xf32>
    %179 = vector.shape_cast %178 : vector<1x1x16x16xf32> to vector<16x16xf32>
    %cst_94 = arith.constant 0.000000e+00 : f32
    %180 = vector.broadcast %cst_94 : f32 to vector<8x16xf32>
    %cst_95 = arith.constant 0.000000e+00 : f32
    %181 = vector.broadcast %cst_95 : f32 to vector<8x16xf32>
    %182 = tpu.concatenate %180, %179, %181 in 0 : vector<8x16xf32>, vector<16x16xf32>, vector<8x16xf32> -> vector<32x16xf32>
    %cst_96 = arith.constant 0.000000e+00 : f32
    %183 = vector.broadcast %cst_96 : f32 to vector<32x16xf32>
    %184 = arith.select %9, %182, %183 : vector<32x16xi1>, vector<32x16xf32>
    %c1_i32_97 = arith.constant 1 : i32
    %185 = tpu.dynamic_rotate %184 by %c1_i32_97 dim 1 : vector<32x16xf32>, i32 -> vector<32x16xf32>
    %cst_98 = arith.constant 0.000000e+00 : f32
    %186 = vector.broadcast %cst_98 : f32 to vector<32x16xf32>
    %187 = arith.select %14, %185, %186 : vector<32x16xi1>, vector<32x16xf32>
    %c15_i32_99 = arith.constant 15 : i32
    %188 = tpu.dynamic_rotate %184 by %c15_i32_99 dim 1 : vector<32x16xf32>, i32 -> vector<32x16xf32>
    %cst_100 = arith.constant 0.000000e+00 : f32
    %189 = vector.broadcast %cst_100 : f32 to vector<32x16xf32>
    %190 = arith.select %12, %188, %189 : vector<32x16xi1>, vector<32x16xf32>
    %191 = arith.addf %187, %190 : vector<32x16xf32>
    %cst_101 = arith.constant 0.00107477885 : f32
    %192 = vector.broadcast %cst_101 : f32 to vector<32x16xf32>
    %193 = arith.mulf %192, %191 : vector<32x16xf32>
    %cst_102 = arith.constant 0.00177201082 : f32
    %194 = vector.broadcast %cst_102 : f32 to vector<32x16xf32>
    %195 = arith.mulf %194, %184 : vector<32x16xf32>
    %196 = arith.addf %193, %195 : vector<32x16xf32>
    %c1_i32_103 = arith.constant 1 : i32
    %197 = tpu.dynamic_rotate %196 by %c1_i32_103 dim 0 : vector<32x16xf32>, i32 -> vector<32x16xf32>
    %c31_i32_104 = arith.constant 31 : i32
    %198 = tpu.dynamic_rotate %196 by %c31_i32_104 dim 0 : vector<32x16xf32>, i32 -> vector<32x16xf32>
    %199 = arith.addf %197, %198 : vector<32x16xf32>
    %cst_105 = arith.constant 0.274068624 : f32
    %200 = vector.broadcast %cst_105 : f32 to vector<32x16xf32>
    %201 = arith.mulf %200, %199 : vector<32x16xf32>
    %cst_106 = arith.constant 0.451862752 : f32
    %202 = vector.broadcast %cst_106 : f32 to vector<32x16xf32>
    %203 = arith.mulf %202, %196 : vector<32x16xf32>
    %204 = arith.addf %201, %203 : vector<32x16xf32>
    %cst_107 = arith.constant 0.000000e+00 : f32
    %205 = vector.broadcast %cst_107 : f32 to vector<32x16xf32>
    %206 = arith.select %9, %204, %205 : vector<32x16xi1>, vector<32x16xf32>
    %207 = vector.extract_strided_slice %206 {offsets = [8, 0], sizes = [16, 16], strides = [1, 1]} : vector<32x16xf32> to vector<16x16xf32>
    %c0_108 = arith.constant 0 : index
    %c3_109 = arith.constant 3 : index
    %c0_110 = arith.constant 0 : index
    %c0_111 = arith.constant 0 : index
    %208 = vector.load %arg3[%c0_108, %c3_109, %c0_110, %c0_111] : memref<2x4x16x16xf32, #tpu.memory_space<vmem>>, vector<1x1x16x16xf32>
    %209 = vector.shape_cast %208 : vector<1x1x16x16xf32> to vector<16x16xf32>
    %210 = vector.shape_cast %207 : vector<16x16xf32> to vector<1x1x16x16xf32>
    tpu.vector_store %arg3[%c0_108, %c3_109, %c0_110, %c0_111], %210 {strides = array<i32>} : memref<2x4x16x16xf32, #tpu.memory_space<vmem>>, vector<1x1x16x16xf32>,
    %c1_i32_112 = arith.constant 1 : i32
    %211 = tpu.dynamic_rotate %206 by %c1_i32_112 dim 1 : vector<32x16xf32>, i32 -> vector<32x16xf32>
    %cst_113 = arith.constant 0.000000e+00 : f32
    %212 = vector.broadcast %cst_113 : f32 to vector<32x16xf32>
    %213 = arith.select %14, %211, %212 : vector<32x16xi1>, vector<32x16xf32>
    %c15_i32_114 = arith.constant 15 : i32
    %214 = tpu.dynamic_rotate %206 by %c15_i32_114 dim 1 : vector<32x16xf32>, i32 -> vector<32x16xf32>
    %cst_115 = arith.constant 0.000000e+00 : f32
    %215 = vector.broadcast %cst_115 : f32 to vector<32x16xf32>
    %216 = arith.select %12, %214, %215 : vector<32x16xi1>, vector<32x16xf32>
    %217 = arith.subf %216, %213 : vector<32x16xf32>
    %218 = arith.addf %213, %216 : vector<32x16xf32>
    %cst_116 = arith.constant 5.000000e-01 : f32
    %219 = vector.broadcast %cst_116 : f32 to vector<32x16xf32>
    %220 = arith.mulf %219, %218 : vector<32x16xf32>
    %221 = arith.addf %220, %206 : vector<32x16xf32>
    %c1_i32_117 = arith.constant 1 : i32
    %222 = tpu.dynamic_rotate %217 by %c1_i32_117 dim 0 : vector<32x16xf32>, i32 -> vector<32x16xf32>
    %c31_i32_118 = arith.constant 31 : i32
    %223 = tpu.dynamic_rotate %217 by %c31_i32_118 dim 0 : vector<32x16xf32>, i32 -> vector<32x16xf32>
    %224 = arith.addf %222, %223 : vector<32x16xf32>
    %cst_119 = arith.constant 5.000000e-01 : f32
    %225 = vector.broadcast %cst_119 : f32 to vector<32x16xf32>
    %226 = arith.mulf %225, %224 : vector<32x16xf32>
    %227 = arith.addf %226, %217 : vector<32x16xf32>
    %c31_i32_120 = arith.constant 31 : i32
    %228 = tpu.dynamic_rotate %221 by %c31_i32_120 dim 0 : vector<32x16xf32>, i32 -> vector<32x16xf32>
    %c1_i32_121 = arith.constant 1 : i32
    %229 = tpu.dynamic_rotate %221 by %c1_i32_121 dim 0 : vector<32x16xf32>, i32 -> vector<32x16xf32>
    %230 = arith.subf %228, %229 : vector<32x16xf32>
    %231 = arith.addf %176, %227 : vector<32x16xf32>
    %232 = arith.addf %177, %230 : vector<32x16xf32>
    %cst_122 = arith.constant 2.500000e-01 : f32
    %233 = vector.broadcast %cst_122 : f32 to vector<32x16xf32>
    %234 = arith.mulf %231, %233 : vector<32x16xf32>
    %cst_123 = arith.constant 2.500000e-01 : f32
    %235 = vector.broadcast %cst_123 : f32 to vector<32x16xf32>
    %236 = arith.mulf %232, %235 : vector<32x16xf32>
    %237 = arith.mulf %234, %234 : vector<32x16xf32>
    %238 = arith.mulf %236, %236 : vector<32x16xf32>
    %239 = arith.addf %237, %238 : vector<32x16xf32>
    %240 = math.sqrt %239 : vector<32x16xf32>
    %cst_124 = arith.constant 0.000000e+00 : f32
    %241 = vector.broadcast %cst_124 : f32 to vector<32x16xf32>
    %242 = arith.select %9, %240, %241 : vector<32x16xi1>, vector<32x16xf32>
    %243 = vector.extract_strided_slice %234 {offsets = [8, 0], sizes = [16, 16], strides = [1, 1]} : vector<32x16xf32> to vector<16x16xf32>
    %c0_125 = arith.constant 0 : index
    %c0_126 = arith.constant 0 : index
    %c0_127 = arith.constant 0 : index
    %c0_128 = arith.constant 0 : index
    %244 = vector.load %arg4[%c0_125, %c0_126, %c0_127, %c0_128] : memref<2x1x16x16xf32, #tpu.memory_space<vmem>>, vector<1x1x16x16xf32>
    %245 = vector.shape_cast %244 : vector<1x1x16x16xf32> to vector<16x16xf32>
    %246 = vector.shape_cast %243 : vector<16x16xf32> to vector<1x1x16x16xf32>
    tpu.vector_store %arg4[%c0_125, %c0_126, %c0_127, %c0_128], %246 {strides = array<i32>} : memref<2x1x16x16xf32, #tpu.memory_space<vmem>>, vector<1x1x16x16xf32>,
    %247 = vector.extract_strided_slice %236 {offsets = [8, 0], sizes = [16, 16], strides = [1, 1]} : vector<32x16xf32> to vector<16x16xf32>
    %c0_129 = arith.constant 0 : index
    %c0_130 = arith.constant 0 : index
    %c0_131 = arith.constant 0 : index
    %c0_132 = arith.constant 0 : index
    %248 = vector.load %arg5[%c0_129, %c0_130, %c0_131, %c0_132] : memref<2x1x16x16xf32, #tpu.memory_space<vmem>>, vector<1x1x16x16xf32>
    %249 = vector.shape_cast %248 : vector<1x1x16x16xf32> to vector<16x16xf32>
    %250 = vector.shape_cast %247 : vector<16x16xf32> to vector<1x1x16x16xf32>
    tpu.vector_store %arg5[%c0_129, %c0_130, %c0_131, %c0_132], %250 {strides = array<i32>} : memref<2x1x16x16xf32, #tpu.memory_space<vmem>>, vector<1x1x16x16xf32>,
    %251 = vector.extract_strided_slice %242 {offsets = [8, 0], sizes = [16, 16], strides = [1, 1]} : vector<32x16xf32> to vector<16x16xf32>
    %c0_133 = arith.constant 0 : index
    %c0_134 = arith.constant 0 : index
    %c0_135 = arith.constant 0 : index
    %c0_136 = arith.constant 0 : index
    %252 = vector.load %arg6[%c0_133, %c0_134, %c0_135, %c0_136] : memref<2x1x16x16xf32, #tpu.memory_space<vmem>>, vector<1x1x16x16xf32>
    %253 = vector.shape_cast %252 : vector<1x1x16x16xf32> to vector<16x16xf32>
    %254 = vector.shape_cast %251 : vector<16x16xf32> to vector<1x1x16x16xf32>
    tpu.vector_store %arg6[%c0_133, %c0_134, %c0_135, %c0_136], %254 {strides = array<i32>} : memref<2x1x16x16xf32, #tpu.memory_space<vmem>>, vector<1x1x16x16xf32>,
    %255 = math.absf %234 : vector<32x16xf32>
    %256 = math.absf %236 : vector<32x16xf32>
    %cst_137 = arith.constant 0.414213568 : f32
    %257 = vector.broadcast %cst_137 : f32 to vector<32x16xf32>
    %258 = arith.mulf %257, %255 : vector<32x16xf32>
    %259 = arith.cmpf ole, %256, %258 : vector<32x16xf32>
    %cst_138 = arith.constant 0.414213568 : f32
    %260 = vector.broadcast %cst_138 : f32 to vector<32x16xf32>
    %261 = arith.mulf %260, %256 : vector<32x16xf32>
    %262 = arith.cmpf ole, %255, %261 : vector<32x16xf32>
    %cst_139 = arith.constant 0.000000e+00 : f32
    %263 = vector.broadcast %cst_139 : f32 to vector<32x16xf32>
    %264 = arith.cmpf oge, %234, %263 : vector<32x16xf32>
    %cst_140 = arith.constant 4.000000e+00 : f32
    %cst_141 = arith.constant 0.000000e+00 : f32
    %265 = vector.broadcast %cst_140 : f32 to vector<32x16xf32>
    %266 = vector.broadcast %cst_141 : f32 to vector<32x16xf32>
    %267 = arith.select %264, %265, %266 : vector<32x16xi1>, vector<32x16xf32>
    %cst_142 = arith.constant 0.000000e+00 : f32
    %268 = vector.broadcast %cst_142 : f32 to vector<32x16xf32>
    %269 = arith.cmpf oge, %236, %268 : vector<32x16xf32>
    %cst_143 = arith.constant 6.000000e+00 : f32
    %cst_144 = arith.constant 2.000000e+00 : f32
    %270 = vector.broadcast %cst_143 : f32 to vector<32x16xf32>
    %271 = vector.broadcast %cst_144 : f32 to vector<32x16xf32>
    %272 = arith.select %269, %270, %271 : vector<32x16xi1>, vector<32x16xf32>
    %cst_145 = arith.constant 0.000000e+00 : f32
    %273 = vector.broadcast %cst_145 : f32 to vector<32x16xf32>
    %274 = arith.cmpf oge, %234, %273 : vector<32x16xf32>
    %cst_146 = arith.constant 0.000000e+00 : f32
    %275 = vector.broadcast %cst_146 : f32 to vector<32x16xf32>
    %276 = arith.cmpf oge, %236, %275 : vector<32x16xf32>
    %cst_147 = arith.constant 5.000000e+00 : f32
    %cst_148 = arith.constant 3.000000e+00 : f32
    %277 = vector.broadcast %cst_147 : f32 to vector<32x16xf32>
    %278 = vector.broadcast %cst_148 : f32 to vector<32x16xf32>
    %279 = arith.select %276, %277, %278 : vector<32x16xi1>, vector<32x16xf32>
    %cst_149 = arith.constant 0.000000e+00 : f32
    %280 = vector.broadcast %cst_149 : f32 to vector<32x16xf32>
    %281 = arith.cmpf oge, %236, %280 : vector<32x16xf32>
    %cst_150 = arith.constant 7.000000e+00 : f32
    %cst_151 = arith.constant 1.000000e+00 : f32
    %282 = vector.broadcast %cst_150 : f32 to vector<32x16xf32>
    %283 = vector.broadcast %cst_151 : f32 to vector<32x16xf32>
    %284 = arith.select %281, %282, %283 : vector<32x16xi1>, vector<32x16xf32>
    %285 = arith.select %274, %279, %284 : vector<32x16xi1>, vector<32x16xf32>
    %286 = arith.select %262, %272, %285 : vector<32x16xi1>, vector<32x16xf32>
    %287 = arith.select %259, %267, %286 : vector<32x16xi1>, vector<32x16xf32>
    %cst_152 = arith.constant 4.500000e+01 : f32
    %288 = vector.broadcast %cst_152 : f32 to vector<32x16xf32>
    %289 = arith.mulf %287, %288 : vector<32x16xf32>
    %290 = vector.extract_strided_slice %289 {offsets = [8, 0], sizes = [16, 16], strides = [1, 1]} : vector<32x16xf32> to vector<16x16xf32>
    %c0_153 = arith.constant 0 : index
    %c0_154 = arith.constant 0 : index
    %c0_155 = arith.constant 0 : index
    %c0_156 = arith.constant 0 : index
    %291 = vector.load %arg7[%c0_153, %c0_154, %c0_155, %c0_156] : memref<2x1x16x16xf32, #tpu.memory_space<vmem>>, vector<1x1x16x16xf32>
    %292 = vector.shape_cast %291 : vector<1x1x16x16xf32> to vector<16x16xf32>
    %293 = vector.shape_cast %290 : vector<16x16xf32> to vector<1x1x16x16xf32>
    tpu.vector_store %arg7[%c0_153, %c0_154, %c0_155, %c0_156], %293 {strides = array<i32>} : memref<2x1x16x16xf32, #tpu.memory_space<vmem>>, vector<1x1x16x16xf32>,
    %c1_i32_157 = arith.constant 1 : i32
    %294 = tpu.dynamic_rotate %242 by %c1_i32_157 dim 0 : vector<32x16xf32>, i32 -> vector<32x16xf32>
    %c31_i32_158 = arith.constant 31 : i32
    %295 = tpu.dynamic_rotate %242 by %c31_i32_158 dim 0 : vector<32x16xf32>, i32 -> vector<32x16xf32>
    %c15_i32_159 = arith.constant 15 : i32
    %296 = tpu.dynamic_rotate %242 by %c15_i32_159 dim 1 : vector<32x16xf32>, i32 -> vector<32x16xf32>
    %cst_160 = arith.constant 0.000000e+00 : f32
    %297 = vector.broadcast %cst_160 : f32 to vector<32x16xf32>
    %298 = arith.select %12, %296, %297 : vector<32x16xi1>, vector<32x16xf32>
    %299 = arith.subf %242, %298 : vector<32x16xf32>
    %c1_i32_161 = arith.constant 1 : i32
    %300 = tpu.dynamic_rotate %242 by %c1_i32_161 dim 1 : vector<32x16xf32>, i32 -> vector<32x16xf32>
    %cst_162 = arith.constant 0.000000e+00 : f32
    %301 = vector.broadcast %cst_162 : f32 to vector<32x16xf32>
    %302 = arith.select %14, %300, %301 : vector<32x16xi1>, vector<32x16xf32>
    %303 = arith.subf %242, %302 : vector<32x16xf32>
    %304 = arith.minimumf %299, %303 : vector<32x16xf32>
    %cst_163 = arith.constant 0.000000e+00 : f32
    %305 = vector.broadcast %cst_163 : f32 to vector<32x16xf32>
    %306 = arith.cmpf ole, %304, %305 : vector<32x16xf32>
    %cst_164 = arith.constant 0.000000e+00 : f32
    %307 = vector.broadcast %cst_164 : f32 to vector<32x16xf32>
    %308 = arith.cmpf oeq, %287, %307 : vector<32x16xf32>
    %cst_165 = arith.constant 4.000000e+00 : f32
    %309 = vector.broadcast %cst_165 : f32 to vector<32x16xf32>
    %310 = arith.cmpf oeq, %287, %309 : vector<32x16xf32>
    %311 = arith.ori %308, %310 : vector<32x16xi1>
    %312 = arith.andi %306, %311 : vector<32x16xi1>
    %c15_i32_166 = arith.constant 15 : i32
    %313 = tpu.dynamic_rotate %294 by %c15_i32_166 dim 1 : vector<32x16xf32>, i32 -> vector<32x16xf32>
    %cst_167 = arith.constant 0.000000e+00 : f32
    %314 = vector.broadcast %cst_167 : f32 to vector<32x16xf32>
    %315 = arith.select %12, %313, %314 : vector<32x16xi1>, vector<32x16xf32>
    %316 = arith.subf %242, %315 : vector<32x16xf32>
    %c1_i32_168 = arith.constant 1 : i32
    %317 = tpu.dynamic_rotate %295 by %c1_i32_168 dim 1 : vector<32x16xf32>, i32 -> vector<32x16xf32>
    %cst_169 = arith.constant 0.000000e+00 : f32
    %318 = vector.broadcast %cst_169 : f32 to vector<32x16xf32>
    %319 = arith.select %14, %317, %318 : vector<32x16xi1>, vector<32x16xf32>
    %320 = arith.subf %242, %319 : vector<32x16xf32>
    %321 = arith.minimumf %316, %320 : vector<32x16xf32>
    %cst_170 = arith.constant 0.000000e+00 : f32
    %322 = vector.broadcast %cst_170 : f32 to vector<32x16xf32>
    %323 = arith.cmpf ole, %321, %322 : vector<32x16xf32>
    %cst_171 = arith.constant 1.000000e+00 : f32
    %324 = vector.broadcast %cst_171 : f32 to vector<32x16xf32>
    %325 = arith.cmpf oeq, %287, %324 : vector<32x16xf32>
    %cst_172 = arith.constant 5.000000e+00 : f32
    %326 = vector.broadcast %cst_172 : f32 to vector<32x16xf32>
    %327 = arith.cmpf oeq, %287, %326 : vector<32x16xf32>
    %328 = arith.ori %325, %327 : vector<32x16xi1>
    %329 = arith.andi %323, %328 : vector<32x16xi1>
    %330 = arith.ori %312, %329 : vector<32x16xi1>
    %331 = arith.subf %242, %294 : vector<32x16xf32>
    %332 = arith.subf %242, %295 : vector<32x16xf32>
    %333 = arith.minimumf %331, %332 : vector<32x16xf32>
    %cst_173 = arith.constant 0.000000e+00 : f32
    %334 = vector.broadcast %cst_173 : f32 to vector<32x16xf32>
    %335 = arith.cmpf ole, %333, %334 : vector<32x16xf32>
    %cst_174 = arith.constant 2.000000e+00 : f32
    %336 = vector.broadcast %cst_174 : f32 to vector<32x16xf32>
    %337 = arith.cmpf oeq, %287, %336 : vector<32x16xf32>
    %cst_175 = arith.constant 6.000000e+00 : f32
    %338 = vector.broadcast %cst_175 : f32 to vector<32x16xf32>
    %339 = arith.cmpf oeq, %287, %338 : vector<32x16xf32>
    %340 = arith.ori %337, %339 : vector<32x16xi1>
    %341 = arith.andi %335, %340 : vector<32x16xi1>
    %342 = arith.ori %330, %341 : vector<32x16xi1>
    %c1_i32_176 = arith.constant 1 : i32
    %343 = tpu.dynamic_rotate %294 by %c1_i32_176 dim 1 : vector<32x16xf32>, i32 -> vector<32x16xf32>
    %cst_177 = arith.constant 0.000000e+00 : f32
    %344 = vector.broadcast %cst_177 : f32 to vector<32x16xf32>
    %345 = arith.select %14, %343, %344 : vector<32x16xi1>, vector<32x16xf32>
    %346 = arith.subf %242, %345 : vector<32x16xf32>
    %c15_i32_178 = arith.constant 15 : i32
    %347 = tpu.dynamic_rotate %295 by %c15_i32_178 dim 1 : vector<32x16xf32>, i32 -> vector<32x16xf32>
    %cst_179 = arith.constant 0.000000e+00 : f32
    %348 = vector.broadcast %cst_179 : f32 to vector<32x16xf32>
    %349 = arith.select %12, %347, %348 : vector<32x16xi1>, vector<32x16xf32>
    %350 = arith.subf %242, %349 : vector<32x16xf32>
    %351 = arith.minimumf %346, %350 : vector<32x16xf32>
    %cst_180 = arith.constant 0.000000e+00 : f32
    %352 = vector.broadcast %cst_180 : f32 to vector<32x16xf32>
    %353 = arith.cmpf ole, %351, %352 : vector<32x16xf32>
    %cst_181 = arith.constant 3.000000e+00 : f32
    %354 = vector.broadcast %cst_181 : f32 to vector<32x16xf32>
    %355 = arith.cmpf oeq, %287, %354 : vector<32x16xf32>
    %cst_182 = arith.constant 7.000000e+00 : f32
    %356 = vector.broadcast %cst_182 : f32 to vector<32x16xf32>
    %357 = arith.cmpf oeq, %287, %356 : vector<32x16xf32>
    %358 = arith.ori %355, %357 : vector<32x16xi1>
    %359 = arith.andi %353, %358 : vector<32x16xi1>
    %360 = arith.ori %342, %359 : vector<32x16xi1>
    %cst_183 = arith.constant 0.000000e+00 : f32
    %361 = vector.broadcast %cst_183 : f32 to vector<32x16xf32>
    %362 = arith.select %360, %361, %242 : vector<32x16xi1>, vector<32x16xf32>
    %363 = vector.extract_strided_slice %362 {offsets = [8, 0], sizes = [16, 16], strides = [1, 1]} : vector<32x16xf32> to vector<16x16xf32>
    %c0_184 = arith.constant 0 : index
    %c0_185 = arith.constant 0 : index
    %c0_186 = arith.constant 0 : index
    %c0_187 = arith.constant 0 : index
    %364 = vector.load %arg8[%c0_184, %c0_185, %c0_186, %c0_187] : memref<2x1x16x16xf32, #tpu.memory_space<vmem>>, vector<1x1x16x16xf32>
    %365 = vector.shape_cast %364 : vector<1x1x16x16xf32> to vector<16x16xf32>
    %366 = vector.shape_cast %363 : vector<16x16xf32> to vector<1x1x16x16xf32>
    tpu.vector_store %arg8[%c0_184, %c0_185, %c0_186, %c0_187], %366 {strides = array<i32>} : memref<2x1x16x16xf32, #tpu.memory_space<vmem>>, vector<1x1x16x16xf32>,
    %c1_188 = arith.constant 1 : index
    %c0_189 = arith.constant 0 : index
    %c0_190 = arith.constant 0 : index
    %c0_191 = arith.constant 0 : index
    %367 = vector.load %arg2[%c1_188, %c0_189, %c0_190, %c0_191] : memref<2x4x16x16xf32, #tpu.memory_space<vmem>>, vector<1x1x16x16xf32>
    %368 = vector.shape_cast %367 : vector<1x1x16x16xf32> to vector<16x16xf32>
    %cst_192 = arith.constant 0.000000e+00 : f32
    %369 = vector.broadcast %cst_192 : f32 to vector<8x16xf32>
    %cst_193 = arith.constant 0.000000e+00 : f32
    %370 = vector.broadcast %cst_193 : f32 to vector<8x16xf32>
    %371 = tpu.concatenate %369, %368, %370 in 0 : vector<8x16xf32>, vector<16x16xf32>, vector<8x16xf32> -> vector<32x16xf32>
    %cst_194 = arith.constant 0.000000e+00 : f32
    %372 = vector.broadcast %cst_194 : f32 to vector<32x16xf32>
    %373 = arith.select %9, %371, %372 : vector<32x16xi1>, vector<32x16xf32>
    %c1_i32_195 = arith.constant 1 : i32
    %374 = tpu.dynamic_rotate %373 by %c1_i32_195 dim 1 : vector<32x16xf32>, i32 -> vector<32x16xf32>
    %cst_196 = arith.constant 0.000000e+00 : f32
    %375 = vector.broadcast %cst_196 : f32 to vector<32x16xf32>
    %376 = arith.select %14, %374, %375 : vector<32x16xi1>, vector<32x16xf32>
    %c15_i32_197 = arith.constant 15 : i32
    %377 = tpu.dynamic_rotate %373 by %c15_i32_197 dim 1 : vector<32x16xf32>, i32 -> vector<32x16xf32>
    %cst_198 = arith.constant 0.000000e+00 : f32
    %378 = vector.broadcast %cst_198 : f32 to vector<32x16xf32>
    %379 = arith.select %12, %377, %378 : vector<32x16xi1>, vector<32x16xf32>
    %380 = arith.addf %376, %379 : vector<32x16xf32>
    %cst_199 = arith.constant 0.00107477885 : f32
    %381 = vector.broadcast %cst_199 : f32 to vector<32x16xf32>
    %382 = arith.mulf %381, %380 : vector<32x16xf32>
    %cst_200 = arith.constant 0.00177201082 : f32
    %383 = vector.broadcast %cst_200 : f32 to vector<32x16xf32>
    %384 = arith.mulf %383, %373 : vector<32x16xf32>
    %385 = arith.addf %382, %384 : vector<32x16xf32>
    %c1_i32_201 = arith.constant 1 : i32
    %386 = tpu.dynamic_rotate %385 by %c1_i32_201 dim 0 : vector<32x16xf32>, i32 -> vector<32x16xf32>
    %c31_i32_202 = arith.constant 31 : i32
    %387 = tpu.dynamic_rotate %385 by %c31_i32_202 dim 0 : vector<32x16xf32>, i32 -> vector<32x16xf32>
    %388 = arith.addf %386, %387 : vector<32x16xf32>
    %cst_203 = arith.constant 0.274068624 : f32
    %389 = vector.broadcast %cst_203 : f32 to vector<32x16xf32>
    %390 = arith.mulf %389, %388 : vector<32x16xf32>
    %cst_204 = arith.constant 0.451862752 : f32
    %391 = vector.broadcast %cst_204 : f32 to vector<32x16xf32>
    %392 = arith.mulf %391, %385 : vector<32x16xf32>
    %393 = arith.addf %390, %392 : vector<32x16xf32>
    %cst_205 = arith.constant 0.000000e+00 : f32
    %394 = vector.broadcast %cst_205 : f32 to vector<32x16xf32>
    %395 = arith.select %9, %393, %394 : vector<32x16xi1>, vector<32x16xf32>
    %396 = vector.extract_strided_slice %395 {offsets = [8, 0], sizes = [16, 16], strides = [1, 1]} : vector<32x16xf32> to vector<16x16xf32>
    %c1_206 = arith.constant 1 : index
    %c0_207 = arith.constant 0 : index
    %c0_208 = arith.constant 0 : index
    %c0_209 = arith.constant 0 : index
    %397 = vector.load %arg3[%c1_206, %c0_207, %c0_208, %c0_209] : memref<2x4x16x16xf32, #tpu.memory_space<vmem>>, vector<1x1x16x16xf32>
    %398 = vector.shape_cast %397 : vector<1x1x16x16xf32> to vector<16x16xf32>
    %399 = vector.shape_cast %396 : vector<16x16xf32> to vector<1x1x16x16xf32>
    tpu.vector_store %arg3[%c1_206, %c0_207, %c0_208, %c0_209], %399 {strides = array<i32>} : memref<2x4x16x16xf32, #tpu.memory_space<vmem>>, vector<1x1x16x16xf32>,
    %c1_i32_210 = arith.constant 1 : i32
    %400 = tpu.dynamic_rotate %395 by %c1_i32_210 dim 1 : vector<32x16xf32>, i32 -> vector<32x16xf32>
    %cst_211 = arith.constant 0.000000e+00 : f32
    %401 = vector.broadcast %cst_211 : f32 to vector<32x16xf32>
    %402 = arith.select %14, %400, %401 : vector<32x16xi1>, vector<32x16xf32>
    %c15_i32_212 = arith.constant 15 : i32
    %403 = tpu.dynamic_rotate %395 by %c15_i32_212 dim 1 : vector<32x16xf32>, i32 -> vector<32x16xf32>
    %cst_213 = arith.constant 0.000000e+00 : f32
    %404 = vector.broadcast %cst_213 : f32 to vector<32x16xf32>
    %405 = arith.select %12, %403, %404 : vector<32x16xi1>, vector<32x16xf32>
    %406 = arith.subf %405, %402 : vector<32x16xf32>
    %407 = arith.addf %402, %405 : vector<32x16xf32>
    %cst_214 = arith.constant 5.000000e-01 : f32
    %408 = vector.broadcast %cst_214 : f32 to vector<32x16xf32>
    %409 = arith.mulf %408, %407 : vector<32x16xf32>
    %410 = arith.addf %409, %395 : vector<32x16xf32>
    %c1_i32_215 = arith.constant 1 : i32
    %411 = tpu.dynamic_rotate %406 by %c1_i32_215 dim 0 : vector<32x16xf32>, i32 -> vector<32x16xf32>
    %c31_i32_216 = arith.constant 31 : i32
    %412 = tpu.dynamic_rotate %406 by %c31_i32_216 dim 0 : vector<32x16xf32>, i32 -> vector<32x16xf32>
    %413 = arith.addf %411, %412 : vector<32x16xf32>
    %cst_217 = arith.constant 5.000000e-01 : f32
    %414 = vector.broadcast %cst_217 : f32 to vector<32x16xf32>
    %415 = arith.mulf %414, %413 : vector<32x16xf32>
    %416 = arith.addf %415, %406 : vector<32x16xf32>
    %c31_i32_218 = arith.constant 31 : i32
    %417 = tpu.dynamic_rotate %410 by %c31_i32_218 dim 0 : vector<32x16xf32>, i32 -> vector<32x16xf32>
    %c1_i32_219 = arith.constant 1 : i32
    %418 = tpu.dynamic_rotate %410 by %c1_i32_219 dim 0 : vector<32x16xf32>, i32 -> vector<32x16xf32>
    %419 = arith.subf %417, %418 : vector<32x16xf32>
    %c1_220 = arith.constant 1 : index
    %c1_221 = arith.constant 1 : index
    %c0_222 = arith.constant 0 : index
    %c0_223 = arith.constant 0 : index
    %420 = vector.load %arg2[%c1_220, %c1_221, %c0_222, %c0_223] : memref<2x4x16x16xf32, #tpu.memory_space<vmem>>, vector<1x1x16x16xf32>
    %421 = vector.shape_cast %420 : vector<1x1x16x16xf32> to vector<16x16xf32>
    %cst_224 = arith.constant 0.000000e+00 : f32
    %422 = vector.broadcast %cst_224 : f32 to vector<8x16xf32>
    %cst_225 = arith.constant 0.000000e+00 : f32
    %423 = vector.broadcast %cst_225 : f32 to vector<8x16xf32>
    %424 = tpu.concatenate %422, %421, %423 in 0 : vector<8x16xf32>, vector<16x16xf32>, vector<8x16xf32> -> vector<32x16xf32>
    %cst_226 = arith.constant 0.000000e+00 : f32
    %425 = vector.broadcast %cst_226 : f32 to vector<32x16xf32>
    %426 = arith.select %9, %424, %425 : vector<32x16xi1>, vector<32x16xf32>
    %c1_i32_227 = arith.constant 1 : i32
    %427 = tpu.dynamic_rotate %426 by %c1_i32_227 dim 1 : vector<32x16xf32>, i32 -> vector<32x16xf32>
    %cst_228 = arith.constant 0.000000e+00 : f32
    %428 = vector.broadcast %cst_228 : f32 to vector<32x16xf32>
    %429 = arith.select %14, %427, %428 : vector<32x16xi1>, vector<32x16xf32>
    %c15_i32_229 = arith.constant 15 : i32
    %430 = tpu.dynamic_rotate %426 by %c15_i32_229 dim 1 : vector<32x16xf32>, i32 -> vector<32x16xf32>
    %cst_230 = arith.constant 0.000000e+00 : f32
    %431 = vector.broadcast %cst_230 : f32 to vector<32x16xf32>
    %432 = arith.select %12, %430, %431 : vector<32x16xi1>, vector<32x16xf32>
    %433 = arith.addf %429, %432 : vector<32x16xf32>
    %cst_231 = arith.constant 0.00107477885 : f32
    %434 = vector.broadcast %cst_231 : f32 to vector<32x16xf32>
    %435 = arith.mulf %434, %433 : vector<32x16xf32>
    %cst_232 = arith.constant 0.00177201082 : f32
    %436 = vector.broadcast %cst_232 : f32 to vector<32x16xf32>
    %437 = arith.mulf %436, %426 : vector<32x16xf32>
    %438 = arith.addf %435, %437 : vector<32x16xf32>
    %c1_i32_233 = arith.constant 1 : i32
    %439 = tpu.dynamic_rotate %438 by %c1_i32_233 dim 0 : vector<32x16xf32>, i32 -> vector<32x16xf32>
    %c31_i32_234 = arith.constant 31 : i32
    %440 = tpu.dynamic_rotate %438 by %c31_i32_234 dim 0 : vector<32x16xf32>, i32 -> vector<32x16xf32>
    %441 = arith.addf %439, %440 : vector<32x16xf32>
    %cst_235 = arith.constant 0.274068624 : f32
    %442 = vector.broadcast %cst_235 : f32 to vector<32x16xf32>
    %443 = arith.mulf %442, %441 : vector<32x16xf32>
    %cst_236 = arith.constant 0.451862752 : f32
    %444 = vector.broadcast %cst_236 : f32 to vector<32x16xf32>
    %445 = arith.mulf %444, %438 : vector<32x16xf32>
    %446 = arith.addf %443, %445 : vector<32x16xf32>
    %cst_237 = arith.constant 0.000000e+00 : f32
    %447 = vector.broadcast %cst_237 : f32 to vector<32x16xf32>
    %448 = arith.select %9, %446, %447 : vector<32x16xi1>, vector<32x16xf32>
    %449 = vector.extract_strided_slice %448 {offsets = [8, 0], sizes = [16, 16], strides = [1, 1]} : vector<32x16xf32> to vector<16x16xf32>
    %c1_238 = arith.constant 1 : index
    %c1_239 = arith.constant 1 : index
    %c0_240 = arith.constant 0 : index
    %c0_241 = arith.constant 0 : index
    %450 = vector.load %arg3[%c1_238, %c1_239, %c0_240, %c0_241] : memref<2x4x16x16xf32, #tpu.memory_space<vmem>>, vector<1x1x16x16xf32>
    %451 = vector.shape_cast %450 : vector<1x1x16x16xf32> to vector<16x16xf32>
    %452 = vector.shape_cast %449 : vector<16x16xf32> to vector<1x1x16x16xf32>
    tpu.vector_store %arg3[%c1_238, %c1_239, %c0_240, %c0_241], %452 {strides = array<i32>} : memref<2x4x16x16xf32, #tpu.memory_space<vmem>>, vector<1x1x16x16xf32>,
    %c1_i32_242 = arith.constant 1 : i32
    %453 = tpu.dynamic_rotate %448 by %c1_i32_242 dim 1 : vector<32x16xf32>, i32 -> vector<32x16xf32>
    %cst_243 = arith.constant 0.000000e+00 : f32
    %454 = vector.broadcast %cst_243 : f32 to vector<32x16xf32>
    %455 = arith.select %14, %453, %454 : vector<32x16xi1>, vector<32x16xf32>
    %c15_i32_244 = arith.constant 15 : i32
    %456 = tpu.dynamic_rotate %448 by %c15_i32_244 dim 1 : vector<32x16xf32>, i32 -> vector<32x16xf32>
    %cst_245 = arith.constant 0.000000e+00 : f32
    %457 = vector.broadcast %cst_245 : f32 to vector<32x16xf32>
    %458 = arith.select %12, %456, %457 : vector<32x16xi1>, vector<32x16xf32>
    %459 = arith.subf %458, %455 : vector<32x16xf32>
    %460 = arith.addf %455, %458 : vector<32x16xf32>
    %cst_246 = arith.constant 5.000000e-01 : f32
    %461 = vector.broadcast %cst_246 : f32 to vector<32x16xf32>
    %462 = arith.mulf %461, %460 : vector<32x16xf32>
    %463 = arith.addf %462, %448 : vector<32x16xf32>
    %c1_i32_247 = arith.constant 1 : i32
    %464 = tpu.dynamic_rotate %459 by %c1_i32_247 dim 0 : vector<32x16xf32>, i32 -> vector<32x16xf32>
    %c31_i32_248 = arith.constant 31 : i32
    %465 = tpu.dynamic_rotate %459 by %c31_i32_248 dim 0 : vector<32x16xf32>, i32 -> vector<32x16xf32>
    %466 = arith.addf %464, %465 : vector<32x16xf32>
    %cst_249 = arith.constant 5.000000e-01 : f32
    %467 = vector.broadcast %cst_249 : f32 to vector<32x16xf32>
    %468 = arith.mulf %467, %466 : vector<32x16xf32>
    %469 = arith.addf %468, %459 : vector<32x16xf32>
    %c31_i32_250 = arith.constant 31 : i32
    %470 = tpu.dynamic_rotate %463 by %c31_i32_250 dim 0 : vector<32x16xf32>, i32 -> vector<32x16xf32>
    %c1_i32_251 = arith.constant 1 : i32
    %471 = tpu.dynamic_rotate %463 by %c1_i32_251 dim 0 : vector<32x16xf32>, i32 -> vector<32x16xf32>
    %472 = arith.subf %470, %471 : vector<32x16xf32>
    %473 = arith.addf %416, %469 : vector<32x16xf32>
    %474 = arith.addf %419, %472 : vector<32x16xf32>
    %c1_252 = arith.constant 1 : index
    %c2_253 = arith.constant 2 : index
    %c0_254 = arith.constant 0 : index
    %c0_255 = arith.constant 0 : index
    %475 = vector.load %arg2[%c1_252, %c2_253, %c0_254, %c0_255] : memref<2x4x16x16xf32, #tpu.memory_space<vmem>>, vector<1x1x16x16xf32>
    %476 = vector.shape_cast %475 : vector<1x1x16x16xf32> to vector<16x16xf32>
    %cst_256 = arith.constant 0.000000e+00 : f32
    %477 = vector.broadcast %cst_256 : f32 to vector<8x16xf32>
    %cst_257 = arith.constant 0.000000e+00 : f32
    %478 = vector.broadcast %cst_257 : f32 to vector<8x16xf32>
    %479 = tpu.concatenate %477, %476, %478 in 0 : vector<8x16xf32>, vector<16x16xf32>, vector<8x16xf32> -> vector<32x16xf32>
    %cst_258 = arith.constant 0.000000e+00 : f32
    %480 = vector.broadcast %cst_258 : f32 to vector<32x16xf32>
    %481 = arith.select %9, %479, %480 : vector<32x16xi1>, vector<32x16xf32>
    %c1_i32_259 = arith.constant 1 : i32
    %482 = tpu.dynamic_rotate %481 by %c1_i32_259 dim 1 : vector<32x16xf32>, i32 -> vector<32x16xf32>
    %cst_260 = arith.constant 0.000000e+00 : f32
    %483 = vector.broadcast %cst_260 : f32 to vector<32x16xf32>
    %484 = arith.select %14, %482, %483 : vector<32x16xi1>, vector<32x16xf32>
    %c15_i32_261 = arith.constant 15 : i32
    %485 = tpu.dynamic_rotate %481 by %c15_i32_261 dim 1 : vector<32x16xf32>, i32 -> vector<32x16xf32>
    %cst_262 = arith.constant 0.000000e+00 : f32
    %486 = vector.broadcast %cst_262 : f32 to vector<32x16xf32>
    %487 = arith.select %12, %485, %486 : vector<32x16xi1>, vector<32x16xf32>
    %488 = arith.addf %484, %487 : vector<32x16xf32>
    %cst_263 = arith.constant 0.00107477885 : f32
    %489 = vector.broadcast %cst_263 : f32 to vector<32x16xf32>
    %490 = arith.mulf %489, %488 : vector<32x16xf32>
    %cst_264 = arith.constant 0.00177201082 : f32
    %491 = vector.broadcast %cst_264 : f32 to vector<32x16xf32>
    %492 = arith.mulf %491, %481 : vector<32x16xf32>
    %493 = arith.addf %490, %492 : vector<32x16xf32>
    %c1_i32_265 = arith.constant 1 : i32
    %494 = tpu.dynamic_rotate %493 by %c1_i32_265 dim 0 : vector<32x16xf32>, i32 -> vector<32x16xf32>
    %c31_i32_266 = arith.constant 31 : i32
    %495 = tpu.dynamic_rotate %493 by %c31_i32_266 dim 0 : vector<32x16xf32>, i32 -> vector<32x16xf32>
    %496 = arith.addf %494, %495 : vector<32x16xf32>
    %cst_267 = arith.constant 0.274068624 : f32
    %497 = vector.broadcast %cst_267 : f32 to vector<32x16xf32>
    %498 = arith.mulf %497, %496 : vector<32x16xf32>
    %cst_268 = arith.constant 0.451862752 : f32
    %499 = vector.broadcast %cst_268 : f32 to vector<32x16xf32>
    %500 = arith.mulf %499, %493 : vector<32x16xf32>
    %501 = arith.addf %498, %500 : vector<32x16xf32>
    %cst_269 = arith.constant 0.000000e+00 : f32
    %502 = vector.broadcast %cst_269 : f32 to vector<32x16xf32>
    %503 = arith.select %9, %501, %502 : vector<32x16xi1>, vector<32x16xf32>
    %504 = vector.extract_strided_slice %503 {offsets = [8, 0], sizes = [16, 16], strides = [1, 1]} : vector<32x16xf32> to vector<16x16xf32>
    %c1_270 = arith.constant 1 : index
    %c2_271 = arith.constant 2 : index
    %c0_272 = arith.constant 0 : index
    %c0_273 = arith.constant 0 : index
    %505 = vector.load %arg3[%c1_270, %c2_271, %c0_272, %c0_273] : memref<2x4x16x16xf32, #tpu.memory_space<vmem>>, vector<1x1x16x16xf32>
    %506 = vector.shape_cast %505 : vector<1x1x16x16xf32> to vector<16x16xf32>
    %507 = vector.shape_cast %504 : vector<16x16xf32> to vector<1x1x16x16xf32>
    tpu.vector_store %arg3[%c1_270, %c2_271, %c0_272, %c0_273], %507 {strides = array<i32>} : memref<2x4x16x16xf32, #tpu.memory_space<vmem>>, vector<1x1x16x16xf32>,
    %c1_i32_274 = arith.constant 1 : i32
    %508 = tpu.dynamic_rotate %503 by %c1_i32_274 dim 1 : vector<32x16xf32>, i32 -> vector<32x16xf32>
    %cst_275 = arith.constant 0.000000e+00 : f32
    %509 = vector.broadcast %cst_275 : f32 to vector<32x16xf32>
    %510 = arith.select %14, %508, %509 : vector<32x16xi1>, vector<32x16xf32>
    %c15_i32_276 = arith.constant 15 : i32
    %511 = tpu.dynamic_rotate %503 by %c15_i32_276 dim 1 : vector<32x16xf32>, i32 -> vector<32x16xf32>
    %cst_277 = arith.constant 0.000000e+00 : f32
    %512 = vector.broadcast %cst_277 : f32 to vector<32x16xf32>
    %513 = arith.select %12, %511, %512 : vector<32x16xi1>, vector<32x16xf32>
    %514 = arith.subf %513, %510 : vector<32x16xf32>
    %515 = arith.addf %510, %513 : vector<32x16xf32>
    %cst_278 = arith.constant 5.000000e-01 : f32
    %516 = vector.broadcast %cst_278 : f32 to vector<32x16xf32>
    %517 = arith.mulf %516, %515 : vector<32x16xf32>
    %518 = arith.addf %517, %503 : vector<32x16xf32>
    %c1_i32_279 = arith.constant 1 : i32
    %519 = tpu.dynamic_rotate %514 by %c1_i32_279 dim 0 : vector<32x16xf32>, i32 -> vector<32x16xf32>
    %c31_i32_280 = arith.constant 31 : i32
    %520 = tpu.dynamic_rotate %514 by %c31_i32_280 dim 0 : vector<32x16xf32>, i32 -> vector<32x16xf32>
    %521 = arith.addf %519, %520 : vector<32x16xf32>
    %cst_281 = arith.constant 5.000000e-01 : f32
    %522 = vector.broadcast %cst_281 : f32 to vector<32x16xf32>
    %523 = arith.mulf %522, %521 : vector<32x16xf32>
    %524 = arith.addf %523, %514 : vector<32x16xf32>
    %c31_i32_282 = arith.constant 31 : i32
    %525 = tpu.dynamic_rotate %518 by %c31_i32_282 dim 0 : vector<32x16xf32>, i32 -> vector<32x16xf32>
    %c1_i32_283 = arith.constant 1 : i32
    %526 = tpu.dynamic_rotate %518 by %c1_i32_283 dim 0 : vector<32x16xf32>, i32 -> vector<32x16xf32>
    %527 = arith.subf %525, %526 : vector<32x16xf32>
    %528 = arith.addf %473, %524 : vector<32x16xf32>
    %529 = arith.addf %474, %527 : vector<32x16xf32>
    %c1_284 = arith.constant 1 : index
    %c3_285 = arith.constant 3 : index
    %c0_286 = arith.constant 0 : index
    %c0_287 = arith.constant 0 : index
    %530 = vector.load %arg2[%c1_284, %c3_285, %c0_286, %c0_287] : memref<2x4x16x16xf32, #tpu.memory_space<vmem>>, vector<1x1x16x16xf32>
    %531 = vector.shape_cast %530 : vector<1x1x16x16xf32> to vector<16x16xf32>
    %cst_288 = arith.constant 0.000000e+00 : f32
    %532 = vector.broadcast %cst_288 : f32 to vector<8x16xf32>
    %cst_289 = arith.constant 0.000000e+00 : f32
    %533 = vector.broadcast %cst_289 : f32 to vector<8x16xf32>
    %534 = tpu.concatenate %532, %531, %533 in 0 : vector<8x16xf32>, vector<16x16xf32>, vector<8x16xf32> -> vector<32x16xf32>
    %cst_290 = arith.constant 0.000000e+00 : f32
    %535 = vector.broadcast %cst_290 : f32 to vector<32x16xf32>
    %536 = arith.select %9, %534, %535 : vector<32x16xi1>, vector<32x16xf32>
    %c1_i32_291 = arith.constant 1 : i32
    %537 = tpu.dynamic_rotate %536 by %c1_i32_291 dim 1 : vector<32x16xf32>, i32 -> vector<32x16xf32>
    %cst_292 = arith.constant 0.000000e+00 : f32
    %538 = vector.broadcast %cst_292 : f32 to vector<32x16xf32>
    %539 = arith.select %14, %537, %538 : vector<32x16xi1>, vector<32x16xf32>
    %c15_i32_293 = arith.constant 15 : i32
    %540 = tpu.dynamic_rotate %536 by %c15_i32_293 dim 1 : vector<32x16xf32>, i32 -> vector<32x16xf32>
    %cst_294 = arith.constant 0.000000e+00 : f32
    %541 = vector.broadcast %cst_294 : f32 to vector<32x16xf32>
    %542 = arith.select %12, %540, %541 : vector<32x16xi1>, vector<32x16xf32>
    %543 = arith.addf %539, %542 : vector<32x16xf32>
    %cst_295 = arith.constant 0.00107477885 : f32
    %544 = vector.broadcast %cst_295 : f32 to vector<32x16xf32>
    %545 = arith.mulf %544, %543 : vector<32x16xf32>
    %cst_296 = arith.constant 0.00177201082 : f32
    %546 = vector.broadcast %cst_296 : f32 to vector<32x16xf32>
    %547 = arith.mulf %546, %536 : vector<32x16xf32>
    %548 = arith.addf %545, %547 : vector<32x16xf32>
    %c1_i32_297 = arith.constant 1 : i32
    %549 = tpu.dynamic_rotate %548 by %c1_i32_297 dim 0 : vector<32x16xf32>, i32 -> vector<32x16xf32>
    %c31_i32_298 = arith.constant 31 : i32
    %550 = tpu.dynamic_rotate %548 by %c31_i32_298 dim 0 : vector<32x16xf32>, i32 -> vector<32x16xf32>
    %551 = arith.addf %549, %550 : vector<32x16xf32>
    %cst_299 = arith.constant 0.274068624 : f32
    %552 = vector.broadcast %cst_299 : f32 to vector<32x16xf32>
    %553 = arith.mulf %552, %551 : vector<32x16xf32>
    %cst_300 = arith.constant 0.451862752 : f32
    %554 = vector.broadcast %cst_300 : f32 to vector<32x16xf32>
    %555 = arith.mulf %554, %548 : vector<32x16xf32>
    %556 = arith.addf %553, %555 : vector<32x16xf32>
    %cst_301 = arith.constant 0.000000e+00 : f32
    %557 = vector.broadcast %cst_301 : f32 to vector<32x16xf32>
    %558 = arith.select %9, %556, %557 : vector<32x16xi1>, vector<32x16xf32>
    %559 = vector.extract_strided_slice %558 {offsets = [8, 0], sizes = [16, 16], strides = [1, 1]} : vector<32x16xf32> to vector<16x16xf32>
    %c1_302 = arith.constant 1 : index
    %c3_303 = arith.constant 3 : index
    %c0_304 = arith.constant 0 : index
    %c0_305 = arith.constant 0 : index
    %560 = vector.load %arg3[%c1_302, %c3_303, %c0_304, %c0_305] : memref<2x4x16x16xf32, #tpu.memory_space<vmem>>, vector<1x1x16x16xf32>
    %561 = vector.shape_cast %560 : vector<1x1x16x16xf32> to vector<16x16xf32>
    %562 = vector.shape_cast %559 : vector<16x16xf32> to vector<1x1x16x16xf32>
    tpu.vector_store %arg3[%c1_302, %c3_303, %c0_304, %c0_305], %562 {strides = array<i32>} : memref<2x4x16x16xf32, #tpu.memory_space<vmem>>, vector<1x1x16x16xf32>,
    %c1_i32_306 = arith.constant 1 : i32
    %563 = tpu.dynamic_rotate %558 by %c1_i32_306 dim 1 : vector<32x16xf32>, i32 -> vector<32x16xf32>
    %cst_307 = arith.constant 0.000000e+00 : f32
    %564 = vector.broadcast %cst_307 : f32 to vector<32x16xf32>
    %565 = arith.select %14, %563, %564 : vector<32x16xi1>, vector<32x16xf32>
    %c15_i32_308 = arith.constant 15 : i32
    %566 = tpu.dynamic_rotate %558 by %c15_i32_308 dim 1 : vector<32x16xf32>, i32 -> vector<32x16xf32>
    %cst_309 = arith.constant 0.000000e+00 : f32
    %567 = vector.broadcast %cst_309 : f32 to vector<32x16xf32>
    %568 = arith.select %12, %566, %567 : vector<32x16xi1>, vector<32x16xf32>
    %569 = arith.subf %568, %565 : vector<32x16xf32>
    %570 = arith.addf %565, %568 : vector<32x16xf32>
    %cst_310 = arith.constant 5.000000e-01 : f32
    %571 = vector.broadcast %cst_310 : f32 to vector<32x16xf32>
    %572 = arith.mulf %571, %570 : vector<32x16xf32>
    %573 = arith.addf %572, %558 : vector<32x16xf32>
    %c1_i32_311 = arith.constant 1 : i32
    %574 = tpu.dynamic_rotate %569 by %c1_i32_311 dim 0 : vector<32x16xf32>, i32 -> vector<32x16xf32>
    %c31_i32_312 = arith.constant 31 : i32
    %575 = tpu.dynamic_rotate %569 by %c31_i32_312 dim 0 : vector<32x16xf32>, i32 -> vector<32x16xf32>
    %576 = arith.addf %574, %575 : vector<32x16xf32>
    %cst_313 = arith.constant 5.000000e-01 : f32
    %577 = vector.broadcast %cst_313 : f32 to vector<32x16xf32>
    %578 = arith.mulf %577, %576 : vector<32x16xf32>
    %579 = arith.addf %578, %569 : vector<32x16xf32>
    %c31_i32_314 = arith.constant 31 : i32
    %580 = tpu.dynamic_rotate %573 by %c31_i32_314 dim 0 : vector<32x16xf32>, i32 -> vector<32x16xf32>
    %c1_i32_315 = arith.constant 1 : i32
    %581 = tpu.dynamic_rotate %573 by %c1_i32_315 dim 0 : vector<32x16xf32>, i32 -> vector<32x16xf32>
    %582 = arith.subf %580, %581 : vector<32x16xf32>
    %583 = arith.addf %528, %579 : vector<32x16xf32>
    %584 = arith.addf %529, %582 : vector<32x16xf32>
    %cst_316 = arith.constant 2.500000e-01 : f32
    %585 = vector.broadcast %cst_316 : f32 to vector<32x16xf32>
    %586 = arith.mulf %583, %585 : vector<32x16xf32>
    %cst_317 = arith.constant 2.500000e-01 : f32
    %587 = vector.broadcast %cst_317 : f32 to vector<32x16xf32>
    %588 = arith.mulf %584, %587 : vector<32x16xf32>
    %589 = arith.mulf %586, %586 : vector<32x16xf32>
    %590 = arith.mulf %588, %588 : vector<32x16xf32>
    %591 = arith.addf %589, %590 : vector<32x16xf32>
    %592 = math.sqrt %591 : vector<32x16xf32>
    %cst_318 = arith.constant 0.000000e+00 : f32
    %593 = vector.broadcast %cst_318 : f32 to vector<32x16xf32>
    %594 = arith.select %9, %592, %593 : vector<32x16xi1>, vector<32x16xf32>
    %595 = vector.extract_strided_slice %586 {offsets = [8, 0], sizes = [16, 16], strides = [1, 1]} : vector<32x16xf32> to vector<16x16xf32>
    %c1_319 = arith.constant 1 : index
    %c0_320 = arith.constant 0 : index
    %c0_321 = arith.constant 0 : index
    %c0_322 = arith.constant 0 : index
    %596 = vector.load %arg4[%c1_319, %c0_320, %c0_321, %c0_322] : memref<2x1x16x16xf32, #tpu.memory_space<vmem>>, vector<1x1x16x16xf32>
    %597 = vector.shape_cast %596 : vector<1x1x16x16xf32> to vector<16x16xf32>
    %598 = vector.shape_cast %595 : vector<16x16xf32> to vector<1x1x16x16xf32>
    tpu.vector_store %arg4[%c1_319, %c0_320, %c0_321, %c0_322], %598 {strides = array<i32>} : memref<2x1x16x16xf32, #tpu.memory_space<vmem>>, vector<1x1x16x16xf32>,
    %599 = vector.extract_strided_slice %588 {offsets = [8, 0], sizes = [16, 16], strides = [1, 1]} : vector<32x16xf32> to vector<16x16xf32>
    %c1_323 = arith.constant 1 : index
    %c0_324 = arith.constant 0 : index
    %c0_325 = arith.constant 0 : index
    %c0_326 = arith.constant 0 : index
    %600 = vector.load %arg5[%c1_323, %c0_324, %c0_325, %c0_326] : memref<2x1x16x16xf32, #tpu.memory_space<vmem>>, vector<1x1x16x16xf32>
    %601 = vector.shape_cast %600 : vector<1x1x16x16xf32> to vector<16x16xf32>
    %602 = vector.shape_cast %599 : vector<16x16xf32> to vector<1x1x16x16xf32>
    tpu.vector_store %arg5[%c1_323, %c0_324, %c0_325, %c0_326], %602 {strides = array<i32>} : memref<2x1x16x16xf32, #tpu.memory_space<vmem>>, vector<1x1x16x16xf32>,
    %603 = vector.extract_strided_slice %594 {offsets = [8, 0], sizes = [16, 16], strides = [1, 1]} : vector<32x16xf32> to vector<16x16xf32>
    %c1_327 = arith.constant 1 : index
    %c0_328 = arith.constant 0 : index
    %c0_329 = arith.constant 0 : index
    %c0_330 = arith.constant 0 : index
    %604 = vector.load %arg6[%c1_327, %c0_328, %c0_329, %c0_330] : memref<2x1x16x16xf32, #tpu.memory_space<vmem>>, vector<1x1x16x16xf32>
    %605 = vector.shape_cast %604 : vector<1x1x16x16xf32> to vector<16x16xf32>
    %606 = vector.shape_cast %603 : vector<16x16xf32> to vector<1x1x16x16xf32>
    tpu.vector_store %arg6[%c1_327, %c0_328, %c0_329, %c0_330], %606 {strides = array<i32>} : memref<2x1x16x16xf32, #tpu.memory_space<vmem>>, vector<1x1x16x16xf32>,
    %607 = math.absf %586 : vector<32x16xf32>
    %608 = math.absf %588 : vector<32x16xf32>
    %cst_331 = arith.constant 0.414213568 : f32
    %609 = vector.broadcast %cst_331 : f32 to vector<32x16xf32>
    %610 = arith.mulf %609, %607 : vector<32x16xf32>
    %611 = arith.cmpf ole, %608, %610 : vector<32x16xf32>
    %cst_332 = arith.constant 0.414213568 : f32
    %612 = vector.broadcast %cst_332 : f32 to vector<32x16xf32>
    %613 = arith.mulf %612, %608 : vector<32x16xf32>
    %614 = arith.cmpf ole, %607, %613 : vector<32x16xf32>
    %cst_333 = arith.constant 0.000000e+00 : f32
    %615 = vector.broadcast %cst_333 : f32 to vector<32x16xf32>
    %616 = arith.cmpf oge, %586, %615 : vector<32x16xf32>
    %cst_334 = arith.constant 4.000000e+00 : f32
    %cst_335 = arith.constant 0.000000e+00 : f32
    %617 = vector.broadcast %cst_334 : f32 to vector<32x16xf32>
    %618 = vector.broadcast %cst_335 : f32 to vector<32x16xf32>
    %619 = arith.select %616, %617, %618 : vector<32x16xi1>, vector<32x16xf32>
    %cst_336 = arith.constant 0.000000e+00 : f32
    %620 = vector.broadcast %cst_336 : f32 to vector<32x16xf32>
    %621 = arith.cmpf oge, %588, %620 : vector<32x16xf32>
    %cst_337 = arith.constant 6.000000e+00 : f32
    %cst_338 = arith.constant 2.000000e+00 : f32
    %622 = vector.broadcast %cst_337 : f32 to vector<32x16xf32>
    %623 = vector.broadcast %cst_338 : f32 to vector<32x16xf32>
    %624 = arith.select %621, %622, %623 : vector<32x16xi1>, vector<32x16xf32>
    %cst_339 = arith.constant 0.000000e+00 : f32
    %625 = vector.broadcast %cst_339 : f32 to vector<32x16xf32>
    %626 = arith.cmpf oge, %586, %625 : vector<32x16xf32>
    %cst_340 = arith.constant 0.000000e+00 : f32
    %627 = vector.broadcast %cst_340 : f32 to vector<32x16xf32>
    %628 = arith.cmpf oge, %588, %627 : vector<32x16xf32>
    %cst_341 = arith.constant 5.000000e+00 : f32
    %cst_342 = arith.constant 3.000000e+00 : f32
    %629 = vector.broadcast %cst_341 : f32 to vector<32x16xf32>
    %630 = vector.broadcast %cst_342 : f32 to vector<32x16xf32>
    %631 = arith.select %628, %629, %630 : vector<32x16xi1>, vector<32x16xf32>
    %cst_343 = arith.constant 0.000000e+00 : f32
    %632 = vector.broadcast %cst_343 : f32 to vector<32x16xf32>
    %633 = arith.cmpf oge, %588, %632 : vector<32x16xf32>
    %cst_344 = arith.constant 7.000000e+00 : f32
    %cst_345 = arith.constant 1.000000e+00 : f32
    %634 = vector.broadcast %cst_344 : f32 to vector<32x16xf32>
    %635 = vector.broadcast %cst_345 : f32 to vector<32x16xf32>
    %636 = arith.select %633, %634, %635 : vector<32x16xi1>, vector<32x16xf32>
    %637 = arith.select %626, %631, %636 : vector<32x16xi1>, vector<32x16xf32>
    %638 = arith.select %614, %624, %637 : vector<32x16xi1>, vector<32x16xf32>
    %639 = arith.select %611, %619, %638 : vector<32x16xi1>, vector<32x16xf32>
    %cst_346 = arith.constant 4.500000e+01 : f32
    %640 = vector.broadcast %cst_346 : f32 to vector<32x16xf32>
    %641 = arith.mulf %639, %640 : vector<32x16xf32>
    %642 = vector.extract_strided_slice %641 {offsets = [8, 0], sizes = [16, 16], strides = [1, 1]} : vector<32x16xf32> to vector<16x16xf32>
    %c1_347 = arith.constant 1 : index
    %c0_348 = arith.constant 0 : index
    %c0_349 = arith.constant 0 : index
    %c0_350 = arith.constant 0 : index
    %643 = vector.load %arg7[%c1_347, %c0_348, %c0_349, %c0_350] : memref<2x1x16x16xf32, #tpu.memory_space<vmem>>, vector<1x1x16x16xf32>
    %644 = vector.shape_cast %643 : vector<1x1x16x16xf32> to vector<16x16xf32>
    %645 = vector.shape_cast %642 : vector<16x16xf32> to vector<1x1x16x16xf32>
    tpu.vector_store %arg7[%c1_347, %c0_348, %c0_349, %c0_350], %645 {strides = array<i32>} : memref<2x1x16x16xf32, #tpu.memory_space<vmem>>, vector<1x1x16x16xf32>,
    %c1_i32_351 = arith.constant 1 : i32
    %646 = tpu.dynamic_rotate %594 by %c1_i32_351 dim 0 : vector<32x16xf32>, i32 -> vector<32x16xf32>
    %c31_i32_352 = arith.constant 31 : i32
    %647 = tpu.dynamic_rotate %594 by %c31_i32_352 dim 0 : vector<32x16xf32>, i32 -> vector<32x16xf32>
    %c15_i32_353 = arith.constant 15 : i32
    %648 = tpu.dynamic_rotate %594 by %c15_i32_353 dim 1 : vector<32x16xf32>, i32 -> vector<32x16xf32>
    %cst_354 = arith.constant 0.000000e+00 : f32
    %649 = vector.broadcast %cst_354 : f32 to vector<32x16xf32>
    %650 = arith.select %12, %648, %649 : vector<32x16xi1>, vector<32x16xf32>
    %651 = arith.subf %594, %650 : vector<32x16xf32>
    %c1_i32_355 = arith.constant 1 : i32
    %652 = tpu.dynamic_rotate %594 by %c1_i32_355 dim 1 : vector<32x16xf32>, i32 -> vector<32x16xf32>
    %cst_356 = arith.constant 0.000000e+00 : f32
    %653 = vector.broadcast %cst_356 : f32 to vector<32x16xf32>
    %654 = arith.select %14, %652, %653 : vector<32x16xi1>, vector<32x16xf32>
    %655 = arith.subf %594, %654 : vector<32x16xf32>
    %656 = arith.minimumf %651, %655 : vector<32x16xf32>
    %cst_357 = arith.constant 0.000000e+00 : f32
    %657 = vector.broadcast %cst_357 : f32 to vector<32x16xf32>
    %658 = arith.cmpf ole, %656, %657 : vector<32x16xf32>
    %cst_358 = arith.constant 0.000000e+00 : f32
    %659 = vector.broadcast %cst_358 : f32 to vector<32x16xf32>
    %660 = arith.cmpf oeq, %639, %659 : vector<32x16xf32>
    %cst_359 = arith.constant 4.000000e+00 : f32
    %661 = vector.broadcast %cst_359 : f32 to vector<32x16xf32>
    %662 = arith.cmpf oeq, %639, %661 : vector<32x16xf32>
    %663 = arith.ori %660, %662 : vector<32x16xi1>
    %664 = arith.andi %658, %663 : vector<32x16xi1>
    %c15_i32_360 = arith.constant 15 : i32
    %665 = tpu.dynamic_rotate %646 by %c15_i32_360 dim 1 : vector<32x16xf32>, i32 -> vector<32x16xf32>
    %cst_361 = arith.constant 0.000000e+00 : f32
    %666 = vector.broadcast %cst_361 : f32 to vector<32x16xf32>
    %667 = arith.select %12, %665, %666 : vector<32x16xi1>, vector<32x16xf32>
    %668 = arith.subf %594, %667 : vector<32x16xf32>
    %c1_i32_362 = arith.constant 1 : i32
    %669 = tpu.dynamic_rotate %647 by %c1_i32_362 dim 1 : vector<32x16xf32>, i32 -> vector<32x16xf32>
    %cst_363 = arith.constant 0.000000e+00 : f32
    %670 = vector.broadcast %cst_363 : f32 to vector<32x16xf32>
    %671 = arith.select %14, %669, %670 : vector<32x16xi1>, vector<32x16xf32>
    %672 = arith.subf %594, %671 : vector<32x16xf32>
    %673 = arith.minimumf %668, %672 : vector<32x16xf32>
    %cst_364 = arith.constant 0.000000e+00 : f32
    %674 = vector.broadcast %cst_364 : f32 to vector<32x16xf32>
    %675 = arith.cmpf ole, %673, %674 : vector<32x16xf32>
    %cst_365 = arith.constant 1.000000e+00 : f32
    %676 = vector.broadcast %cst_365 : f32 to vector<32x16xf32>
    %677 = arith.cmpf oeq, %639, %676 : vector<32x16xf32>
    %cst_366 = arith.constant 5.000000e+00 : f32
    %678 = vector.broadcast %cst_366 : f32 to vector<32x16xf32>
    %679 = arith.cmpf oeq, %639, %678 : vector<32x16xf32>
    %680 = arith.ori %677, %679 : vector<32x16xi1>
    %681 = arith.andi %675, %680 : vector<32x16xi1>
    %682 = arith.ori %664, %681 : vector<32x16xi1>
    %683 = arith.subf %594, %646 : vector<32x16xf32>
    %684 = arith.subf %594, %647 : vector<32x16xf32>
    %685 = arith.minimumf %683, %684 : vector<32x16xf32>
    %cst_367 = arith.constant 0.000000e+00 : f32
    %686 = vector.broadcast %cst_367 : f32 to vector<32x16xf32>
    %687 = arith.cmpf ole, %685, %686 : vector<32x16xf32>
    %cst_368 = arith.constant 2.000000e+00 : f32
    %688 = vector.broadcast %cst_368 : f32 to vector<32x16xf32>
    %689 = arith.cmpf oeq, %639, %688 : vector<32x16xf32>
    %cst_369 = arith.constant 6.000000e+00 : f32
    %690 = vector.broadcast %cst_369 : f32 to vector<32x16xf32>
    %691 = arith.cmpf oeq, %639, %690 : vector<32x16xf32>
    %692 = arith.ori %689, %691 : vector<32x16xi1>
    %693 = arith.andi %687, %692 : vector<32x16xi1>
    %694 = arith.ori %682, %693 : vector<32x16xi1>
    %c1_i32_370 = arith.constant 1 : i32
    %695 = tpu.dynamic_rotate %646 by %c1_i32_370 dim 1 : vector<32x16xf32>, i32 -> vector<32x16xf32>
    %cst_371 = arith.constant 0.000000e+00 : f32
    %696 = vector.broadcast %cst_371 : f32 to vector<32x16xf32>
    %697 = arith.select %14, %695, %696 : vector<32x16xi1>, vector<32x16xf32>
    %698 = arith.subf %594, %697 : vector<32x16xf32>
    %c15_i32_372 = arith.constant 15 : i32
    %699 = tpu.dynamic_rotate %647 by %c15_i32_372 dim 1 : vector<32x16xf32>, i32 -> vector<32x16xf32>
    %cst_373 = arith.constant 0.000000e+00 : f32
    %700 = vector.broadcast %cst_373 : f32 to vector<32x16xf32>
    %701 = arith.select %12, %699, %700 : vector<32x16xi1>, vector<32x16xf32>
    %702 = arith.subf %594, %701 : vector<32x16xf32>
    %703 = arith.minimumf %698, %702 : vector<32x16xf32>
    %cst_374 = arith.constant 0.000000e+00 : f32
    %704 = vector.broadcast %cst_374 : f32 to vector<32x16xf32>
    %705 = arith.cmpf ole, %703, %704 : vector<32x16xf32>
    %cst_375 = arith.constant 3.000000e+00 : f32
    %706 = vector.broadcast %cst_375 : f32 to vector<32x16xf32>
    %707 = arith.cmpf oeq, %639, %706 : vector<32x16xf32>
    %cst_376 = arith.constant 7.000000e+00 : f32
    %708 = vector.broadcast %cst_376 : f32 to vector<32x16xf32>
    %709 = arith.cmpf oeq, %639, %708 : vector<32x16xf32>
    %710 = arith.ori %707, %709 : vector<32x16xi1>
    %711 = arith.andi %705, %710 : vector<32x16xi1>
    %712 = arith.ori %694, %711 : vector<32x16xi1>
    %cst_377 = arith.constant 0.000000e+00 : f32
    %713 = vector.broadcast %cst_377 : f32 to vector<32x16xf32>
    %714 = arith.select %712, %713, %594 : vector<32x16xi1>, vector<32x16xf32>
    %715 = vector.extract_strided_slice %714 {offsets = [8, 0], sizes = [16, 16], strides = [1, 1]} : vector<32x16xf32> to vector<16x16xf32>
    %c1_378 = arith.constant 1 : index
    %c0_379 = arith.constant 0 : index
    %c0_380 = arith.constant 0 : index
    %c0_381 = arith.constant 0 : index
    %716 = vector.load %arg8[%c1_378, %c0_379, %c0_380, %c0_381] : memref<2x1x16x16xf32, #tpu.memory_space<vmem>>, vector<1x1x16x16xf32>
    %717 = vector.shape_cast %716 : vector<1x1x16x16xf32> to vector<16x16xf32>
    %718 = vector.shape_cast %715 : vector<16x16xf32> to vector<1x1x16x16xf32>
    tpu.vector_store %arg8[%c1_378, %c0_379, %c0_380, %c0_381], %718 {strides = array<i32>} : memref<2x1x16x16xf32, #tpu.memory_space<vmem>>, vector<1x1x16x16xf32>,
    return
  }
  func.func @transform_0(%arg0: i32, %arg1: i32) -> (i32, i32, i32, i32) {
    %c0_i32 = arith.constant 0 : i32
    %c0_i32_0 = arith.constant 0 : i32
    %c0_i32_1 = arith.constant 0 : i32
    return %arg0, %c0_i32, %arg1, %c0_i32_0 : i32, i32, i32, i32
  }
  func.func @transform_1(%arg0: i32, %arg1: i32) -> (i32, i32, i32, i32) {
    %c0_i32 = arith.constant 0 : i32
    %c0_i32_0 = arith.constant 0 : i32
    %c0_i32_1 = arith.constant 0 : i32
    return %arg0, %c0_i32, %arg1, %c0_i32_0 : i32, i32, i32, i32
  }
  func.func @transform_2(%arg0: i32, %arg1: i32) -> (i32, i32, i32, i32) {
    %c0_i32 = arith.constant 0 : i32
    %c0_i32_0 = arith.constant 0 : i32
    %c0_i32_1 = arith.constant 0 : i32
    return %arg0, %c0_i32, %arg1, %c0_i32_0 : i32, i32, i32, i32
  }
  func.func @transform_3(%arg0: i32, %arg1: i32) -> (i32, i32, i32, i32) {
    %c0_i32 = arith.constant 0 : i32
    %c0_i32_0 = arith.constant 0 : i32
    %c0_i32_1 = arith.constant 0 : i32
    return %arg0, %c0_i32, %arg1, %c0_i32_0 : i32, i32, i32, i32
  }
  func.func @transform_4(%arg0: i32, %arg1: i32) -> (i32, i32, i32, i32) {
    %c0_i32 = arith.constant 0 : i32
    %c0_i32_0 = arith.constant 0 : i32
    %c0_i32_1 = arith.constant 0 : i32
    return %arg0, %c0_i32, %arg1, %c0_i32_0 : i32, i32, i32, i32
  }
  func.func @transform_5(%arg0: i32, %arg1: i32) -> (i32, i32, i32, i32) {
    %c0_i32 = arith.constant 0 : i32
    %c0_i32_0 = arith.constant 0 : i32
    %c0_i32_1 = arith.constant 0 : i32
    return %arg0, %c0_i32, %arg1, %c0_i32_0 : i32, i32, i32, i32
  }
  func.func @transform_6(%arg0: i32, %arg1: i32) -> (i32, i32, i32, i32) {
    %c0_i32 = arith.constant 0 : i32
    %c0_i32_0 = arith.constant 0 : i32
    %c0_i32_1 = arith.constant 0 : i32
    return %arg0, %c0_i32, %arg1, %c0_i32_0 : i32, i32, i32, i32
  }
}

</mosaic_0001>

<bundles_post_ra>
// kernel: tpu_custom_call.1
= control target key start
LH: loop header
LB: loop body
LE: loop exit
PB: predicated region body
PF: predicated region fallthrough
CT: control target
= control target key end

     0   :  { %12 = vsyncpa [#allocation3], 0  ;;  %s4874_s0 = inlined_call_operand.hbm [shape: f32[2,4,16,16], index: 0, kind: input, shape index: {}]   ;;  %s4875_s1 = inlined_call_operand.hbm [shape: f32[2,4,16,16], index: 1, kind: output, shape index: {0}]   ;;  %s4876_s2 = inlined_call_operand.hbm [shape: f32[2,1,16,16], index: 2, kind: output, shape index: {1}]   ;;  %s4877_s3 = inlined_call_operand.hbm [shape: f32[2,1,16,16], index: 3, kind: output, shape index: {2}]   ;;  %s4878_s4 = inlined_call_operand.hbm [shape: f32[2,1,16,16], index: 4, kind: output, shape index: {3}]   ;;  %s4879_s5 = inlined_call_operand.hbm [shape: f32[2,1,16,16], index: 5, kind: output, shape index: {4}]   ;;  %s4880_s6 = inlined_call_operand.hbm [shape: f32[2,1,16,16], index: 6, kind: output, shape index: {5}]  }
   0x1   :  { %13 = vsyncpa [#allocation4], 0 }
   0x2   :  { %14 = vsyncpa [#allocation7], 0 }
   0x3   :  { %15 = vsyncpa [#allocation10], 0 }
   0x4   :  { %16 = vsyncpa [#allocation13], 0  ;;  %s2695_s21 = smov [#allocation2]   ;;  %s2531_s25 = scalar_lea.hbm %s4874_s0, 2048 }
   0x5   :  { %s22_s22 = sshll.u32 %s2695_s21, 4  ;;  %p2532_p0 = scmp.ne.s32.totalorder %s4874_s0, %s2531_s25  ;;  %s23_s22 = int_to_ptr.vmem [resolvable:$true] %s22_s22 }
   0x6   :  { %p2535_p1 = scmp.lt.u32.totalorder %s2531_s25, %s4874_s0 }
   0x8   :  { %p2537_p2 = pnand %p2535_p1, %p2532_p0 }
   0xa   :  { %2540 = shalt.err (!%p2537_p2)
}
   0xb   :  { %s2541_s30 = scalar_lea.vmem %s23_s22, 2048  ;;  %p2546_p4 = scmp.lt.s32.totalorder %s23_s22, %s23_s22 }
   0xc   :  { %p2542_p3 = scmp.ne.s32.totalorder %s23_s22, %s2541_s30  ;;  %p2547_p5 = scmp.lt.s32.totalorder %s2541_s30, %s2541_s30 }
   0xe   :  { %p2548_p6 = por %p2547_p5, %p2546_p4 }
  0x10   :  { %p2549_p7 = pnand %p2548_p6, %p2542_p3 }
  0x12   :  { %2552 = shalt.err (!%p2549_p7)
}
  0x13   :  { %s2696_s7 = smov 128   ;;  %s2697_s8 = smov 8  }
  0x14   :  { %28 = dma.hbm_to_vmem [thread:$0]  %s4874_s0, 2048, %s23_s22, [#allocation3], %s2696_s7, %s2696_s7, %s2697_s8  }
  0x15   :  { %2685 = dma.done.wait [#allocation3], 2048  }
  0x16   :  { %2686 = vsyncadd [#allocation3], 4294965248  ;;  %v2761_v0 = vld [vmem:[#allocation2] sm:$0xff]  ;;  %s2698_s11 = smov 16   ;;  %v2765_v1 = vld [vmem:[#allocation2 + $0x10] sm:$0xff]  ;;  %v4881_v9 = vmov 0.0  }
  0x17   :  { %68 = vrot.lane.b32.xlu0 %v2761_v0, %s2698_s11  ;;  %v2767_v2 = vld [vmem:[#allocation2 + $0x8] sm:$0xff]  ;;  %286 = vrot.lane.b32.xlu1 %v2765_v1, %s2698_s11  ;;  %v2771_v3 = vld [vmem:[#allocation2 + $0x18] sm:$0xff]  ;;  %v2775_v4 = vld [vmem:[#allocation2 + $0x40] sm:$0xff]  ;;  %vm64_vm0 = vcmask 1047680   ;;  %s2700_s0 = smov 113   ;;  %s2701_s12 = smov 127  }
  0x18   :  { %v2779_v5 = vld [vmem:[#allocation2 + $0x48] sm:$0xff]  ;;  %v2783_v6 = vld [vmem:[#allocation2 + $0x50] sm:$0xff]  ;;  %v2787_v7 = vld [vmem:[#allocation2 + $0x58] sm:$0xff]  ;;  %vm4899_vm5 = vcmask 130048   ;;  %s2705_s13 = smov [#allocation6]   ;;  %s2706_s15 = smov [#allocation9]  }
  0x19   :  { %v2793_v8 = vld [vmem:[#allocation2 + $0x20] sm:$0xff]  ;;  %v2799_v10 = vld [vmem:[#allocation2 + $0x28] sm:$0xff]  ;;  %v2809_v13 = vld [vmem:[#allocation2 + $0x30] sm:$0xff]  ;;  %s2269_s14 = sshll.u32 %s2705_s13, 4  ;;  %s2293_s16 = sshll.u32 %s2706_s15, 4  ;;  %s2270_s14 = int_to_ptr.vmem [resolvable:$true] %s2269_s14  ;;  %s4387_s16 = int_to_ptr.vmem [resolvable:$true] %s2293_s16 }
  0x1a   :  { %v2801_v11 = vld [vmem:[#allocation2 + $0x60] sm:$0xff]  ;;  %v2807_v12 = vld [vmem:[#allocation2 + $0x68] sm:$0xff]  ;;  %v2815_v14 = vld [vmem:[#allocation2 + $0x38] sm:$0xff]  ;;  %s2553_s17 = scalar_lea.vmem %s2270_s14, 512  ;;  %p2558_p9 = scmp.lt.s32.totalorder %s2270_s14, %s2270_s14 }
  0x1b   :  { %71 = vrot.lane.b32.xlu0 %v2767_v2, %s2698_s11  ;;  %289 = vrot.lane.b32.xlu1 %v2771_v3, %s2698_s11  ;;  %v2817_v15 = vld [vmem:[#allocation2 + $0x70] sm:$0xff]  ;;  %v2823_v16 = vld [vmem:[#allocation2 + $0x78] sm:$0xff]  ;;  %p2554_p8 = scmp.ne.s32.totalorder %s2270_s14, %s2553_s17  ;;  %p2559_p10 = scmp.lt.s32.totalorder %s2553_s17, %s2553_s17 }
  0x1d   :  { %p2560_p11 = por %p2559_p10, %p2558_p9 }
  0x1f   :  { %1170 = vrot.lane.b32.xlu0 %v2775_v4, %s2698_s11  ;;  %1173 = vrot.lane.b32.xlu1 %v2779_v5, %s2698_s11  ;;  %p2561_p12 = pnand %p2560_p11, %p2554_p8 }
  0x23   :  { %1368 = vrot.lane.b32.xlu0 %v2783_v6, %s2698_s11  ;;  %1371 = vrot.lane.b32.xlu1 %v2787_v7, %s2698_s11 }
  0x27   :  { %65 = vrot.lane.b32.xlu0 %v4881_v9, %s2698_s11  ;;  %492 = vrot.lane.b32.xlu1 %v2793_v8, %s2698_s11 }
  0x2b   :  { %495 = vrot.lane.b32.xlu0 %v2799_v10, %s2698_s11  ;;  %1574 = vrot.lane.b32.xlu1 %v2801_v11, %s2698_s11 }
  0x2f   :  { %1577 = vrot.lane.b32.xlu0 %v2807_v12, %s2698_s11  ;;  %698 = vrot.lane.b32.xlu1 %v2809_v13, %s2698_s11 }
  0x33   :  { %701 = vrot.lane.b32.xlu0 %v2815_v14, %s2698_s11  ;;  %1780 = vrot.lane.b32.xlu1 %v2817_v15, %s2698_s11 }
  0x37   :  { %1783 = vrot.lane.b32.xlu0 %v2823_v16, %s2698_s11 }
  0x89   :  { %v69_v17 = vpop.permute.xlu0 %68  ;;  %v287_v18 = vpop.permute.xlu1 %286 }
  0x8a   :  { %v70_v35 = vsel %vm64_vm0, %v69_v17, %v2761_v0  ;;  %v288_v37 = vsel %vm64_vm0, %v287_v18, %v2765_v1 }
  0x8d   :  { %v72_v19 = vpop.permute.xlu0 %71  ;;  %v290_v21 = vpop.permute.xlu1 %289 }
  0x8e   :  { %v73_v20 = vsel %vm64_vm0, %v72_v19, %v2767_v2  ;;  %v291_v22 = vsel %vm64_vm0, %v290_v21, %v2771_v3 }
  0x8f   :  { %78 = vrot.lane.b32.xlu0 %v73_v20, %s2698_s11 }
  0x91   :  { %v1171_v23 = vpop.permute.xlu0 %1170  ;;  %v1174_v24 = vpop.permute.xlu1 %1173 }
  0x92   :  { %v1175_v25 = vsel %vm64_vm0, %v1174_v24, %v2779_v5  ;;  %v1172_v41 = vsel %vm64_vm0, %v1171_v23, %v2775_v4 }
  0x93   :  { %294 = vrot.lane.b32.xlu0 %v291_v22, %s2698_s11 }
  0x95   :  { %v1369_v26 = vpop.permute.xlu0 %1368  ;;  %v1372_v27 = vpop.permute.xlu1 %1371 }
  0x96   :  { %v1373_v28 = vsel %vm64_vm0, %v1372_v27, %v2787_v7  ;;  %v1370_v44 = vsel %vm64_vm0, %v1369_v26, %v2783_v6 }
  0x97   :  { %1178 = vrot.lane.b32.xlu0 %v1175_v25, %s2698_s11 }
  0x99   :  { %v66_v29 = vpop.permute.xlu0 %65  ;;  %v493_v31 = vpop.permute.xlu1 %492 }
  0x9a   :  { %v67_v30 = vsel %vm64_vm0, %v66_v29, 0.0  ;;  %v494_v33 = vsel %vm64_vm0, %v493_v31, %v2793_v8 }
  0x9b   :  { %v2363_v32 = vpack.i.bf16 %v4881_v9, %v67_v30  ;;  %1376 = vrot.lane.b32.xlu0 %v1373_v28, %s2698_s11 }
  0x9d   :  { %2364 = vrot.lane.b32.xlu1 %v2363_v32, %s2698_s11  ;;  %v1575_v34 = vpop.permute.xlu1 %1574  ;;  %v496_v43 = vpop.permute.xlu0 %495 }
  0x9e   :  { %v1576_v36 = vsel %vm64_vm0, %v1575_v34, %v2801_v11  ;;  %v497_v45 = vsel %vm64_vm0, %v496_v43, %v2799_v10  ;;  %v34_v43 = vlaneseq }
  0x9f   :  { %498 = vrot.lane.b32.xlu0 %v494_v33, %s2698_s11 }
  0xa1   :  { %76 = vrot.lane.b32.xlu1 %v70_v35, %s2698_s11  ;;  %v699_v38 = vpop.permute.xlu1 %698  ;;  %v1578_v46 = vpop.permute.xlu0 %1577 }
  0xa2   :  { %v700_v39 = vsel %vm64_vm0, %v699_v38, %v2809_v13  ;;  %v1579_v47 = vsel %vm64_vm0, %v1578_v46, %v2807_v12 }
  0xa3   :  { %1580 = vrot.lane.b32.xlu0 %v1576_v36, %s2698_s11 }
  0xa5   :  { %292 = vrot.lane.b32.xlu1 %v288_v37, %s2698_s11  ;;  %v1781_v40 = vpop.permute.xlu1 %1780  ;;  %v702_v48 = vpop.permute.xlu0 %701 }
  0xa6   :  { %v1782_v42 = vsel %vm64_vm0, %v1781_v40, %v2817_v15  ;;  %v703_v49 = vsel %vm64_vm0, %v702_v48, %v2815_v14 }
  0xa7   :  { %704 = vrot.lane.b32.xlu0 %v700_v39, %s2698_s11 }
  0xa9   :  { %1176 = vrot.lane.b32.xlu1 %v1172_v41, %s2698_s11  ;;  %v1784_v50 = vpop.permute.xlu0 %1783 }
  0xaa   :  { %v1785_v51 = vsel %vm64_vm0, %v1784_v50, %v2823_v16 }
  0xab   :  { %1786 = vrot.lane.b32.xlu0 %v1782_v42, %s2698_s11 }
  0xad   :  { %1374 = vrot.lane.b32.xlu1 %v1370_v44, %s2698_s11  ;;  %v2966_v44 = vand.u32 127, %v34_v43 }
  0xaf   :  { %vm4898_vm1 = vcmp.le.s32.totalorder %v2966_v44, 14  ;;  %vm4900_vm2 = vcmp.ge.s32.totalorder %v2966_v44, 1 }
  0xb1   :  { %500 = vrot.lane.b32.xlu1 %v497_v45, %s2698_s11 }
  0xb5   :  { %1582 = vrot.lane.b32.xlu1 %v1579_v47, %s2698_s11 }
  0xb9   :  { %706 = vrot.lane.b32.xlu1 %v703_v49, %s2698_s11 }
  0xbd   :  { %1788 = vrot.lane.b32.xlu1 %v1785_v51, %s2698_s11 }
 0x101   :  { %v79_v55 = vpop.permute.xlu0 %78 }
 0x102   :  { %v82_v58 = vsel %vm64_vm0, %v79_v55, %v2767_v2 }
 0x105   :  { %v295_v59 = vpop.permute.xlu0 %294 }
 0x106   :  { %v297_v62 = vsel %vm64_vm0, %v295_v59, %v2771_v3  ;;  %v117_v59 = vmul.f32 0.0017720108, %v2767_v2 }
 0x109   :  { %v1179_v63 = vpop.permute.xlu0 %1178 }
 0x10a   :  { %v1181_v18 = vsel %vm64_vm0, %v1179_v63, %v2779_v5 }
 0x10d   :  { %v1377_v20 = vpop.permute.xlu0 %1376 }
 0x10e   :  { %v1379_v22 = vsel %vm64_vm0, %v1377_v20, %v2787_v7 }
 0x10f   :  { %v2878_v52 = vpop.permute.xlu1 %2364 }
 0x110   :  { %v2366_v53 = vunpack.i.l.bf16 %v2878_v52  ;;  %v2367_v40 = vunpack.i.h.bf16 %v2878_v52  ;;  %v2974_v52 = vshrl.u32 %v34_v43, 7 }
 0x111   :  { %v499_v25 = vpop.permute.xlu0 %498 }
 0x112   :  { %v80_v54 = vsel %vm64_vm0, %v2366_v53, 0.0  ;;  %v502_v27 = vsel %vm64_vm0, %v499_v25, %v2793_v8  ;;  %v159_v41 = vsel %vm64_vm0, %v2367_v40, 0.0  ;;  %vm131_vm3 = vcmp.lt.s32.totalorder %v2974_v52, 7 }
 0x113   :  { %v77_v56 = vpop.permute.xlu1 %76  ;;  %86 = vrot.lane.b32.xlu0 %v80_v54, %s2700_s0  ;;  %98 = vrot.lane.b32.xlu1 %v80_v54, %s2701_s12  ;;  %v2403_v42 = vpack.i.bf16 %v159_v41, %v4881_v9  ;;  %vm124_vm4 = vcmp.lt.s32.totalorder %v2974_v52, 1 }
 0x114   :  { %v81_v57 = vsel %vm64_vm0, %v77_v56, %v2761_v0 }
 0x115   :  { %v1581_v29 = vpop.permute.xlu0 %1580 }
 0x116   :  { %v1584_v31 = vsel %vm64_vm0, %v1581_v29, %v2801_v11 }
 0x117   :  { %88 = vrot.lane.b32.xlu0 %v81_v57, %s2700_s0  ;;  %90 = vrot.lane.b32.xlu1 %v82_v58, %s2700_s0  ;;  %v293_v60 = vpop.permute.xlu1 %292 }
 0x118   :  { %v296_v61 = vsel %vm64_vm0, %v293_v60, %v2765_v1 }
 0x119   :  { %v705_v33 = vpop.permute.xlu0 %704 }
 0x11a   :  { %v708_v35 = vsel %vm64_vm0, %v705_v33, %v2809_v13 }
 0x11b   :  { %100 = vrot.lane.b32.xlu0 %v81_v57, %s2701_s12  ;;  %102 = vrot.lane.b32.xlu1 %v82_v58, %s2701_s12  ;;  %v1177_v17 = vpop.permute.xlu1 %1176 }
 0x11c   :  { %v1180_v19 = vsel %vm64_vm0, %v1177_v17, %v2775_v4 }
 0x11d   :  { %v1787_v37 = vpop.permute.xlu0 %1786 }
 0x11e   :  { %v1790_v39 = vsel %vm64_vm0, %v1787_v37, %v2817_v15 }
 0x11f   :  { %300 = vrot.lane.b32.xlu0 %v296_v61, %s2700_s0  ;;  %302 = vrot.lane.b32.xlu1 %v297_v62, %s2700_s0  ;;  %v1375_v21 = vpop.permute.xlu1 %1374 }
 0x120   :  { %v1378_v23 = vsel %vm64_vm0, %v1375_v21, %v2783_v6 }
 0x123   :  { %308 = vrot.lane.b32.xlu0 %v296_v61, %s2701_s12  ;;  %310 = vrot.lane.b32.xlu1 %v297_v62, %s2701_s12  ;;  %v501_v24 = vpop.permute.xlu1 %500  ;;  %v116_v62 = vmul.f32 0.0017720108, %v2761_v0 }
 0x124   :  { %v503_v26 = vsel %vm64_vm0, %v501_v24, %v2799_v10  ;;  %v321_v24 = vmul.f32 0.0017720108, %v2771_v3 }
 0x127   :  { %1184 = vrot.lane.b32.xlu0 %v1180_v19, %s2700_s0  ;;  %1186 = vrot.lane.b32.xlu1 %v1181_v18, %s2700_s0  ;;  %v1583_v28 = vpop.permute.xlu1 %1582 }
 0x128   :  { %v1585_v30 = vsel %vm64_vm0, %v1583_v28, %v2807_v12 }
 0x12b   :  { %1192 = vrot.lane.b32.xlu0 %v1180_v19, %s2701_s12  ;;  %1194 = vrot.lane.b32.xlu1 %v1181_v18, %s2701_s12  ;;  %v707_v32 = vpop.permute.xlu1 %706 }
 0x12c   :  { %v709_v34 = vsel %vm64_vm0, %v707_v32, %v2815_v14 }
 0x12f   :  { %1382 = vrot.lane.b32.xlu0 %v1378_v23, %s2700_s0  ;;  %1384 = vrot.lane.b32.xlu1 %v1379_v22, %s2700_s0  ;;  %v1789_v36 = vpop.permute.xlu1 %1788 }
 0x130   :  { %v1791_v38 = vsel %vm64_vm0, %v1789_v36, %v2823_v16 }
 0x133   :  { %1390 = vrot.lane.b32.xlu0 %v1378_v23, %s2701_s12  ;;  %1392 = vrot.lane.b32.xlu1 %v1379_v22, %s2701_s12 }
 0x137   :  { %508 = vrot.lane.b32.xlu1 %v503_v26, %s2700_s0  ;;  %506 = vrot.lane.b32.xlu0 %v502_v27, %s2700_s0 }
 0x13b   :  { %516 = vrot.lane.b32.xlu1 %v503_v26, %s2701_s12  ;;  %514 = vrot.lane.b32.xlu0 %v502_v27, %s2701_s12 }
 0x13f   :  { %1590 = vrot.lane.b32.xlu1 %v1585_v30, %s2700_s0  ;;  %1588 = vrot.lane.b32.xlu0 %v1584_v31, %s2700_s0 }
 0x143   :  { %1598 = vrot.lane.b32.xlu1 %v1585_v30, %s2701_s12  ;;  %1596 = vrot.lane.b32.xlu0 %v1584_v31, %s2701_s12 }
 0x147   :  { %714 = vrot.lane.b32.xlu1 %v709_v34, %s2700_s0  ;;  %712 = vrot.lane.b32.xlu0 %v708_v35, %s2700_s0 }
 0x14b   :  { %722 = vrot.lane.b32.xlu1 %v709_v34, %s2701_s12  ;;  %720 = vrot.lane.b32.xlu0 %v708_v35, %s2701_s12 }
 0x14f   :  { %1796 = vrot.lane.b32.xlu1 %v1791_v38, %s2700_s0  ;;  %1794 = vrot.lane.b32.xlu0 %v1790_v39, %s2700_s0 }
 0x153   :  { %1804 = vrot.lane.b32.xlu1 %v1791_v38, %s2701_s12  ;;  %1802 = vrot.lane.b32.xlu0 %v1790_v39, %s2701_s12  ;;  %v320_v38 = vmul.f32 0.0017720108, %v2765_v1 }
 0x157   :  { %2374 = vrot.lane.b32.xlu1 %v4881_v9, %s2698_s11  ;;  %2369 = vrot.lane.b32.xlu0 %v4881_v9, %s2698_s11 }
 0x15b   :  { %2384 = vrot.lane.b32.xlu1 %v4881_v9, %s2698_s11  ;;  %2379 = vrot.lane.b32.xlu0 %v4881_v9, %s2698_s11 }
 0x15f   :  { %2394 = vrot.lane.b32.xlu1 %v4881_v9, %s2698_s11  ;;  %2389 = vrot.lane.b32.xlu0 %v4881_v9, %s2698_s11 }
 0x163   :  { %2404 = vrot.lane.b32.xlu1 %v2403_v42, %s2698_s11  ;;  %2399 = vrot.lane.b32.xlu0 %v4881_v9, %s2698_s11 }
 0x185   :  { %v99_v45 = vpop.permute.xlu1 %98  ;;  %v87_v46 = vpop.permute.xlu0 %86 }
 0x186   :  { %v107_v47 = vsel %vm4898_vm1, %v99_v45, 0.0  ;;  %v95_v48 = vsel %vm4900_vm2, %v87_v46, 0.0 }
 0x187   :  { %v110_v51 = vadd.f32 %v107_v47, %v95_v48 }
 0x189   :  { %v91_v49 = vpop.permute.xlu1 %90  ;;  %v89_v50 = vpop.permute.xlu0 %88  ;;  %v113_v63 = vmul.f32 0.0010747788, %v110_v51 }
 0x18a   :  { %v97_v55 = vsel %vm4900_vm2, %v91_v49, 0.0  ;;  %v96_v56 = vsel %vm4900_vm2, %v89_v50, 0.0 }
 0x18b   :  { %v2987_v23 = vrot.slane %v113_v63, 7  ;;  %v2993_v25 = vrot.slane %v113_v63, 1 }
 0x18d   :  { %v103_v53 = vpop.permute.xlu1 %102  ;;  %v101_v54 = vpop.permute.xlu0 %100 }
 0x18e   :  { %v109_v57 = vsel %vm4898_vm1, %v103_v53, 0.0  ;;  %v108_v58 = vsel %vm4898_vm1, %v101_v54, 0.0 }
 0x18f   :  { %v112_v60 = vadd.f32 %v109_v57, %v97_v55  ;;  %v111_v61 = vadd.f32 %v108_v58, %v96_v56  ;;  %v1205_v58 = vmul.f32 0.0017720108, %v2779_v5 }
 0x191   :  { %v115_v17 = vmul.f32 0.0010747788, %v112_v60  ;;  %v114_v18 = vmul.f32 0.0010747788, %v111_v61  ;;  %v303_v19 = vpop.permute.xlu1 %302  ;;  %v301_v20 = vpop.permute.xlu0 %300 }
 0x192   :  { %v307_v2 = vsel %vm4900_vm2, %v303_v19, 0.0  ;;  %v306_v31 = vsel %vm4900_vm2, %v301_v20, 0.0 }
 0x193   :  { %v120_v21 = vadd.f32 %v117_v59, %v115_v17  ;;  %v119_v22 = vadd.f32 %v116_v62, %v114_v18  ;;  %v1204_v17 = vmul.f32 0.0017720108, %v2775_v4 }
 0x195   :  { %v123_v0 = vrot.slane %v120_v21, 7  ;;  %v130_v26 = vrot.slane %v120_v21, 1  ;;  %v122_v27 = vrot.slane %v119_v22, 7  ;;  %v311_v28 = vpop.permute.xlu1 %310  ;;  %v309_v29 = vpop.permute.xlu0 %308  ;;  %v129_v30 = vrot.slane %v119_v22, 1 }
 0x196   :  { %v315_v32 = vsel %vm4898_vm1, %v311_v28, 0.0  ;;  %v314_v33 = vsel %vm4898_vm1, %v309_v29, 0.0  ;;  %v145_v46 = vmul.f32 0.45186275, %v120_v21  ;;  %v144_v50 = vmul.f32 0.45186275, %v119_v22 }
 0x197   :  { %v132_v3 = vsel %vm131_vm3, %v130_v26, %v2993_v25  ;;  %v126_v34 = vsel %vm124_vm4, %v122_v27, %v123_v0  ;;  %v127_v35 = vsel %vm124_vm4, %v2987_v23, %v122_v27  ;;  %v317_v36 = vadd.f32 %v315_v32, %v307_v2 }
 0x198   :  { %v133_v37 = vsel %vm131_vm3, %v129_v30, %v130_v26  ;;  %v316_v39 = vadd.f32 %v314_v33, %v306_v31  ;;  %v137_v40 = vadd.f32 %v132_v3, %v126_v34 }
 0x199   :  { %v136_v41 = vadd.f32 %v133_v37, %v127_v35  ;;  %v319_v42 = vmul.f32 0.0010747788, %v317_v36  ;;  %v1187_v43 = vpop.permute.xlu1 %1186  ;;  %v1185_v45 = vpop.permute.xlu0 %1184  ;;  %v1403_v35 = vmul.f32 0.0017720108, %v2787_v7  ;;  %v1402_v36 = vmul.f32 0.0017720108, %v2783_v6 }
 0x19a   :  { %v318_v47 = vmul.f32 0.0010747788, %v316_v39  ;;  %v141_v48 = vmul.f32 0.27406862, %v137_v40  ;;  %v1191_v54 = vsel %vm4900_vm2, %v1187_v43, 0.0  ;;  %v1190_v5 = vsel %vm4900_vm2, %v1185_v45, 0.0 }
 0x19b   :  { %v140_v49 = vmul.f32 0.27406862, %v136_v41  ;;  %v323_v51 = vadd.f32 %v321_v24, %v319_v42 }
 0x19c   :  { %v322_v53 = vadd.f32 %v320_v38, %v318_v47  ;;  %v3014_v55 = vadd.f32 %v145_v46, %v141_v48 }
 0x19d   :  { %v3016_v1 = vadd.f32 %v144_v50, %v140_v49  ;;  %v325_v56 = vrot.slane %v323_v51, 7  ;;  %v330_v57 = vrot.slane %v323_v51, 1  ;;  %v1195_v59 = vpop.permute.xlu1 %1194  ;;  %v1193_v60 = vpop.permute.xlu0 %1192  ;;  %v343_v37 = vmul.f32 0.45186275, %v323_v51 }
 0x19e   :  { %v324_v61 = vrot.slane %v322_v53, 7  ;;  %v329_v62 = vrot.slane %v322_v53, 1  ;;  %v1199_v63 = vsel %vm4898_vm1, %v1195_v59, 0.0  ;;  %156 = vst.msk [vmem:[#allocation5 + $0x8] sm:$0xff] %vm4899_vm5, %v3014_v55  ;;  %v1198_v20 = vsel %vm4898_vm1, %v1193_v60, 0.0 }
 0x19f   :  { %155 = vst.msk [vmem:[#allocation5] sm:$0xff] %vm4899_vm5, %v3016_v1  ;;  %v331_v18 = vsel %vm131_vm3, %v330_v57, %v2993_v25  ;;  %v1201_v19 = vadd.f32 %v1199_v63, %v1191_v54  ;;  %v1200_v2 = vadd.f32 %v1198_v20, %v1190_v5  ;;  %v342_v31 = vmul.f32 0.45186275, %v322_v53 }
 0x1a0   :  { %v327_v4 = vsel %vm124_vm4, %v324_v61, %v325_v56  ;;  %v328_v21 = vsel %vm124_vm4, %v2987_v23, %v324_v61  ;;  %v332_v22 = vsel %vm131_vm3, %v329_v62, %v330_v57  ;;  %v527_v20 = vmul.f32 0.0017720108, %v2799_v10 }
 0x1a1   :  { %v335_v24 = vadd.f32 %v332_v22, %v328_v21  ;;  %v1203_v0 = vmul.f32 0.0010747788, %v1201_v19  ;;  %v1385_v26 = vpop.permute.xlu1 %1384  ;;  %v1383_v27 = vpop.permute.xlu0 %1382  ;;  %v336_v28 = vadd.f32 %v331_v18, %v327_v4  ;;  %v1202_v29 = vmul.f32 0.0010747788, %v1200_v2 }
 0x1a2   :  { %v1389_v34 = vsel %vm4900_vm2, %v1385_v26, 0.0  ;;  %v1388_v46 = vsel %vm4900_vm2, %v1383_v27, 0.0  ;;  %v526_v4 = vmul.f32 0.0017720108, %v2793_v8 }
 0x1a3   :  { %v339_v30 = vmul.f32 0.27406862, %v335_v24  ;;  %v1207_v32 = vadd.f32 %v1205_v58, %v1203_v0  ;;  %v340_v33 = vmul.f32 0.27406862, %v336_v28  ;;  %v1206_v3 = vadd.f32 %v1204_v17, %v1202_v29 }
 0x1a5   :  { %v3044_v38 = vadd.f32 %v342_v31, %v339_v30  ;;  %v1209_v39 = vrot.slane %v1207_v32, 7  ;;  %v1214_v40 = vrot.slane %v1207_v32, 1  ;;  %v1393_v41 = vpop.permute.xlu1 %1392  ;;  %v1391_v42 = vpop.permute.xlu0 %1390  ;;  %v1208_v43 = vrot.slane %v1206_v3, 7 }
 0x1a6   :  { %v1213_v45 = vrot.slane %v1206_v3, 1  ;;  %v1397_v47 = vsel %vm4898_vm1, %v1393_v41, 0.0  ;;  %v1396_v48 = vsel %vm4898_vm1, %v1391_v42, 0.0  ;;  %v3057_v49 = vadd.f32 %v343_v37, %v340_v33 }
 0x1a7   :  { %353 = vst.msk [vmem:[#allocation5 + $0x10] sm:$0xff] %vm4899_vm5, %v3044_v38  ;;  %v1215_v6 = vsel %vm131_vm3, %v1214_v40, %v2993_v25  ;;  %v1399_v7 = vadd.f32 %v1397_v47, %v1389_v34  ;;  %v1211_v50 = vsel %vm124_vm4, %v1208_v43, %v1209_v39  ;;  %v1212_v51 = vsel %vm124_vm4, %v2987_v23, %v1208_v43 }
 0x1a8   :  { %v1216_v53 = vsel %vm131_vm3, %v1213_v45, %v1214_v40  ;;  %v1398_v54 = vadd.f32 %v1396_v48, %v1388_v46  ;;  %354 = vst.msk [vmem:[#allocation5 + $0x18] sm:$0xff] %vm4899_vm5, %v3057_v49  ;;  %v1220_v60 = vadd.f32 %v1215_v6, %v1211_v50  ;;  %v1226_v63 = vmul.f32 0.45186275, %v1206_v3 }
 0x1a9   :  { %v1219_v56 = vadd.f32 %v1216_v53, %v1212_v51  ;;  %v1401_v57 = vmul.f32 0.0010747788, %v1399_v7  ;;  %v509_v58 = vpop.permute.xlu1 %508  ;;  %v507_v59 = vpop.permute.xlu0 %506  ;;  %v1227_v21 = vmul.f32 0.45186275, %v1207_v32  ;;  %v1609_v48 = vmul.f32 0.0017720108, %v2807_v12 }
 0x1aa   :  { %v1400_v61 = vmul.f32 0.0010747788, %v1398_v54  ;;  %v1224_v18 = vmul.f32 0.27406862, %v1220_v60  ;;  %v513_v19 = vsel %vm4900_vm2, %v509_v58, 0.0  ;;  %v512_v29 = vsel %vm4900_vm2, %v507_v59, 0.0 }
 0x1ab   :  { %v1223_v62 = vmul.f32 0.27406862, %v1219_v56  ;;  %v1405_v17 = vadd.f32 %v1403_v35, %v1401_v57  ;;  %v1608_v50 = vmul.f32 0.0017720108, %v2801_v11 }
 0x1ac   :  { %v1404_v5 = vadd.f32 %v1402_v36, %v1400_v61  ;;  %v3085_v32 = vadd.f32 %v1227_v21, %v1224_v18 }
 0x1ad   :  { %v3072_v22 = vadd.f32 %v1226_v63, %v1223_v62  ;;  %v1407_v2 = vrot.slane %v1405_v17, 7  ;;  %v1412_v24 = vrot.slane %v1405_v17, 1  ;;  %v517_v0 = vpop.permute.xlu1 %516  ;;  %v515_v26 = vpop.permute.xlu0 %514  ;;  %v1425_v51 = vmul.f32 0.45186275, %v1405_v17 }
 0x1ae   :  { %v1406_v27 = vrot.slane %v1404_v5, 7  ;;  %v1411_v28 = vrot.slane %v1404_v5, 1  ;;  %v521_v30 = vsel %vm4898_vm1, %v517_v0, 0.0  ;;  %v520_v31 = vsel %vm4898_vm1, %v515_v26, 0.0  ;;  %1238 = vst.msk [vmem:[#allocation5 + $0x48] sm:$0xff] %vm4899_vm5, %v3085_v32 }
 0x1af   :  { %1237 = vst.msk [vmem:[#allocation5 + $0x40] sm:$0xff] %vm4899_vm5, %v3072_v22  ;;  %v1413_v8 = vsel %vm131_vm3, %v1412_v24, %v2993_v25  ;;  %v523_v10 = vadd.f32 %v521_v30, %v513_v19  ;;  %v522_v35 = vadd.f32 %v520_v31, %v512_v29  ;;  %v1424_v45 = vmul.f32 0.45186275, %v1404_v5 }
 0x1b0   :  { %v1409_v33 = vsel %vm124_vm4, %v1406_v27, %v1407_v2  ;;  %v1410_v3 = vsel %vm124_vm4, %v2987_v23, %v1406_v27  ;;  %v1414_v34 = vsel %vm131_vm3, %v1411_v28, %v1412_v24  ;;  %v733_v31 = vmul.f32 0.0017720108, %v2815_v14 }
 0x1b1   :  { %v1417_v36 = vadd.f32 %v1414_v34, %v1410_v3  ;;  %v525_v37 = vmul.f32 0.0010747788, %v523_v10  ;;  %v1591_v39 = vpop.permute.xlu1 %1590  ;;  %v1589_v40 = vpop.permute.xlu0 %1588  ;;  %v1418_v41 = vadd.f32 %v1413_v8, %v1409_v33  ;;  %v524_v42 = vmul.f32 0.0010747788, %v522_v35 }
 0x1b2   :  { %v1595_v7 = vsel %vm4900_vm2, %v1591_v39, 0.0  ;;  %v1594_v61 = vsel %vm4900_vm2, %v1589_v40, 0.0  ;;  %v732_v33 = vmul.f32 0.0017720108, %v2809_v13 }
 0x1b3   :  { %v1421_v43 = vmul.f32 0.27406862, %v1417_v36  ;;  %v529_v46 = vadd.f32 %v527_v20, %v525_v37  ;;  %v1422_v47 = vmul.f32 0.27406862, %v1418_v41  ;;  %v528_v6 = vadd.f32 %v526_v4, %v524_v42 }
 0x1b5   :  { %v3100_v53 = vadd.f32 %v1424_v45, %v1421_v43  ;;  %v531_v54 = vrot.slane %v529_v46, 7  ;;  %v536_v56 = vrot.slane %v529_v46, 1  ;;  %v1599_v57 = vpop.permute.xlu1 %1598  ;;  %v1597_v58 = vpop.permute.xlu0 %1596  ;;  %v530_v59 = vrot.slane %v528_v6, 7 }
 0x1b6   :  { %v535_v60 = vrot.slane %v528_v6, 1  ;;  %v1603_v62 = vsel %vm4898_vm1, %v1599_v57, 0.0  ;;  %v1602_v63 = vsel %vm4898_vm1, %v1597_v58, 0.0  ;;  %v3113_v17 = vadd.f32 %v1425_v51, %v1422_v47 }
 0x1b7   :  { %4903 = vst [vmem:[#allocation19_spill] sm:$0xff] %v3100_v53  ;;  %1435 = vst.msk [vmem:[#allocation5 + $0x50] sm:$0xff] %vm4899_vm5, %v3100_v53  ;;  %v537_v11 = vsel %vm131_vm3, %v536_v56, %v2993_v25  ;;  %v1605_v12 = vadd.f32 %v1603_v62, %v1595_v7  ;;  %v533_v18 = vsel %vm124_vm4, %v530_v59, %v531_v54  ;;  %v548_v28 = vmul.f32 0.45186275, %v528_v6 }
 0x1b8   :  { %4904 = vst [vmem:[#allocation20_spill] sm:$0xff] %v3113_v17  ;;  %v534_v5 = vsel %vm124_vm4, %v2987_v23, %v530_v59  ;;  %v538_v19 = vsel %vm131_vm3, %v535_v60, %v536_v56  ;;  %v1604_v20 = vadd.f32 %v1602_v63, %v1594_v61  ;;  %1436 = vst.msk [vmem:[#allocation5 + $0x58] sm:$0xff] %vm4899_vm5, %v3113_v17  ;;  %v549_v3 = vmul.f32 0.45186275, %v529_v46 }
 0x1b9   :  { %v541_v4 = vadd.f32 %v538_v19, %v534_v5  ;;  %v1607_v21 = vmul.f32 0.0010747788, %v1605_v12  ;;  %v715_v2 = vpop.permute.xlu1 %714  ;;  %v713_v24 = vpop.permute.xlu0 %712  ;;  %v542_v0 = vadd.f32 %v537_v11, %v533_v18  ;;  %v1815_v63 = vmul.f32 0.0017720108, %v2823_v16 }
 0x1ba   :  { %v1606_v26 = vmul.f32 0.0010747788, %v1604_v20  ;;  %v719_v10 = vsel %vm4900_vm2, %v715_v2, 0.0  ;;  %v718_v42 = vsel %vm4900_vm2, %v713_v24, 0.0  ;;  %v1814_v18 = vmul.f32 0.0017720108, %v2817_v15 }
 0x1bb   :  { %v545_v27 = vmul.f32 0.27406862, %v541_v4  ;;  %v1611_v29 = vadd.f32 %v1609_v48, %v1607_v21  ;;  %v546_v30 = vmul.f32 0.27406862, %v542_v0 }
 0x1bc   :  { %v1610_v8 = vadd.f32 %v1608_v50, %v1606_v26 }
 0x1bd   :  { %v3128_v34 = vadd.f32 %v548_v28, %v545_v27  ;;  %v1613_v35 = vrot.slane %v1611_v29, 7  ;;  %v1618_v36 = vrot.slane %v1611_v29, 1  ;;  %v723_v37 = vpop.permute.xlu1 %722  ;;  %v721_v39 = vpop.permute.xlu0 %720  ;;  %v3141_v46 = vadd.f32 %v549_v3, %v546_v30 }
 0x1be   :  { %v1612_v40 = vrot.slane %v1610_v8, 7  ;;  %v1617_v41 = vrot.slane %v1610_v8, 1  ;;  %v727_v43 = vsel %vm4898_vm1, %v723_v37, 0.0  ;;  %v726_v45 = vsel %vm4898_vm1, %v721_v39, 0.0 }
 0x1bf   :  { %4905 = vst [vmem:[#allocation21_spill] sm:$0xff] %v3128_v34  ;;  %559 = vst.msk [vmem:[#allocation5 + $0x20] sm:$0xff] %vm4899_vm5, %v3128_v34  ;;  %v1619_v13 = vsel %vm131_vm3, %v1618_v36, %v2993_v25  ;;  %v729_v14 = vadd.f32 %v727_v43, %v719_v10  ;;  %v728_v48 = vadd.f32 %v726_v45, %v718_v42  ;;  %v1630_v60 = vmul.f32 0.45186275, %v1610_v8 }
 0x1c0   :  { %4906 = vst [vmem:[#allocation22_spill] sm:$0xff] %v3141_v46  ;;  %v1615_v47 = vsel %vm124_vm4, %v1612_v40, %v1613_v35  ;;  %v1616_v6 = vsel %vm124_vm4, %v2987_v23, %v1612_v40  ;;  %v1620_v7 = vsel %vm131_vm3, %v1617_v41, %v1618_v36  ;;  %560 = vst.msk [vmem:[#allocation5 + $0x28] sm:$0xff] %vm4899_vm5, %v3141_v46  ;;  %v1631_v5 = vmul.f32 0.45186275, %v1611_v29 }
 0x1c1   :  { %v1623_v50 = vadd.f32 %v1620_v7, %v1616_v6  ;;  %v731_v51 = vmul.f32 0.0010747788, %v729_v14  ;;  %v1797_v54 = vpop.permute.xlu1 %1796  ;;  %v1795_v56 = vpop.permute.xlu0 %1794  ;;  %v1624_v57 = vadd.f32 %v1619_v13, %v1615_v47  ;;  %v730_v58 = vmul.f32 0.0010747788, %v728_v48 }
 0x1c2   :  { %v1801_v12 = vsel %vm4900_vm2, %v1797_v54, 0.0  ;;  %v1800_v26 = vsel %vm4900_vm2, %v1795_v56, 0.0 }
 0x1c3   :  { %v1627_v59 = vmul.f32 0.27406862, %v1623_v50  ;;  %v735_v61 = vadd.f32 %v733_v31, %v731_v51  ;;  %v1628_v62 = vmul.f32 0.27406862, %v1624_v57  ;;  %v734_v11 = vadd.f32 %v732_v33, %v730_v58 }
 0x1c5   :  { %v3156_v19 = vadd.f32 %v1630_v60, %v1627_v59  ;;  %v737_v20 = vrot.slane %v735_v61, 7  ;;  %v742_v4 = vrot.slane %v735_v61, 1  ;;  %v1805_v21 = vpop.permute.xlu1 %1804  ;;  %v1803_v2 = vpop.permute.xlu0 %1802  ;;  %v736_v24 = vrot.slane %v734_v11, 7 }
 0x1c6   :  { %v741_v0 = vrot.slane %v734_v11, 1  ;;  %v1809_v27 = vsel %vm4898_vm1, %v1805_v21, 0.0  ;;  %v1808_v28 = vsel %vm4898_vm1, %v1803_v2, 0.0  ;;  %v3169_v29 = vadd.f32 %v1631_v5, %v1628_v62 }
 0x1c7   :  { %4907 = vst [vmem:[#allocation23_spill] sm:$0xff] %v3156_v19  ;;  %1641 = vst.msk [vmem:[#allocation5 + $0x60] sm:$0xff] %vm4899_vm5, %v3156_v19  ;;  %v743_v15 = vsel %vm131_vm3, %v742_v4, %v2993_v25  ;;  %v1811_v16 = vadd.f32 %v1809_v27, %v1801_v12  ;;  %v739_v30 = vsel %vm124_vm4, %v736_v24, %v737_v20  ;;  %v755_v43 = vmul.f32 0.45186275, %v735_v61 }
 0x1c8   :  { %4908 = vst [vmem:[#allocation24_spill] sm:$0xff] %v3169_v29  ;;  %v740_v8 = vsel %vm124_vm4, %v2987_v23, %v736_v24  ;;  %v744_v10 = vsel %vm131_vm3, %v741_v0, %v742_v4  ;;  %v1810_v31 = vadd.f32 %v1808_v28, %v1800_v26  ;;  %1642 = vst.msk [vmem:[#allocation5 + $0x68] sm:$0xff] %vm4899_vm5, %v3169_v29  ;;  %v754_v14 = vmul.f32 0.45186275, %v734_v11 }
 0x1c9   :  { %v747_v33 = vadd.f32 %v744_v10, %v740_v8  ;;  %v1813_v3 = vmul.f32 0.0010747788, %v1811_v16  ;;  %v2375_v35 = vpop.permute.xlu1 %2374  ;;  %v2370_v36 = vpop.permute.xlu0 %2369  ;;  %v748_v37 = vadd.f32 %v743_v15, %v739_v30 }
 0x1ca   :  { %v1812_v39 = vmul.f32 0.0010747788, %v1810_v31  ;;  %v2377_v40 = vunpack.i.h.bf16 %v2375_v35  ;;  %v2376_v41 = vunpack.i.l.bf16 %v2375_v35  ;;  %v2372_v42 = vunpack.i.h.bf16 %v2370_v36 }
 0x1cb   :  { %v751_v13 = vmul.f32 0.27406862, %v747_v33  ;;  %v1817_v45 = vadd.f32 %v1815_v63, %v1813_v3  ;;  %v2371_v6 = vunpack.i.l.bf16 %v2370_v36  ;;  %v752_v48 = vmul.f32 0.27406862, %v748_v37 }
 0x1cc   :  { %v1816_v47 = vadd.f32 %v1814_v18, %v1812_v39  ;;  %v366_v7 = vsel %vm64_vm0, %v2376_v41, 0.0  ;;  %v1241_v57 = vsel %vm64_vm0, %v2377_v40, 0.0  ;;  %v357_v58 = vsel %vm64_vm0, %v2372_v42, 0.0 }
 0x1cd   :  { %v3181_v50 = vadd.f32 %v754_v14, %v751_v13  ;;  %v1824_v51 = vrot.slane %v1817_v45, 1  ;;  %v2385_v54 = vpop.permute.xlu1 %2384  ;;  %v2380_v56 = vpop.permute.xlu0 %2379  ;;  %v1819_v59 = vrot.slane %v1817_v45, 7  ;;  %v2413_v21 = vpack.i.bf16 %v1241_v57, %v366_v7 }
 0x1ce   :  { %v1818_v60 = vrot.slane %v1816_v47, 7  ;;  %v1823_v61 = vrot.slane %v1816_v47, 1  ;;  %v2387_v62 = vunpack.i.h.bf16 %v2385_v54  ;;  %v1836_v12 = vmul.f32 0.45186275, %v1816_v47 }
 0x1cf   :  { %4909 = vst [vmem:[#allocation25_spill] sm:$0xff] %v3181_v50  ;;  %765 = vst.msk [vmem:[#allocation5 + $0x30] sm:$0xff] %vm4899_vm5, %v3181_v50  ;;  %v1825_v11 = vsel %vm131_vm3, %v1824_v51, %v2993_v25  ;;  %v2386_v63 = vunpack.i.l.bf16 %v2385_v54  ;;  %v2381_v18 = vunpack.i.l.bf16 %v2380_v56  ;;  %v2382_v4 = vunpack.i.h.bf16 %v2380_v56  ;;  %2414 = vrot.lane.b32.xlu1 %v2413_v21, %s2698_s11 }
 0x1d0   :  { %v1822_v5 = vsel %vm124_vm4, %v2987_v23, %v1818_v60  ;;  %v1826_v20 = vsel %vm131_vm3, %v1823_v61, %v1824_v51  ;;  %v168_v24 = vsel %vm64_vm0, %v2371_v6, 0.0  ;;  %v563_v27 = vsel %vm64_vm0, %v2387_v62, 0.0 }
 0x1d1   :  { %v1829_v2 = vadd.f32 %v1826_v20, %v1822_v5  ;;  %v2395_v0 = vpop.permute.xlu1 %2394  ;;  %v2390_v26 = vpop.permute.xlu0 %2389  ;;  %v1448_v25 = vsel %vm64_vm0, %v2386_v63, 0.0  ;;  %v2408_v15 = vpack.i.bf16 %v357_v58, %v168_v24  ;;  %v1250_v31 = vsel %vm64_vm0, %v2381_v18, 0.0 }
 0x1d2   :  { %v2397_v16 = vunpack.i.h.bf16 %v2395_v0  ;;  %v2396_v28 = vunpack.i.l.bf16 %v2395_v0  ;;  %v2392_v23 = vunpack.i.h.bf16 %v2390_v26  ;;  %v2391_v8 = vunpack.i.l.bf16 %v2390_v26 }
 0x1d3   :  { %v1833_v30 = vmul.f32 0.27406862, %v1829_v2  ;;  %v2423_v10 = vpack.i.bf16 %v563_v27, %v1448_v25  ;;  %v1821_v33 = vsel %vm124_vm4, %v1818_v60, %v1819_v59  ;;  %2409 = vrot.lane.b32.xlu0 %v2408_v15, %s2698_s11  ;;  %v1439_v3 = vsel %vm64_vm0, %v2382_v4, 0.0 }
 0x1d4   :  { %v769_v35 = vsel %vm64_vm0, %v2397_v16, 0.0  ;;  %v1654_v36 = vsel %vm64_vm0, %v2396_v28, 0.0  ;;  %v2418_v39 = vpack.i.bf16 %v1439_v3, %v1250_v31  ;;  %v572_v41 = vsel %vm64_vm0, %v2391_v8, 0.0 }
 0x1d5   :  { %v3206_v37 = vadd.f32 %v1836_v12, %v1833_v30  ;;  %v2400_v40 = vpop.permute.xlu0 %2399  ;;  %v1645_v42 = vsel %vm64_vm0, %v2392_v23, 0.0  ;;  %2424 = vrot.lane.b32.xlu1 %v2423_v10, %s2698_s11  ;;  %v2405_v13 = vpop.permute.xlu1 %2404  ;;  %v2433_v6 = vpack.i.bf16 %v769_v35, %v1654_v36  ;;  %v3213_v7 = vadd.f32 %v755_v43, %v752_v48 }
 0x1d6   :  { %v2402_v14 = vunpack.i.h.bf16 %v2400_v40  ;;  %v2401_v47 = vunpack.i.l.bf16 %v2400_v40  ;;  %v1830_v51 = vadd.f32 %v1825_v11, %v1821_v33  ;;  %v1837_v54 = vmul.f32 0.45186275, %v1817_v45 }
 0x1d7   :  { %4910 = vst [vmem:[#allocation26_spill] sm:$0xff] %v3206_v37  ;;  %1847 = vst.msk [vmem:[#allocation5 + $0x70] sm:$0xff] %vm4899_vm5, %v3206_v37  ;;  %2419 = vrot.lane.b32.xlu0 %v2418_v39, %s2698_s11  ;;  %v2428_v56 = vpack.i.bf16 %v1645_v42, %v572_v41  ;;  %v2406_v57 = vunpack.i.l.bf16 %v2405_v13  ;;  %v2407_v62 = vunpack.i.h.bf16 %v2405_v13 }
 0x1d8   :  { %4911 = vst [vmem:[#allocation27_spill] sm:$0xff] %v3213_v7  ;;  %v778_v58 = vsel %vm64_vm0, %v2401_v47, 0.0  ;;  %v1851_v59 = vsel %vm64_vm0, %v2402_v14, 0.0  ;;  %766 = vst.msk [vmem:[#allocation5 + $0x38] sm:$0xff] %vm4899_vm5, %v3213_v7  ;;  %v1834_v60 = vmul.f32 0.27406862, %v1830_v51 }
 0x1d9   :  { %2434 = vrot.lane.b32.xlu1 %v2433_v6, %s2698_s11  ;;  %v2438_v43 = vpack.i.bf16 %v1851_v59, %v778_v58  ;;  %v1860_v45 = vsel %vm64_vm0, %v2406_v57, 0.0  ;;  %v177_v5 = vsel %vm64_vm0, %v2407_v62, 0.0 }
 0x1da   :  { %v3221_v61 = vadd.f32 %v1837_v54, %v1834_v60 }
 0x1db   :  { %2429 = vrot.lane.b32.xlu0 %v2428_v56, %s2698_s11 }
 0x1dc   :  { %4912 = vst [vmem:[#allocation28_spill] sm:$0xff] %v3221_v61  ;;  %1848 = vst.msk [vmem:[#allocation5 + $0x78] sm:$0xff] %vm4899_vm5, %v3221_v61 }
 0x1dd   :  { %1867 = vrot.lane.b32.xlu1 %v1860_v45, %s2698_s11 }
 0x1df   :  { %2439 = vrot.lane.b32.xlu0 %v2438_v43, %s2698_s11 }
 0x241   :  { %v2415_v48 = vpop.permute.xlu1 %2414 }
 0x242   :  { %v2416_v12 = vunpack.i.l.bf16 %v2415_v48  ;;  %v2417_v26 = vunpack.i.h.bf16 %v2415_v48 }
 0x244   :  { %v378_v2 = vsel %vm64_vm0, %v2416_v12, 0.0  ;;  %v1259_v28 = vsel %vm64_vm0, %v2417_v26, 0.0 }
 0x245   :  { %v2410_v11 = vpop.permute.xlu0 %2409 }
 0x246   :  { %v2412_v63 = vunpack.i.h.bf16 %v2410_v11  ;;  %v2411_v18 = vunpack.i.l.bf16 %v2410_v11 }
 0x247   :  { %v2425_v25 = vpop.permute.xlu1 %2424 }
 0x248   :  { %v180_v20 = vsel %vm64_vm0, %v2411_v18, 0.0  ;;  %v375_v21 = vsel %vm64_vm0, %v2412_v63, 0.0  ;;  %v2426_v15 = vunpack.i.l.bf16 %v2425_v25  ;;  %v2427_v8 = vunpack.i.h.bf16 %v2425_v25 }
 0x249   :  { %v2448_v4 = vpack.i.bf16 %v180_v20, %v177_v5  ;;  %v2458_v24 = vpack.i.bf16 %v378_v2, %v375_v21  ;;  %v2420_v0 = vpop.permute.xlu0 %2419 }
 0x24a   :  { %v2421_v27 = vunpack.i.l.bf16 %v2420_v0  ;;  %v2422_v16 = vunpack.i.h.bf16 %v2420_v0  ;;  %v1460_v10 = vsel %vm64_vm0, %v2426_v15, 0.0  ;;  %v581_v39 = vsel %vm64_vm0, %v2427_v8, 0.0 }
 0x24b   :  { %2449 = vrot.lane.b32.xlu1 %v2448_v4, %s2701_s12  ;;  %2444 = vrot.lane.b32.xlu0 %v2448_v4, %s2700_s0  ;;  %v2435_v36 = vpop.permute.xlu1 %2434 }
 0x24c   :  { %v1262_v23 = vsel %vm64_vm0, %v2421_v27, 0.0  ;;  %v1457_v31 = vsel %vm64_vm0, %v2422_v16, 0.0  ;;  %v2436_v40 = vunpack.i.l.bf16 %v2435_v36  ;;  %v2437_v47 = vunpack.i.h.bf16 %v2435_v36 }
 0x24d   :  { %v2430_v30 = vpop.permute.xlu0 %2429  ;;  %v2468_v3 = vpack.i.bf16 %v1262_v23, %v1259_v28  ;;  %v2478_v35 = vpack.i.bf16 %v1460_v10, %v1457_v31 }
 0x24e   :  { %v2431_v33 = vunpack.i.l.bf16 %v2430_v30  ;;  %v2432_v41 = vunpack.i.h.bf16 %v2430_v30  ;;  %v1666_v6 = vsel %vm64_vm0, %v2436_v40, 0.0  ;;  %v787_v57 = vsel %vm64_vm0, %v2437_v47, 0.0 }
 0x24f   :  { %2459 = vrot.lane.b32.xlu1 %v2458_v24, %s2701_s12  ;;  %2454 = vrot.lane.b32.xlu0 %v2458_v24, %s2700_s0  ;;  %v1868_v43 = vpop.permute.xlu1 %1867 }
 0x250   :  { %v584_v42 = vsel %vm64_vm0, %v2431_v33, 0.0  ;;  %v1663_v51 = vsel %vm64_vm0, %v2432_v41, 0.0  ;;  %v1872_v48 = vsel %vm64_vm0, %v1868_v43, 0.0 }
 0x251   :  { %v2488_v13 = vpack.i.bf16 %v584_v42, %v581_v39  ;;  %v2440_v14 = vpop.permute.xlu0 %2439  ;;  %v2498_v56 = vpack.i.bf16 %v1666_v6, %v1663_v51 }
 0x252   :  { %v2441_v54 = vunpack.i.l.bf16 %v2440_v14  ;;  %v2442_v59 = vunpack.i.h.bf16 %v2440_v14 }
 0x253   :  { %160 = vrot.lane.b32.xlu0 %v3016_v1, %s2698_s11  ;;  %163 = vrot.lane.b32.xlu1 %v3014_v55, %s2698_s11 }
 0x254   :  { %v790_v58 = vsel %vm64_vm0, %v2441_v54, 0.0  ;;  %v1869_v45 = vsel %vm64_vm0, %v2442_v59, 0.0 }
 0x255   :  { %v2508_v60 = vpack.i.bf16 %v790_v58, %v787_v57  ;;  %v2518_v62 = vpack.i.bf16 %v1872_v48, %v1869_v45 }
 0x257   :  { %361 = vrot.lane.b32.xlu0 %v3057_v49, %s2698_s11  ;;  %358 = vrot.lane.b32.xlu1 %v3044_v38, %s2698_s11 }
 0x25b   :  { %1242 = vrot.lane.b32.xlu0 %v3072_v22, %s2698_s11  ;;  %1245 = vrot.lane.b32.xlu1 %v3085_v32, %s2698_s11 }
 0x25f   :  { %1443 = vrot.lane.b32.xlu0 %v3113_v17, %s2698_s11  ;;  %1440 = vrot.lane.b32.xlu1 %v3100_v53, %s2698_s11 }
 0x263   :  { %564 = vrot.lane.b32.xlu0 %v3128_v34, %s2698_s11  ;;  %567 = vrot.lane.b32.xlu1 %v3141_v46, %s2698_s11 }
 0x267   :  { %1649 = vrot.lane.b32.xlu0 %v3169_v29, %s2698_s11  ;;  %1646 = vrot.lane.b32.xlu1 %v3156_v19, %s2698_s11 }
 0x26b   :  { %770 = vrot.lane.b32.xlu0 %v3181_v50, %s2698_s11  ;;  %773 = vrot.lane.b32.xlu1 %v3213_v7, %s2698_s11 }
 0x26f   :  { %1855 = vrot.lane.b32.xlu0 %v3221_v61, %s2698_s11  ;;  %1852 = vrot.lane.b32.xlu1 %v3206_v37, %s2698_s11 }
 0x273   :  { %2464 = vrot.lane.b32.xlu0 %v2468_v3, %s2700_s0  ;;  %2469 = vrot.lane.b32.xlu1 %v2468_v3, %s2701_s12 }
 0x277   :  { %2474 = vrot.lane.b32.xlu0 %v2478_v35, %s2700_s0  ;;  %2479 = vrot.lane.b32.xlu1 %v2478_v35, %s2701_s12 }
 0x27b   :  { %2484 = vrot.lane.b32.xlu0 %v2488_v13, %s2700_s0  ;;  %2489 = vrot.lane.b32.xlu1 %v2488_v13, %s2701_s12 }
 0x27f   :  { %2494 = vrot.lane.b32.xlu0 %v2498_v56, %s2700_s0  ;;  %2499 = vrot.lane.b32.xlu1 %v2498_v56, %s2701_s12 }
 0x283   :  { %2504 = vrot.lane.b32.xlu0 %v2508_v60, %s2700_s0  ;;  %2509 = vrot.lane.b32.xlu1 %v2508_v60, %s2701_s12 }
 0x287   :  { %2514 = vrot.lane.b32.xlu0 %v2518_v62, %s2700_s0  ;;  %2519 = vrot.lane.b32.xlu1 %v2518_v62, %s2701_s12 }
 0x2bd   :  { %v3293_v11 = vpop.permute.xlu1 %2449  ;;  %v3295_v12 = vpop.permute.xlu0 %2444 }
 0x2c1   :  { %v3297_v63 = vpop.permute.xlu1 %2459  ;;  %v3299_v18 = vpop.permute.xlu0 %2454 }
 0x2c5   :  { %v161_v5 = vpop.permute.xlu0 %160  ;;  %v164_v20 = vpop.permute.xlu1 %163 }
 0x2c6   :  { %v162_v4 = vsel %vm64_vm0, %v161_v5, %v3016_v1  ;;  %v165_v21 = vsel %vm64_vm0, %v164_v20, %v3014_v55 }
 0x2c7   :  { %171 = vrot.lane.b32.xlu0 %v162_v4, %s2698_s11  ;;  %173 = vrot.lane.b32.xlu1 %v165_v21, %s2698_s11 }
 0x2c9   :  { %v362_v2 = vpop.permute.xlu0 %361  ;;  %v359_v24 = vpop.permute.xlu1 %358 }
 0x2ca   :  { %v363_v0 = vsel %vm64_vm0, %v362_v2, %v3057_v49  ;;  %v360_v26 = vsel %vm64_vm0, %v359_v24, %v3044_v38 }
 0x2cb   :  { %371 = vrot.lane.b32.xlu0 %v363_v0, %s2698_s11  ;;  %369 = vrot.lane.b32.xlu1 %v360_v26, %s2698_s11 }
 0x2cd   :  { %v1243_v27 = vpop.permute.xlu0 %1242  ;;  %v1246_v25 = vpop.permute.xlu1 %1245 }
 0x2ce   :  { %v1244_v15 = vsel %vm64_vm0, %v1243_v27, %v3072_v22  ;;  %v1247_v16 = vsel %vm64_vm0, %v1246_v25, %v3085_v32 }
 0x2cf   :  { %1253 = vrot.lane.b32.xlu0 %v1244_v15, %s2698_s11  ;;  %1255 = vrot.lane.b32.xlu1 %v1247_v16, %s2698_s11 }
 0x2d1   :  { %v1444_v28 = vpop.permute.xlu0 %1443  ;;  %v1441_v23 = vpop.permute.xlu1 %1440 }
 0x2d2   :  { %v1445_v30 = vsel %vm64_vm0, %v1444_v28, %v3113_v17  ;;  %v1442_v8 = vsel %vm64_vm0, %v1441_v23, %v3100_v53 }
 0x2d3   :  { %1453 = vrot.lane.b32.xlu0 %v1445_v30, %s2698_s11  ;;  %1451 = vrot.lane.b32.xlu1 %v1442_v8, %s2698_s11 }
 0x2d5   :  { %v565_v10 = vpop.permute.xlu0 %564  ;;  %v568_v31 = vpop.permute.xlu1 %567 }
 0x2d6   :  { %v566_v33 = vsel %vm64_vm0, %v565_v10, %v3128_v34  ;;  %v569_v3 = vsel %vm64_vm0, %v568_v31, %v3141_v46 }
 0x2d7   :  { %575 = vrot.lane.b32.xlu0 %v566_v33, %s2698_s11  ;;  %577 = vrot.lane.b32.xlu1 %v569_v3, %s2698_s11 }
 0x2d9   :  { %v1650_v35 = vpop.permute.xlu0 %1649  ;;  %v1647_v36 = vpop.permute.xlu1 %1646 }
 0x2da   :  { %v1651_v39 = vsel %vm64_vm0, %v1650_v35, %v3169_v29  ;;  %v1648_v40 = vsel %vm64_vm0, %v1647_v36, %v3156_v19 }
 0x2db   :  { %1659 = vrot.lane.b32.xlu0 %v1651_v39, %s2698_s11  ;;  %1657 = vrot.lane.b32.xlu1 %v1648_v40, %s2698_s11 }
 0x2dd   :  { %v771_v41 = vpop.permute.xlu0 %770  ;;  %v774_v42 = vpop.permute.xlu1 %773 }
 0x2de   :  { %v772_v13 = vsel %vm64_vm0, %v771_v41, %v3181_v50  ;;  %v775_v14 = vsel %vm64_vm0, %v774_v42, %v3213_v7 }
 0x2df   :  { %781 = vrot.lane.b32.xlu0 %v772_v13, %s2698_s11  ;;  %783 = vrot.lane.b32.xlu1 %v775_v14, %s2698_s11 }
 0x2e1   :  { %v1856_v47 = vpop.permute.xlu0 %1855  ;;  %v1853_v6 = vpop.permute.xlu1 %1852 }
 0x2e2   :  { %v1857_v51 = vsel %vm64_vm0, %v1856_v47, %v3221_v61  ;;  %v1854_v54 = vsel %vm64_vm0, %v1853_v6, %v3206_v37 }
 0x2e3   :  { %1865 = vrot.lane.b32.xlu0 %v1857_v51, %s2698_s11  ;;  %1863 = vrot.lane.b32.xlu1 %v1854_v54, %s2698_s11 }
 0x2e5   :  { %v3349_v56 = vpop.permute.xlu0 %2464  ;;  %v3351_v57 = vpop.permute.xlu1 %2469 }
 0x2e9   :  { %v3353_v58 = vpop.permute.xlu0 %2474  ;;  %v3355_v59 = vpop.permute.xlu1 %2479 }
 0x2ed   :  { %v3357_v60 = vpop.permute.xlu0 %2484  ;;  %v3359_v43 = vpop.permute.xlu1 %2489 }
 0x2f1   :  { %v3361_v45 = vpop.permute.xlu0 %2494  ;;  %v3363_v48 = vpop.permute.xlu1 %2499 }
 0x2f5   :  { %v3365_v62 = vpop.permute.xlu0 %2504  ;;  %v3367_v5 = vpop.permute.xlu1 %2509 }
 0x2f6   :  { %v2507_v16 = vunpack.i.h.bf16 %v3365_v62 }
 0x2f9   :  { %v2515_v20 = vpop.permute.xlu0 %2514  ;;  %v2520_v21 = vpop.permute.xlu1 %2519 }
 0x2fa   :  { %v2517_v4 = vunpack.i.h.bf16 %v2515_v20  ;;  %v2516_v2 = vunpack.i.l.bf16 %v2515_v20  ;;  %v2522_v0 = vunpack.i.h.bf16 %v2520_v21  ;;  %v2521_v26 = vunpack.i.l.bf16 %v2520_v21 }
 0x2fc   :  { %v3371_v24 = vsel %vm4900_vm2, %v2517_v4, 0.0  ;;  %v3375_v27 = vsel %vm4900_vm2, %v2516_v2, 0.0  ;;  %v3379_v25 = vsel %vm4898_vm1, %v2522_v0, 0.0  ;;  %v3383_v15 = vsel %vm4898_vm1, %v2521_v26, 0.0 }
 0x2fd   :  { %v3389_v28 = vadd.f32 %v3379_v25, %v3371_v24  ;;  %v3395_v30 = vadd.f32 %v3383_v15, %v3375_v27 }
 0x339   :  { %v172_v8 = vpop.permute.xlu0 %171  ;;  %v174_v10 = vpop.permute.xlu1 %173 }
 0x33a   :  { %v178_v31 = vsel %vm64_vm0, %v172_v8, %v3016_v1  ;;  %v179_v33 = vsel %vm64_vm0, %v174_v10, %v3014_v55 }
 0x33b   :  { %187 = vrot.lane.b32.xlu1 %v178_v31, %s2700_s0  ;;  %189 = vrot.lane.b32.xlu0 %v179_v33, %s2700_s0 }
 0x33d   :  { %v372_v3 = vpop.permute.xlu0 %371  ;;  %v370_v35 = vpop.permute.xlu1 %369 }
 0x33e   :  { %v377_v36 = vsel %vm64_vm0, %v372_v3, %v3057_v49  ;;  %v376_v39 = vsel %vm64_vm0, %v370_v35, %v3044_v38 }
 0x33f   :  { %205 = vrot.lane.b32.xlu1 %v179_v33, %s2701_s12  ;;  %203 = vrot.lane.b32.xlu0 %v178_v31, %s2701_s12 }
 0x341   :  { %v1254_v40 = vpop.permute.xlu0 %1253  ;;  %v1256_v41 = vpop.permute.xlu1 %1255 }
 0x342   :  { %v1260_v42 = vsel %vm64_vm0, %v1254_v40, %v3072_v22  ;;  %v1261_v13 = vsel %vm64_vm0, %v1256_v41, %v3085_v32  ;;  %v2452_v41 = vunpack.i.h.bf16 %v3293_v11 }
 0x343   :  { %387 = vrot.lane.b32.xlu0 %v377_v36, %s2700_s0  ;;  %385 = vrot.lane.b32.xlu1 %v376_v39, %s2700_s0 }
 0x345   :  { %v1454_v14 = vpop.permute.xlu0 %1453  ;;  %v1452_v47 = vpop.permute.xlu1 %1451 }
 0x346   :  { %v1459_v6 = vsel %vm64_vm0, %v1454_v14, %v3113_v17  ;;  %v1458_v51 = vsel %vm64_vm0, %v1452_v47, %v3100_v53  ;;  %v2446_v14 = vunpack.i.l.bf16 %v3295_v12  ;;  %v216_v47 = vsel %vm4898_vm1, %v2452_v41, 0.0 }
 0x347   :  { %401 = vrot.lane.b32.xlu0 %v376_v39, %s2701_s12  ;;  %403 = vrot.lane.b32.xlu1 %v377_v36, %s2701_s12  ;;  %v2466_v41 = vunpack.i.l.bf16 %v3349_v56  ;;  %v2506_v17 = vunpack.i.l.bf16 %v3365_v62 }
 0x349   :  { %v576_v54 = vpop.permute.xlu0 %575  ;;  %v578_v20 = vpop.permute.xlu1 %577 }
 0x34a   :  { %v582_v4 = vsel %vm64_vm0, %v576_v54, %v3128_v34  ;;  %v583_v21 = vsel %vm64_vm0, %v578_v20, %v3141_v46  ;;  %v197_v54 = vsel %vm4900_vm2, %v2446_v14, 0.0  ;;  %v2462_v20 = vunpack.i.h.bf16 %v3297_v63 }
 0x34b   :  { %1269 = vrot.lane.b32.xlu1 %v1260_v42, %s2700_s0  ;;  %1271 = vrot.lane.b32.xlu0 %v1261_v13, %s2700_s0  ;;  %v2511_v46 = vunpack.i.l.bf16 %v3367_v5 }
 0x34d   :  { %v1660_v2 = vpop.permute.xlu0 %1659  ;;  %v1658_v0 = vpop.permute.xlu1 %1657 }
 0x34e   :  { %v1665_v26 = vsel %vm64_vm0, %v1660_v2, %v3169_v29  ;;  %v1664_v8 = vsel %vm64_vm0, %v1658_v0, %v3156_v19  ;;  %v2456_v2 = vunpack.i.l.bf16 %v3299_v18  ;;  %v414_v0 = vsel %vm4898_vm1, %v2462_v20, 0.0 }
 0x34f   :  { %1287 = vrot.lane.b32.xlu1 %v1261_v13, %s2701_s12  ;;  %1285 = vrot.lane.b32.xlu0 %v1260_v42, %s2701_s12  ;;  %v2451_v42 = vunpack.i.l.bf16 %v3293_v11  ;;  %v2447_v13 = vunpack.i.h.bf16 %v3295_v12  ;;  %v2457_v11 = vunpack.i.h.bf16 %v3299_v18  ;;  %v2461_v12 = vunpack.i.l.bf16 %v3297_v63 }
 0x351   :  { %v782_v10 = vpop.permute.xlu0 %781  ;;  %v784_v31 = vpop.permute.xlu1 %783  ;;  %v411_v63 = vsel %vm4898_vm1, %v2461_v12, 0.0  ;;  %v2477_v12 = vunpack.i.h.bf16 %v3353_v58 }
 0x352   :  { %v788_v33 = vsel %vm64_vm0, %v782_v10, %v3181_v50  ;;  %v789_v3 = vsel %vm64_vm0, %v784_v31, %v3213_v7  ;;  %v2472_v10 = vunpack.i.h.bf16 %v3351_v57 }
 0x353   :  { %1469 = vrot.lane.b32.xlu0 %v1459_v6, %s2700_s0  ;;  %1467 = vrot.lane.b32.xlu1 %v1458_v51, %s2700_s0 }
 0x355   :  { %v1866_v35 = vpop.permute.xlu0 %1865  ;;  %v1864_v36 = vpop.permute.xlu1 %1863 }
 0x356   :  { %v1871_v39 = vsel %vm64_vm0, %v1866_v35, %v3221_v61  ;;  %v1870_v40 = vsel %vm64_vm0, %v1864_v36, %v3206_v37 }
 0x357   :  { %1483 = vrot.lane.b32.xlu0 %v1458_v51, %s2701_s12  ;;  %1485 = vrot.lane.b32.xlu1 %v1459_v6, %s2701_s12  ;;  %v213_v6 = vsel %vm4898_vm1, %v2451_v42, 0.0  ;;  %v200_v51 = vsel %vm4900_vm2, %v2447_v13, 0.0  ;;  %v1298_v42 = vsel %vm4898_vm1, %v2472_v10, 0.0  ;;  %v2471_v13 = vunpack.i.l.bf16 %v3351_v57 }
 0x358   :  { %v220_v31 = vsub.f32 %v216_v47, %v200_v51  ;;  %v2492_v10 = vunpack.i.h.bf16 %v3359_v43 }
 0x359   :  { %v1295_v57 = vsel %vm4898_vm1, %v2471_v13, 0.0 }
 0x35a   :  { %v3497_v14 = vrot.slane %v220_v31, 1 }
 0x35b   :  { %591 = vrot.lane.b32.xlu1 %v582_v4, %s2700_s0  ;;  %593 = vrot.lane.b32.xlu0 %v583_v21, %s2700_s0 }
 0x35f   :  { %609 = vrot.lane.b32.xlu1 %v583_v21, %s2701_s12  ;;  %607 = vrot.lane.b32.xlu0 %v582_v4, %s2701_s12  ;;  %v224_v4 = vadd.f32 %v216_v47, %v200_v51  ;;  %v221_v21 = vadd.f32 %v213_v6, %v197_v54 }
 0x361   :  { %v3485_v35 = vmul.f32 0.5, %v221_v21  ;;  %v1279_v21 = vsel %vm4900_vm2, %v2466_v41, 0.0 }
 0x362   :  { %v1299_v41 = vsub.f32 %v1295_v57, %v1279_v21  ;;  %v1303_v13 = vadd.f32 %v1295_v57, %v1279_v21  ;;  %v2496_v57 = vunpack.i.l.bf16 %v3361_v45 }
 0x363   :  { %1675 = vrot.lane.b32.xlu0 %v1665_v26, %s2700_s0  ;;  %1673 = vrot.lane.b32.xlu1 %v1664_v8, %s2700_s0 }
 0x364   :  { %v3558_v20 = vmul.f32 0.5, %v1303_v13  ;;  %v3560_v23 = vrot.slane %v1299_v41, 7 }
 0x367   :  { %1689 = vrot.lane.b32.xlu0 %v1664_v8, %s2701_s12  ;;  %1691 = vrot.lane.b32.xlu1 %v1665_v26, %s2701_s12  ;;  %v398_v26 = vsel %vm4900_vm2, %v2457_v11, 0.0  ;;  %v2467_v8 = vunpack.i.h.bf16 %v3349_v56 }
 0x368   :  { %v418_v18 = vsub.f32 %v414_v0, %v398_v26  ;;  %v422_v36 = vadd.f32 %v414_v0, %v398_v26  ;;  %v2476_v0 = vunpack.i.l.bf16 %v3353_v58  ;;  %v2481_v26 = vunpack.i.l.bf16 %v3355_v59 }
 0x369   :  { %v1480_v58 = vsel %vm4900_vm2, %v2477_v12, 0.0  ;;  %v2501_v12 = vunpack.i.l.bf16 %v3363_v48 }
 0x36a   :  { %v3503_v11 = vmul.f32 0.5, %v422_v36 }
 0x36b   :  { %797 = vrot.lane.b32.xlu1 %v788_v33, %s2700_s0  ;;  %799 = vrot.lane.b32.xlu0 %v789_v3, %s2700_s0 }
 0x36f   :  { %815 = vrot.lane.b32.xlu1 %v789_v3, %s2701_s12  ;;  %813 = vrot.lane.b32.xlu0 %v788_v33, %s2701_s12  ;;  %v3483_v33 = vmul.f32 0.5, %v224_v4  ;;  %v217_v3 = vsub.f32 %v213_v6, %v197_v54  ;;  %v3505_v4 = vrot.slane %v418_v18, 1  ;;  %v2491_v18 = vunpack.i.l.bf16 %v3359_v43 }
 0x370   :  { %v1493_v43 = vsel %vm4898_vm1, %v2481_v26, 0.0 }
 0x371   :  { %v3500_v6 = vrot.slane %v217_v3, 7  ;;  %v617_v21 = vsel %vm4898_vm1, %v2491_v18, 0.0 }
 0x373   :  { %1881 = vrot.lane.b32.xlu0 %v1871_v39, %s2700_s0  ;;  %1879 = vrot.lane.b32.xlu1 %v1870_v40, %s2700_s0 }
 0x377   :  { %1895 = vrot.lane.b32.xlu0 %v1870_v40, %s2701_s12  ;;  %1897 = vrot.lane.b32.xlu1 %v1871_v39, %s2701_s12  ;;  %v395_v39 = vsel %vm4900_vm2, %v2456_v2, 0.0  ;;  %v1282_v40 = vsel %vm4900_vm2, %v2467_v8, 0.0  ;;  %v2482_v2 = vunpack.i.h.bf16 %v3355_v59  ;;  %v2487_v8 = vunpack.i.h.bf16 %v3357_v60 }
 0x378   :  { %v415_v51 = vsub.f32 %v411_v63, %v395_v39  ;;  %v419_v54 = vadd.f32 %v411_v63, %v395_v39  ;;  %v1306_v56 = vadd.f32 %v1298_v42, %v1282_v40  ;;  %v2486_v63 = vunpack.i.l.bf16 %v3357_v60 }
 0x379   :  { %v1302_v36 = vsub.f32 %v1298_v42, %v1282_v40  ;;  %v1496_v59 = vsel %vm4898_vm1, %v2482_v2, 0.0  ;;  %v1477_v60 = vsel %vm4900_vm2, %v2476_v0, 0.0  ;;  %v604_v40 = vsel %vm4900_vm2, %v2487_v8, 0.0 }
 0x37a   :  { %v3517_v31 = vmul.f32 0.5, %v419_v54  ;;  %v3519_v3 = vrot.slane %v415_v51, 7  ;;  %v3523_v39 = vmul.f32 0.5, %v1306_v56  ;;  %v2497_v54 = vunpack.i.h.bf16 %v3361_v45 }
 0x37b   :  { %v2502_v51 = vunpack.i.h.bf16 %v3363_v48  ;;  %v620_v42 = vsel %vm4898_vm1, %v2492_v10, 0.0  ;;  %v601_v56 = vsel %vm4900_vm2, %v2486_v63, 0.0  ;;  %v3551_v9 = vrot.slane %v1302_v36, 1 }
 0x37c   :  { %v1504_v10 = vadd.f32 %v1496_v59, %v1480_v58  ;;  %v1501_v47 = vadd.f32 %v1493_v43, %v1477_v60  ;;  %v628_v63 = vadd.f32 %v620_v42, %v604_v40  ;;  %v1686_v18 = vsel %vm4900_vm2, %v2497_v54, 0.0 }
 0x37d   :  { %v1702_v45 = vsel %vm4898_vm1, %v2502_v51, 0.0  ;;  %v625_v26 = vadd.f32 %v617_v21, %v601_v56  ;;  %v1683_v36 = vsel %vm4900_vm2, %v2496_v57, 0.0  ;;  %v1699_v8 = vsel %vm4898_vm1, %v2501_v12, 0.0 }
 0x37e   :  { %v2512_v54 = vunpack.i.h.bf16 %v3367_v5  ;;  %v1500_v51 = vsub.f32 %v1496_v59, %v1480_v58  ;;  %v3568_v29 = vmul.f32 0.5, %v1504_v10  ;;  %v1497_v13 = vsub.f32 %v1493_v43, %v1477_v60 }
 0x37f   :  { %v1710_v48 = vadd.f32 %v1702_v45, %v1686_v18  ;;  %v3570_v41 = vmul.f32 0.5, %v1501_v47  ;;  %v624_v7 = vsub.f32 %v620_v42, %v604_v40  ;;  %v3572_v50 = vmul.f32 0.5, %v628_v63 }
 0x380   :  { %4913 = vst [vmem:[#allocation29_spill] sm:$0xff] %v3568_v29  ;;  %v621_v57 = vsub.f32 %v617_v21, %v601_v56  ;;  %v3574_v19 = vmul.f32 0.5, %v625_v26  ;;  %v1707_v12 = vadd.f32 %v1699_v8, %v1683_v36  ;;  %v1706_v34 = vsub.f32 %v1702_v45, %v1686_v18 }
 0x381   :  { %v1703_v53 = vsub.f32 %v1699_v8, %v1683_v36  ;;  %v810_v58 = vsel %vm4900_vm2, %v2507_v16, 0.0  ;;  %v826_v47 = vsel %vm4898_vm1, %v2512_v54, 0.0  ;;  %v3583_v40 = vrot.slane %v1500_v51, 1 }
 0x382   :  { %v3585_v42 = vrot.slane %v1497_v13, 7  ;;  %v3587_v56 = vmul.f32 0.5, %v1710_v48  ;;  %v3591_v21 = vrot.slane %v624_v7, 1  ;;  %v3593_v16 = vrot.slane %v621_v57, 7 }
 0x383   :  { %v3595_v26 = vmul.f32 0.5, %v1707_v12  ;;  %v807_v8 = vsel %vm4900_vm2, %v2506_v17, 0.0  ;;  %v834_v10 = vadd.f32 %v826_v47, %v810_v58  ;;  %v823_v63 = vsel %vm4898_vm1, %v2511_v46, 0.0 }
 0x384   :  { %4914 = vst [vmem:[#allocation30_spill] sm:$0xff] %v3587_v56  ;;  %v3603_v48 = vrot.slane %v1706_v34, 1  ;;  %v3605_v36 = vrot.slane %v1703_v53, 7  ;;  %v830_v13 = vsub.f32 %v826_v47, %v810_v58  ;;  %v827_v46 = vsub.f32 %v823_v63, %v807_v8 }
 0x385   :  { %4915 = vst [vmem:[#allocation31_spill] sm:$0xff] %v3595_v26  ;;  %v831_v12 = vadd.f32 %v823_v63, %v807_v8  ;;  %v3617_v18 = vmul.f32 0.5, %v834_v10  ;;  %v3645_v43 = vmul.f32 0.5, %v3389_v28 }
 0x386   :  { %4916 = vst [vmem:[#allocation32_spill] sm:$0xff] %v3603_v48  ;;  %v4921_v48 = vsub.f32 %v3383_v15, %v3375_v27 }
 0x387   :  { %4917 = vst [vmem:[#allocation33_spill] sm:$0xff] %v3617_v18  ;;  %v3639_v45 = vmul.f32 0.5, %v831_v12 }
 0x388   :  { %v3667_v18 = vrot.slane %v4921_v48, 7 }
 0x389   :  { %4919 = vst [vmem:[#allocation35_spill] sm:$0xff] %v3639_v45 }
 0x3ad   :  { %v3545_v2 = vpop.permute.xlu0 %189  ;;  %v3547_v0 = vpop.permute.xlu1 %187 }
 0x3ae   :  { %v198_v58 = vsel %vm4900_vm2, %v3547_v0, 0.0  ;;  %v199_v47 = vsel %vm4900_vm2, %v3545_v2, 0.0  ;;  %v3641_v2 = vrot.slane %v827_v46, 7 }
 0x3b1   :  { %v204_v61 = vpop.permute.xlu0 %203  ;;  %v206_v37 = vpop.permute.xlu1 %205 }
 0x3b2   :  { %v214_v17 = vsel %vm4898_vm1, %v204_v61, 0.0  ;;  %v215_v62 = vsel %vm4898_vm1, %v206_v37, 0.0 }
 0x3b3   :  { %v222_v8 = vadd.f32 %v214_v17, %v198_v58  ;;  %v3633_v51 = vsub.f32 %v215_v62, %v199_v47  ;;  %v223_v0 = vadd.f32 %v215_v62, %v199_v47 }
 0x3b5   :  { %v388_v59 = vpop.permute.xlu0 %387  ;;  %v386_v60 = vpop.permute.xlu1 %385  ;;  %v226_v56 = vmul.f32 0.5, %v222_v8  ;;  %v243_v28 = vrot.slane %v3633_v51, 1 }
 0x3b6   :  { %v396_v61 = vsel %vm4900_vm2, %v386_v60, 0.0  ;;  %v397_v37 = vsel %vm4900_vm2, %v388_v59, 0.0  ;;  %v3637_v60 = vrot.slane %v830_v13, 1  ;;  %v227_v59 = vmul.f32 0.5, %v223_v0 }
 0x3b7   :  { %v230_v45 = vadd.f32 %v226_v56, %v3016_v1 }
 0x3b8   :  { %4918 = vst [vmem:[#allocation34_spill] sm:$0xff] %v3637_v60  ;;  %v231_v15 = vadd.f32 %v227_v59, %v3014_v55 }
 0x3b9   :  { %v402_v7 = vpop.permute.xlu0 %401  ;;  %v404_v54 = vpop.permute.xlu1 %403 }
 0x3ba   :  { %v412_v57 = vsel %vm4898_vm1, %v402_v7, 0.0  ;;  %v413_v53 = vsel %vm4898_vm1, %v404_v54, 0.0  ;;  %v3631_v54 = vsub.f32 %v214_v17, %v198_v58  ;;  %v3648_v17 = vmul.f32 0.5, %v3395_v30 }
 0x3bb   :  { %v3629_v63 = vsub.f32 %v412_v57, %v396_v61  ;;  %v3635_v34 = vsub.f32 %v413_v53, %v397_v37  ;;  %v420_v5 = vadd.f32 %v412_v57, %v396_v61  ;;  %v421_v58 = vadd.f32 %v413_v53, %v397_v37 }
 0x3bc   :  { %v234_v57 = vrot.slane %v3631_v54, 7  ;;  %v242_v61 = vrot.slane %v3631_v54, 1  ;;  %v4920_v53 = vsub.f32 %v3379_v25, %v3371_v24  ;;  %v235_v37 = vrot.slane %v3633_v51, 7 }
 0x3bd   :  { %v1272_v7 = vpop.permute.xlu0 %1271  ;;  %v1270_v10 = vpop.permute.xlu1 %1269  ;;  %v432_v62 = vrot.slane %v3629_v63, 7  ;;  %v433_v13 = vrot.slane %v3635_v34, 7  ;;  %v441_v12 = vrot.slane %v3635_v34, 1  ;;  %v424_v26 = vmul.f32 0.5, %v420_v5 }
 0x3be   :  { %v3660_v8 = vrot.slane %v4920_v53, 1  ;;  %v440_v0 = vrot.slane %v3629_v63, 1  ;;  %v425_v60 = vmul.f32 0.5, %v421_v58  ;;  %v239_v27 = vsel %vm124_vm4, %v3500_v6, %v234_v57 }
 0x3bf   :  { %v436_v24 = vsel %vm124_vm4, %v432_v62, %v433_v13  ;;  %v443_v25 = vsel %vm131_vm3, %v441_v12, %v3505_v4  ;;  %v246_v1 = vsel %vm131_vm3, %v242_v61, %v243_v28  ;;  %v238_v56 = vsel %vm124_vm4, %v234_v57, %v235_v37 }
 0x3c0   :  { %v245_v4 = vsel %vm131_vm3, %v243_v28, %v3497_v14  ;;  %v428_v48 = vadd.f32 %v424_v26, %v3044_v38  ;;  %v437_v58 = vsel %vm124_vm4, %v3519_v3, %v432_v62  ;;  %v429_v6 = vadd.f32 %v425_v60, %v3057_v49 }
 0x3c1   :  { %v1286_v47 = vpop.permute.xlu0 %1285  ;;  %v1288_v46 = vpop.permute.xlu1 %1287  ;;  %v444_v55 = vsel %vm131_vm3, %v440_v0, %v441_v12  ;;  %v449_v59 = vadd.f32 %v443_v25, %v436_v24  ;;  %v262_v13 = vrot.slane %v230_v45, 1  ;;  %v270_v61 = vrot.slane %v230_v45, 7 }
 0x3c2   :  { %v250_v29 = vadd.f32 %v246_v1, %v239_v27  ;;  %v1296_v57 = vsel %vm4898_vm1, %v1286_v47, 0.0  ;;  %v251_v28 = vadd.f32 %v245_v4, %v238_v56  ;;  %v263_v38 = vrot.slane %v231_v15, 1 }
 0x3c3   :  { %v271_v26 = vrot.slane %v231_v15, 7  ;;  %v1297_v3 = vsel %vm4898_vm1, %v1288_v46, 0.0  ;;  %v468_v62 = vrot.slane %v428_v48, 7  ;;  %v448_v49 = vadd.f32 %v444_v55, %v437_v58 }
 0x3c4   :  { %v1281_v60 = vsel %vm4900_vm2, %v1272_v7, 0.0  ;;  %v1280_v45 = vsel %vm4900_vm2, %v1270_v10, 0.0  ;;  %v453_v12 = vmul.f32 0.5, %v449_v59  ;;  %v461_v0 = vrot.slane %v429_v6, 1 }
 0x3c5   :  { %v3677_v5 = vpop.permute.xlu0 %1469  ;;  %v3679_v53 = vpop.permute.xlu1 %1467  ;;  %v3707_v24 = vsub.f32 %v1296_v57, %v1280_v45  ;;  %v1304_v47 = vadd.f32 %v1296_v57, %v1280_v45  ;;  %v4922_v25 = vrot.slane %v3485_v35, 7  ;;  %v460_v15 = vrot.slane %v428_v48, 1 }
 0x3c6   :  { %v469_v46 = vrot.slane %v429_v6, 7  ;;  %v3713_v1 = vsub.f32 %v1297_v3, %v1281_v60  ;;  %v254_v7 = vmul.f32 0.5, %v250_v29  ;;  %v255_v58 = vmul.f32 0.5, %v251_v28 }
 0x3c7   :  { %v275_v27 = vsel %vm124_vm4, %v4922_v25, %v270_v61  ;;  %v4923_v10 = vrot.slane %v3483_v33, 1  ;;  %v266_v59 = vsel %vm131_vm3, %v262_v13, %v263_v38  ;;  %v274_v35 = vsel %vm124_vm4, %v270_v61, %v271_v26 }
 0x3c8   :  { %v4924_v48 = vrot.slane %v3517_v31, 7  ;;  %v452_v57 = vmul.f32 0.5, %v448_v49  ;;  %v1305_v45 = vadd.f32 %v1297_v3, %v1281_v60  ;;  %v457_v29 = vadd.f32 %v453_v12, %v3635_v34 }
 0x3c9   :  { %v1484_v37 = vpop.permute.xlu0 %1483  ;;  %v1486_v14 = vpop.permute.xlu1 %1485  ;;  %v265_v55 = vsel %vm131_vm3, %v263_v38, %v4923_v10  ;;  %v4925_v33 = vrot.slane %v3503_v11, 1  ;;  %v1308_v25 = vmul.f32 0.5, %v1304_v47  ;;  %v1316_v13 = vrot.slane %v3707_v24, 7 }
 0x3ca   :  { %v473_v6 = vsel %vm124_vm4, %v4924_v48, %v468_v62  ;;  %v464_v61 = vsel %vm131_vm3, %v460_v15, %v461_v0  ;;  %v472_v31 = vsel %vm124_vm4, %v468_v62, %v469_v46  ;;  %v1317_v38 = vrot.slane %v3713_v1, 7 }
 0x3cb   :  { %v463_v28 = vsel %vm131_vm3, %v461_v0, %v4925_v33  ;;  %v1325_v26 = vrot.slane %v3713_v1, 1  ;;  %v258_v11 = vadd.f32 %v254_v7, %v3631_v54  ;;  %v259_v49 = vadd.f32 %v255_v58, %v3633_v51 }
 0x3cc   :  { %v278_v60 = vsub.f32 %v266_v59, %v275_v27  ;;  %v279_v12 = vsub.f32 %v265_v55, %v274_v35  ;;  %v456_v47 = vadd.f32 %v452_v57, %v3629_v63  ;;  %v1324_v10 = vrot.slane %v3707_v24, 1 }
 0x3cd   :  { %v594_v56 = vpop.permute.xlu0 %593  ;;  %v592_v4 = vpop.permute.xlu1 %591  ;;  %v1309_v0 = vmul.f32 0.5, %v1305_v45  ;;  %v476_v15 = vsub.f32 %v464_v61, %v473_v6  ;;  %v477_v48 = vsub.f32 %v463_v28, %v472_v31  ;;  %v1312_v62 = vadd.f32 %v1308_v25, %v3072_v22 }
 0x3ce   :  { %v1494_v46 = vsel %vm4898_vm1, %v1484_v37, 0.0  ;;  %v3746_v33 = vadd.f32 %v457_v29, %v259_v49  ;;  %v1320_v54 = vsel %vm124_vm4, %v1316_v13, %v1317_v38  ;;  %v1327_v51 = vsel %vm131_vm3, %v1325_v26, %v3551_v9 }
 0x3cf   :  { %v1321_v22 = vsel %vm124_vm4, %v3560_v23, %v1316_v13  ;;  %v1478_v37 = vsel %vm4900_vm2, %v3679_v53, 0.0  ;;  %v1495_v7 = vsel %vm4898_vm1, %v1486_v14, 0.0  ;;  %v602_v58 = vsel %vm4900_vm2, %v592_v4, 0.0 }
 0x3d0   :  { %v1313_v9 = vadd.f32 %v1309_v0, %v3085_v32  ;;  %v1328_v55 = vsel %vm131_vm3, %v1324_v10, %v1325_v26  ;;  %v1502_v59 = vadd.f32 %v1494_v46, %v1478_v37  ;;  %v1333_v23 = vadd.f32 %v1327_v51, %v1320_v54 }
 0x3d1   :  { %v608_v3 = vpop.permute.xlu0 %607  ;;  %v610_v34 = vpop.permute.xlu1 %609  ;;  %v1479_v53 = vsel %vm4900_vm2, %v3677_v5, 0.0  ;;  %v3775_v57 = vsub.f32 %v1494_v46, %v1478_v37  ;;  %v3779_v4 = vadd.f32 %v456_v47, %v258_v11  ;;  %v3781_v32 = vadd.f32 %v476_v15, %v278_v60 }
 0x3d2   :  { %v618_v63 = vsel %vm4898_vm1, %v608_v3, 0.0  ;;  %v619_v14 = vsel %vm4898_vm1, %v610_v34, 0.0  ;;  %v3783_v45 = vsub.f32 %v1495_v7, %v1479_v53  ;;  %v603_v29 = vsel %vm4900_vm2, %v594_v56, 0.0 }
 0x3d3   :  { %v626_v35 = vadd.f32 %v618_v63, %v602_v58  ;;  %v3787_v28 = vadd.f32 %v477_v48, %v279_v12  ;;  %v1352_v25 = vrot.slane %v1312_v62, 7  ;;  %v1332_v13 = vadd.f32 %v1328_v55, %v1321_v22 }
 0x3d4   :  { %v627_v61 = vadd.f32 %v619_v14, %v603_v29  ;;  %v1344_v31 = vrot.slane %v1312_v62, 1  ;;  %v1345_v38 = vrot.slane %v1313_v9, 1  ;;  %v1506_v26 = vmul.f32 0.5, %v1502_v59  ;;  %v4930_v59 = vld [vmem:[#allocation22_spill] sm:$0xff] }
 0x3d5   :  { %v3755_v27 = vpop.permute.xlu0 %1675  ;;  %v3770_v6 = vpop.permute.xlu1 %1673  ;;  %v630_v3 = vmul.f32 0.5, %v626_v35  ;;  %v1337_v34 = vmul.f32 0.5, %v1333_v23  ;;  %v1353_v11 = vrot.slane %v1313_v9, 7  ;;  %v1514_v49 = vrot.slane %v3775_v57, 7  ;;  %v4929_v9 = vld [vmem:[#allocation21_spill] sm:$0xff] }
 0x3d6   :  { %v631_v60 = vmul.f32 0.5, %v627_v61  ;;  %v1522_v47 = vrot.slane %v3775_v57, 1  ;;  %v1503_v10 = vadd.f32 %v1495_v7, %v1479_v53  ;;  %v1515_v56 = vrot.slane %v3783_v45, 7 }
 0x3d7   :  { %v1523_v12 = vrot.slane %v3783_v45, 1  ;;  %v4926_v15 = vrot.slane %v3558_v20, 7  ;;  %v1336_v62 = vmul.f32 0.5, %v1332_v13  ;;  %v3801_v46 = vsub.f32 %v618_v63, %v602_v58  ;;  %v4928_v20 = vld [vmem:[#allocation19_spill] sm:$0xff] }
 0x3d8   :  { %v3803_v54 = vsub.f32 %v619_v14, %v603_v29  ;;  %v4927_v51 = vrot.slane %v3523_v39, 1  ;;  %v3813_v37 = vsel %vm131_vm3, %v1344_v31, %v1345_v38  ;;  %v3816_v7 = vadd.f32 %v1506_v26, %v4928_v20 }
 0x3d9   :  { %v1690_v5 = vpop.permute.xlu0 %1689  ;;  %v3793_v0 = vpop.permute.xlu1 %1691  ;;  %v3799_v48 = vsel %vm124_vm4, %v4926_v15, %v1352_v25  ;;  %v634_v55 = vadd.f32 %v630_v3, %v4929_v9  ;;  %v3820_v63 = vadd.f32 %v1337_v34, %v3713_v1  ;;  %v3824_v58 = vsel %vm124_vm4, %v1352_v25, %v1353_v11 }
 0x3da   :  { %v3809_v22 = vsel %vm131_vm3, %v1345_v38, %v4927_v51  ;;  %v1519_v39 = vsel %vm124_vm4, %v3585_v42, %v1514_v49  ;;  %v635_v35 = vadd.f32 %v631_v60, %v4930_v59  ;;  %v1507_v53 = vmul.f32 0.5, %v1503_v10 }
 0x3db   :  { %v1518_v14 = vsel %vm124_vm4, %v1514_v49, %v1515_v56  ;;  %v1525_v1 = vsel %vm131_vm3, %v1523_v12, %v3583_v40  ;;  %v1526_v29 = vsel %vm131_vm3, %v1522_v47, %v1523_v12  ;;  %v638_v25 = vrot.slane %v3801_v46, 7  ;;  %v4931_v47 = vld [vmem:[#allocation20_spill] sm:$0xff] }
 0x3dc   :  { %v646_v13 = vrot.slane %v3801_v46, 1  ;;  %v639_v42 = vrot.slane %v3803_v54, 7  ;;  %v647_v61 = vrot.slane %v3803_v54, 1  ;;  %v1360_v31 = vsub.f32 %v3813_v37, %v3799_v48 }
 0x3dd   :  { %v800_v23 = vpop.permute.xlu0 %799  ;;  %v1550_v26 = vrot.slane %v3816_v7, 7  ;;  %v674_v40 = vrot.slane %v634_v55, 7  ;;  %v798_v3 = vpop.permute.xlu1 %797  ;;  %v3847_v34 = vadd.f32 %v1336_v62, %v3707_v24  ;;  %v1542_v11 = vrot.slane %v3816_v7, 1 }
 0x3de   :  { %v666_v49 = vrot.slane %v634_v55, 1  ;;  %v667_v60 = vrot.slane %v635_v35, 1  ;;  %v3851_v10 = vadd.f32 %v1507_v53, %v4931_v47  ;;  %v1530_v56 = vadd.f32 %v1526_v29, %v1519_v39 }
 0x3df   :  { %v1531_v12 = vadd.f32 %v1525_v1, %v1518_v14  ;;  %v1700_v15 = vsel %vm4898_vm1, %v1690_v5, 0.0  ;;  %v643_v51 = vsel %vm124_vm4, %v3593_v16, %v638_v25  ;;  %v642_v24 = vsel %vm124_vm4, %v638_v25, %v639_v42 }
 0x3e0   :  { %v649_v62 = vsel %vm131_vm3, %v647_v61, %v3591_v21  ;;  %v650_v20 = vsel %vm131_vm3, %v646_v13, %v647_v61  ;;  %v4932_v55 = vrot.slane %v3570_v41, 7  ;;  %v4933_v16 = vrot.slane %v3574_v19, 7 }
 0x3e1   :  { %v814_v9 = vpop.permute.xlu0 %813  ;;  %v1685_v21 = vsel %vm4900_vm2, %v3755_v27, 0.0  ;;  %v1684_v59 = vsel %vm4900_vm2, %v3770_v6, 0.0  ;;  %v670_v41 = vsel %vm131_vm3, %v666_v49, %v667_v60  ;;  %v675_v53 = vrot.slane %v635_v35, 7  ;;  %v816_v42 = vpop.permute.xlu1 %815 }
 0x3e2   :  { %v3871_v5 = vsel %vm124_vm4, %v4932_v55, %v1550_v26  ;;  %v679_v39 = vsel %vm124_vm4, %v4933_v16, %v674_v40  ;;  %v3885_v14 = vsub.f32 %v1700_v15, %v1684_v59  ;;  %v1708_v1 = vadd.f32 %v1700_v15, %v1684_v59 }
 0x3e3   :  { %v1534_v29 = vmul.f32 0.5, %v1530_v56  ;;  %v654_v19 = vadd.f32 %v650_v20, %v643_v51  ;;  %v655_v25 = vadd.f32 %v649_v62, %v642_v24  ;;  %v824_v13 = vsel %vm4898_vm1, %v814_v9, 0.0 }
 0x3e4   :  { %v3889_v61 = vmul.f32 0.5, %v1531_v12  ;;  %v1543_v27 = vrot.slane %v3851_v10, 1  ;;  %v1551_v6 = vrot.slane %v3851_v10, 7  ;;  %v808_v49 = vsel %vm4900_vm2, %v798_v3, 0.0 }
 0x3e5   :  { %v4934_v35 = vrot.slane %v3572_v50, 1  ;;  %v682_v56 = vsub.f32 %v670_v41, %v679_v39  ;;  %v3899_v15 = vsub.f32 %v824_v13, %v808_v49  ;;  %v832_v51 = vadd.f32 %v824_v13, %v808_v49  ;;  %v3906_v9 = vpop.permute.xlu0 %1881 }
 0x3e6   :  { %v678_v12 = vsel %vm124_vm4, %v674_v40, %v675_v53  ;;  %v1712_v24 = vmul.f32 0.5, %v1708_v1  ;;  %v1720_v62 = vrot.slane %v3885_v14, 7  ;;  %v825_v20 = vsel %vm4898_vm1, %v816_v42, 0.0 }
 0x3e7   :  { %v669_v47 = vsel %vm131_vm3, %v667_v60, %v4934_v35  ;;  %v3909_v50 = vadd.f32 %v1534_v29, %v3775_v57  ;;  %v658_v3 = vmul.f32 0.5, %v654_v19  ;;  %v659_v60 = vmul.f32 0.5, %v655_v25  ;;  %v4935_v29 = vld [vmem:[#allocation23_spill] sm:$0xff] }
 0x3e8   :  { %v809_v55 = vsel %vm4900_vm2, %v800_v23, 0.0  ;;  %v1701_v40 = vsel %vm4898_vm1, %v3793_v0, 0.0  ;;  %v836_v16 = vmul.f32 0.5, %v832_v51  ;;  %v683_v41 = vsub.f32 %v669_v47, %v678_v12  ;;  %v4936_v0 = vld [vmem:[#allocation25_spill] sm:$0xff]  ;;  %v4937_v12 = vld [vmem:[#allocation27_spill] sm:$0xff] }
 0x3e9   :  { %v829_v39 = vsub.f32 %v825_v20, %v809_v55  ;;  %v833_v59 = vadd.f32 %v825_v20, %v809_v55  ;;  %v690_v53 = vadd.f32 %v682_v56, %v3781_v32  ;;  %v1728_v1 = vrot.slane %v3885_v14, 1  ;;  %v1896_v20 = vpop.permute.xlu0 %1895 }
 0x3ea   :  { %v844_v57 = vrot.slane %v3899_v15, 7  ;;  %v3920_v19 = vadd.f32 %v1712_v24, %v4935_v29  ;;  %v1725_v23 = vsel %vm124_vm4, %v3605_v36, %v1720_v62  ;;  %v840_v25 = vadd.f32 %v836_v16, %v4936_v0 }
 0x3eb   :  { %v837_v13 = vmul.f32 0.5, %v833_v59  ;;  %v662_v42 = vadd.f32 %v658_v3, %v3801_v46  ;;  %v3929_v49 = vsub.f32 %v1701_v40, %v1685_v21  ;;  %v852_v32 = vrot.slane %v3899_v15, 1  ;;  %v4938_v59 = vld [vmem:[#allocation35_spill] sm:$0xff] }
 0x3ec   :  { %v845_v35 = vrot.slane %v829_v39, 7  ;;  %v663_v47 = vadd.f32 %v659_v60, %v3803_v54  ;;  %v872_v56 = vrot.slane %v840_v25, 1  ;;  %v880_v51 = vrot.slane %v840_v25, 7  ;;  %v1880_v25 = vpop.permute.xlu1 %1879 }
 0x3ed   :  { %v841_v24 = vadd.f32 %v837_v13, %v4937_v12  ;;  %v1709_v55 = vadd.f32 %v1701_v40, %v1685_v21  ;;  %v849_v36 = vsel %vm124_vm4, %v3641_v2, %v844_v57  ;;  %v853_v3 = vrot.slane %v829_v39, 1  ;;  %v4940_v40 = vld [vmem:[#allocation34_spill] sm:$0xff] }
 0x3ee   :  { %v848_v46 = vsel %vm124_vm4, %v844_v57, %v845_v35  ;;  %v691_v16 = vadd.f32 %v683_v41, %v3787_v28  ;;  %v4939_v29 = vrot.slane %v4938_v59, 7  ;;  %v1729_v21 = vrot.slane %v3929_v49, 1  ;;  %v4941_v35 = vld [vmem:[#allocation33_spill] sm:$0xff] }
 0x3ef   :  { %v873_v60 = vrot.slane %v841_v24, 1  ;;  %v881_v0 = vrot.slane %v841_v24, 7  ;;  %v855_v2 = vsel %vm131_vm3, %v853_v3, %v4940_v40  ;;  %v856_v57 = vsel %vm131_vm3, %v852_v32, %v853_v3 }
 0x3f0   :  { %v885_v54 = vsel %vm124_vm4, %v4939_v29, %v880_v51  ;;  %v1906_v28 = vsel %vm4898_vm1, %v1896_v20, 0.0  ;;  %v860_v41 = vadd.f32 %v856_v57, %v849_v36  ;;  %v861_v13 = vadd.f32 %v855_v2, %v848_v46 }
 0x3f1   :  { %v4942_v12 = vrot.slane %v4941_v35, 1  ;;  %v876_v59 = vsel %vm131_vm3, %v872_v56, %v873_v60  ;;  %v1713_v29 = vmul.f32 0.5, %v1709_v55  ;;  %v1721_v30 = vrot.slane %v3929_v49, 7 }
 0x3f2   :  { %v884_v40 = vsel %vm124_vm4, %v880_v51, %v881_v0  ;;  %v888_v32 = vsub.f32 %v876_v59, %v885_v54  ;;  %v864_v3 = vmul.f32 0.5, %v860_v41  ;;  %v865_v38 = vmul.f32 0.5, %v861_v13  ;;  %v1898_v54 = vpop.permute.xlu1 %1897 }
 0x3f3   :  { %v875_v24 = vsel %vm131_vm3, %v873_v60, %v4942_v12  ;;  %v1890_v36 = vsel %vm4900_vm2, %v1880_v25, 0.0  ;;  %v686_v46 = vadd.f32 %v662_v42, %v3779_v4  ;;  %v687_v2 = vadd.f32 %v663_v47, %v3746_v33  ;;  %v4943_v4 = vld [vmem:[#allocation24_spill] sm:$0xff] }
 0x3f4   :  { %v889_v20 = vsub.f32 %v875_v24, %v884_v40  ;;  %v896_v57 = vadd.f32 %v888_v32, %v690_v53  ;;  %v1914_v35 = vadd.f32 %v1906_v28, %v1890_v36  ;;  %v1732_v56 = vsel %vm131_vm3, %v1728_v1, %v1729_v21 }
 0x3f5   :  { %v868_v55 = vadd.f32 %v864_v3, %v3899_v15  ;;  %v869_v60 = vadd.f32 %v865_v38, %v829_v39  ;;  %v1546_v0 = vsel %vm131_vm3, %v1542_v11, %v1543_v27  ;;  %v1717_v42 = vadd.f32 %v1713_v29, %v4943_v4  ;;  %v4944_v15 = vld [vmem:[#allocation32_spill] sm:$0xff]  ;;  %v4950_v4 = vld [vmem:[#allocation30_spill] sm:$0xff] }
 0x3f6   :  { %v897_v51 = vadd.f32 %v889_v20, %v691_v16  ;;  %v1724_v33 = vsel %vm124_vm4, %v1720_v62, %v1721_v30  ;;  %v3979_v53 = vmul.f32 0.25, %v896_v57  ;;  %v1731_v38 = vsel %vm131_vm3, %v1729_v21, %v4944_v15  ;;  %v4945_v20 = vld [vmem:[#allocation29_spill] sm:$0xff] }
 0x3f7   :  { %v892_v39 = vadd.f32 %v868_v55, %v686_v46  ;;  %v893_v1 = vadd.f32 %v869_v60, %v687_v2  ;;  %v1748_v16 = vrot.slane %v3920_v19, 1  ;;  %v1736_v11 = vadd.f32 %v1732_v56, %v1725_v23  ;;  %v4948_v55 = vld [vmem:[#allocation31_spill] sm:$0xff] }
 0x3f8   :  { %v3984_v47 = vmul.f32 0.25, %v897_v51  ;;  %953 = vst.msk [vmem:[#allocation8] sm:$0xff] %vm4899_vm5, %v3979_v53  ;;  %v1918_v25 = vmul.f32 0.5, %v1914_v35  ;;  %v1907_v30 = vsel %vm4898_vm1, %v1898_v54, 0.0  ;;  %v912_v21 = vmul.f32 %v3979_v53, %v3979_v53 }
 0x3f9   :  { %v3991_v62 = vmul.f32 0.25, %v892_v39  ;;  %v3993_v41 = vmul.f32 0.25, %v893_v1  ;;  %v1756_v23 = vrot.slane %v3920_v19, 7  ;;  %v1737_v12 = vadd.f32 %v1731_v38, %v1724_v33 }
 0x3fa   :  { %v913_v13 = vmul.f32 %v3984_v47, %v3984_v47  ;;  %954 = vst.msk [vmem:[#allocation8 + $0x8] sm:$0xff] %vm4899_vm5, %v3984_v47  ;;  %v1749_v24 = vrot.slane %v1717_v42, 1  ;;  %v1891_v59 = vsel %vm4900_vm2, %v3906_v9, 0.0  ;;  %v1910_v32 = vsub.f32 %v1906_v28, %v1890_v36 }
 0x3fb   :  { %v908_v29 = vmul.f32 %v3991_v62, %v3991_v62  ;;  %v909_v40 = vmul.f32 %v3993_v41, %v3993_v41  ;;  %951 = vst.msk [vmem:[#allocation6] sm:$0xff] %vm4899_vm5, %v3991_v62  ;;  %952 = vst.msk [vmem:[#allocation6 + $0x8] sm:$0xff] %vm4899_vm5, %v3993_v41  ;;  %v1911_v19 = vsub.f32 %v1907_v30, %v1891_v59  ;;  %v4946_v46 = vrot.slane %v4945_v20, 1 }
 0x3fc   :  { %v1539_v3 = vadd.f32 %v3889_v61, %v3783_v45  ;;  %v1554_v2 = vsel %vm124_vm4, %v1550_v26, %v1551_v6  ;;  %v1757_v57 = vrot.slane %v1717_v42, 7  ;;  %v1740_v28 = vmul.f32 0.5, %v1736_v11  ;;  %v4947_v45 = vld [vmem:[#allocation26_spill] sm:$0xff] }
 0x3fd   :  { %v1545_v9 = vsel %vm131_vm3, %v1543_v27, %v4946_v46  ;;  %v4027_v36 = vadd.f32 %v912_v21, %v908_v29  ;;  %v4029_v35 = vadd.f32 %v913_v13, %v909_v40  ;;  %v1922_v61 = vadd.f32 %v1918_v25, %v4947_v45 }
 0x3fe   :  { %v1558_v56 = vsub.f32 %v1546_v0, %v3871_v5  ;;  %v4949_v60 = vrot.slane %v4948_v55, 7  ;;  %v1741_v27 = vmul.f32 0.5, %v1737_v12  ;;  %v1915_v7 = vadd.f32 %v1907_v30, %v1891_v59 }
 0x3ff   :  { %v1752_v26 = vsel %vm131_vm3, %v1748_v16, %v1749_v24  ;;  %2523 = vrsqrt.f32 %v4027_v36  ;;  %v1926_v6 = vrot.slane %v1910_v32, 7  ;;  %v1927_v51 = vrot.slane %v1911_v19, 7 }
 0x400   :  { %v1761_v10 = vsel %vm124_vm4, %v4949_v60, %v1756_v23  ;;  %v1559_v54 = vsub.f32 %v1545_v9, %v1554_v2  ;;  %v4951_v42 = vrot.slane %v4950_v4, 1  ;;  %v1760_v0 = vsel %vm124_vm4, %v1756_v23, %v1757_v57 }
 0x401   :  { %2525 = vrsqrt.f32 %v4029_v35  ;;  %v1562_v33 = vadd.f32 %v3909_v50, %v3847_v34  ;;  %v1744_v15 = vadd.f32 %v1740_v28, %v3885_v14  ;;  %v1934_v38 = vrot.slane %v1910_v32, 1 }
 0x402   :  { %v1751_v5 = vsel %vm131_vm3, %v1749_v24, %v4951_v42  ;;  %v1962_v39 = vrot.slane %v1922_v61, 7  ;;  %v1563_v1 = vadd.f32 %v1539_v3, %v3820_v63  ;;  %v1745_v16 = vadd.f32 %v1741_v27, %v3929_v49  ;;  %v4953_v49 = vld [vmem:[#allocation28_spill] sm:$0xff] }
 0x403   :  { %v1764_v11 = vsub.f32 %v1752_v26, %v1761_v10  ;;  %v1919_v25 = vmul.f32 0.5, %v1915_v7  ;;  %v1765_v30 = vsub.f32 %v1751_v5, %v1760_v0  ;;  %v1931_v21 = vsel %vm124_vm4, %v3667_v18, %v1926_v6 }
 0x404   :  { %v1930_v13 = vsel %vm124_vm4, %v1926_v6, %v1927_v51  ;;  %v1935_v23 = vrot.slane %v1911_v19, 1  ;;  %v1566_v34 = vadd.f32 %v1558_v56, %v1360_v31  ;;  %v4952_v63 = vsub.f32 %v3809_v22, %v3824_v58 }
 0x405   :  { %v1954_v50 = vrot.slane %v1922_v61, 1  ;;  %v1923_v12 = vadd.f32 %v1919_v25, %v4953_v49  ;;  %v1768_v24 = vadd.f32 %v1744_v15, %v1562_v33  ;;  %v4954_v59 = vrot.slane %v3648_v17, 7 }
 0x406   :  { %v1567_v14 = vadd.f32 %v1559_v54, %v4952_v63  ;;  %v1937_v29 = vsel %vm131_vm3, %v1935_v23, %v3660_v8  ;;  %v1938_v48 = vsel %vm131_vm3, %v1934_v38, %v1935_v23  ;;  %v1769_v40 = vadd.f32 %v1745_v16, %v1563_v1 }
 0x407   :  { %v1967_v18 = vsel %vm124_vm4, %v4954_v59, %v1962_v39  ;;  %v1942_v37 = vadd.f32 %v1938_v48, %v1931_v21  ;;  %v1943_v31 = vadd.f32 %v1937_v29, %v1930_v13  ;;  %v1955_v22 = vrot.slane %v1923_v12, 1 }
 0x408   :  { %v1963_v58 = vrot.slane %v1923_v12, 7  ;;  %v1772_v3 = vadd.f32 %v1764_v11, %v1566_v34  ;;  %v1773_v20 = vadd.f32 %v1765_v30, %v1567_v14  ;;  %vm928_vm6 = vcmp.eq.f32.partialorder %v4027_v36, inf }
 0x409   :  { %v1946_v17 = vmul.f32 0.5, %v1942_v37  ;;  %v1947_v46 = vmul.f32 0.5, %v1943_v31  ;;  %v4955_v9 = vrot.slane %v3645_v43, 1  ;;  %v1958_v8 = vsel %vm131_vm3, %v1954_v50, %v1955_v22  ;;  %v2524_v57 = vpop.eup %2523 }
 0x40a   :  { %vm930_vm7 = vcmp.eq.f32.partialorder %v4027_v36, 0.0  ;;  %v931_v28 = vand.u32 2147483648, %v4027_v36  ;;  %v1966_v45 = vsel %vm124_vm4, %v1962_v39, %v1963_v58  ;;  %v1970_v61 = vsub.f32 %v1958_v8, %v1967_v18 }
 0x40b   :  { %v1957_v2 = vsel %vm131_vm3, %v1955_v22, %v4955_v9  ;;  %v2526_v56 = vpop.eup %2525  ;;  %v927_v55 = vmul.f32 %v2524_v57, %v4027_v36  ;;  %v1950_v60 = vadd.f32 %v1946_v17, %v1910_v32  ;;  %v1951_v43 = vadd.f32 %v1947_v46, %v1911_v19 }
 0x40c   :  { %v1971_v10 = vsub.f32 %v1957_v2, %v1966_v45  ;;  %v934_v27 = vmul.f32 %v2526_v56, %v4029_v35  ;;  %vm935_vm8 = vcmp.eq.f32.partialorder %v4029_v35, inf  ;;  %v938_v7 = vand.u32 2147483648, %v4029_v35 }
 0x40d   :  { %v1978_v26 = vadd.f32 %v1970_v61, %v1772_v3  ;;  %v929_v6 = vsel %vm928_vm6, %v4027_v36, %v927_v55  ;;  %v1974_v51 = vadd.f32 %v1950_v60, %v1768_v24  ;;  %v1975_v54 = vadd.f32 %v1951_v43, %v1769_v40 }
 0x40e   :  { %v1979_v4 = vadd.f32 %v1971_v10, %v1773_v20  ;;  %v4093_v42 = vsel %vm930_vm7, %v931_v28, %v929_v6  ;;  %v936_v32 = vsel %vm935_vm8, %v4029_v35, %v934_v27  ;;  %vm937_vm9 = vcmp.eq.f32.partialorder %v4029_v35, 0.0 }
 0x40f   :  { %v1986_v19 = vmul.f32 0.25, %v1978_v26  ;;  %v4097_v5 = vsel %vm937_vm9, %v938_v7, %v936_v32  ;;  %955 = vst.msk [vmem:[#allocation9] sm:$0xff] %vm4899_vm5, %v4093_v42  ;;  %v1982_v0 = vmul.f32 0.25, %v1974_v51  ;;  %v1983_v33 = vmul.f32 0.25, %v1975_v54  ;;  %1001 = vrot.lane.b32.xlu0 %v4093_v42, %s2698_s11 }
 0x410   :  { %v1987_v15 = vmul.f32 0.25, %v1979_v4  ;;  %v959_v36 = vand.u32 2147483647, %v3979_v53  ;;  %vm973_vm10 = vcmp.ge.f32.partialorder %v3979_v53, 0.0  ;;  %956 = vst.msk [vmem:[#allocation9 + $0x8] sm:$0xff] %vm4899_vm5, %v4097_v5  ;;  %1004 = vrot.lane.b32.xlu1 %v4097_v5, %s2698_s11  ;;  %vm974_vm12 = vcmp.ge.f32.partialorder %v3984_v47, 0.0 }
 0x411   :  { %v1994_v35 = vmul.f32 %v1986_v19, %v1986_v19  ;;  %v2044_v38 = vand.u32 2147483647, %v1986_v19  ;;  %2037 = vst.msk [vmem:[#allocation8 + $0x10] sm:$0xff] %vm4899_vm5, %v1986_v19  ;;  %v1990_v39 = vmul.f32 %v1982_v0, %v1982_v0  ;;  %v1991_v1 = vmul.f32 %v1983_v33, %v1983_v33  ;;  %2034 = vst.msk [vmem:[#allocation6 + $0x10] sm:$0xff] %vm4899_vm5, %v1982_v0 }
 0x412   :  { %v1995_v16 = vmul.f32 %v1987_v15, %v1987_v15  ;;  %v2042_v11 = vand.u32 2147483647, %v1982_v0  ;;  %2035 = vst.msk [vmem:[#allocation6 + $0x18] sm:$0xff] %vm4899_vm5, %v1983_v33  ;;  %2038 = vst.msk [vmem:[#allocation8 + $0x18] sm:$0xff] %vm4899_vm5, %v1987_v15  ;;  %v2043_v25 = vand.u32 2147483647, %v1983_v33 }
 0x413   :  { %v2045_v30 = vand.u32 2147483647, %v1987_v15  ;;  %v2050_v21 = vmul.f32 0.41421357, %v2044_v38  ;;  %v960_v13 = vand.u32 2147483647, %v3984_v47  ;;  %v4114_v23 = vadd.f32 %v1994_v35, %v1990_v39 }
 0x414   :  { %v4116_v34 = vadd.f32 %v1995_v16, %v1991_v1  ;;  %v2046_v63 = vmul.f32 0.41421357, %v2042_v11  ;;  %v965_v14 = vmul.f32 0.41421357, %v959_v36  ;;  %v2047_v50 = vmul.f32 0.41421357, %v2043_v25 }
 0x415   :  { %v2051_v49 = vmul.f32 0.41421357, %v2045_v30  ;;  %vm4120_vm11 = vcmp.le.f32.partialorder %v2042_v11, %v2050_v21  ;;  %v957_v24 = vand.u32 2147483647, %v3991_v62  ;;  %2527 = vrsqrt.f32 %v4114_v23 }
 0x416   :  { %vm2058_vm13 = vcmp.ge.f32.partialorder %v1986_v19, 0.0  ;;  %v958_v59 = vand.u32 2147483647, %v3993_v41  ;;  %v2702_v18 = vmov 3.0   ;;  %2529 = vrsqrt.f32 %v4116_v34 }
 0x417   :  { %v977_v29 = vsel %vm973_vm10, 5.0, %v2702_v18  ;;  %vm2054_vm14 = vcmp.ge.f32.partialorder %v1982_v0, 0.0  ;;  %vm4131_vm15 = vcmp.le.f32.partialorder %v2044_v38, %v2046_v63  ;;  %vm4135_vm6 = vcmp.le.f32.partialorder %v2045_v30, %v2047_v50 }
 0x418   :  { %vm4139_vm7 = vcmp.le.f32.partialorder %v2043_v25, %v2051_v49  ;;  %vm2055_vm8 = vcmp.ge.f32.partialorder %v1983_v33, 0.0  ;;  %v966_v22 = vmul.f32 0.41421357, %v960_v13  ;;  %vm969_vm9 = vcmp.ge.f32.partialorder %v3991_v62, 0.0 }
 0x419   :  { %vm2059_vm1 = vcmp.ge.f32.partialorder %v1987_v15, 0.0  ;;  %v2062_v58 = vsel %vm2058_vm13, 5.0, %v2702_v18  ;;  %v961_v40 = vmul.f32 0.41421357, %v957_v24  ;;  %v2703_v20 = vmov 1.0  }
 0x41a   :  { %v2063_v3 = vsel %vm2059_vm1, 5.0, %v2702_v18  ;;  %v2064_v17 = vsel %vm2058_vm13, 7.0, %v2703_v20  ;;  %v2065_v46 = vsel %vm2059_vm1, 7.0, %v2703_v20  ;;  %v2704_v9 = vmov 2.0  }
 0x41b   :  { %v2060_v2 = vsel %vm2058_vm13, 6.0, %v2704_v9  ;;  %v2061_v8 = vsel %vm2059_vm1, 6.0, %v2704_v9  ;;  %v2066_v57 = vsel %vm2054_vm14, %v2062_v58, %v2064_v17  ;;  %v2067_v28 = vsel %vm2055_vm8, %v2063_v3, %v2065_v46 }
 0x41c   :  { %v4964_v45 = vmov 0.0   ;;  %v2068_v55 = vsel %vm4120_vm11, %v2060_v2, %v2066_v57  ;;  %v2069_v60 = vsel %vm4139_vm7, %v2061_v8, %v2067_v28  ;;  %v962_v43 = vmul.f32 0.41421357, %v958_v59 }
 0x41d   :  { %v2056_v61 = vsel %vm2054_vm14, 4.0, %v4964_v45  ;;  %v2057_v56 = vsel %vm2055_vm8, 4.0, %v4964_v45  ;;  %v979_v10 = vsel %vm973_vm10, 7.0, %v2703_v20  ;;  %vm4167_vm1 = vcmp.le.f32.partialorder %v957_v24, %v965_v14 }
 0x41e   :  { %v4161_v27 = vsel %vm4131_vm15, %v2056_v61, %v2068_v55  ;;  %v4165_v7 = vsel %vm4135_vm6, %v2057_v56, %v2069_v60  ;;  %vm970_vm11 = vcmp.ge.f32.partialorder %v3993_v41, 0.0  ;;  %v978_v6 = vsel %vm974_vm12, 5.0, %v2702_v18 }
 0x41f   :  { %v980_v51 = vsel %vm974_vm12, 7.0, %v2703_v20  ;;  %vm4176_vm13 = vcmp.le.f32.partialorder %v958_v59, %v966_v22  ;;  %v991_v4 = vrot.slane %v4964_v45, 7  ;;  %v2528_v32 = vpop.eup %2527  ;;  %vm4183_vm14 = vcmp.le.f32.partialorder %v959_v36, %v961_v40 }
 0x420   :  { %v975_v0 = vsel %vm973_vm10, 6.0, %v2704_v9  ;;  %v976_v33 = vsel %vm974_vm12, 6.0, %v2704_v9  ;;  %v981_v15 = vsel %vm969_vm9, %v977_v29, %v979_v10  ;;  %v2530_v35 = vpop.eup %2529  ;;  %vm4193_vm15 = vcmp.le.f32.partialorder %v960_v13, %v962_v43 }
 0x421   :  { %v982_v36 = vsel %vm970_vm11, %v978_v6, %v980_v51  ;;  %v983_v39 = vsel %vm4167_vm1, %v975_v0, %v981_v15  ;;  %v2009_v53 = vmul.f32 %v2528_v32, %v4114_v23  ;;  %vm2010_vm10 = vcmp.eq.f32.partialorder %v4114_v23, inf }
 0x422   :  { %v984_v47 = vsel %vm4176_vm13, %v976_v33, %v982_v36  ;;  %v2013_v1 = vand.u32 2147483648, %v4114_v23  ;;  %v2016_v16 = vmul.f32 %v2530_v35, %v4116_v34  ;;  %vm2012_vm12 = vcmp.eq.f32.partialorder %v4114_v23, 0.0 }
 0x423   :  { %v2011_v11 = vsel %vm2010_vm10, %v4114_v23, %v2009_v53  ;;  %vm2017_vm6 = vcmp.eq.f32.partialorder %v4116_v34, inf  ;;  %v2020_v25 = vand.u32 2147483648, %v4116_v34  ;;  %vm2019_vm7 = vcmp.eq.f32.partialorder %v4116_v34, 0.0 }
 0x424   :  { %v4211_v30 = vsel %vm2012_vm12, %v2013_v1, %v2011_v11  ;;  %v2018_v21 = vsel %vm2017_vm6, %v4116_v34, %v2016_v16  ;;  %v992_v13 = vrot.slane %v4093_v42, 7  ;;  %v993_v23 = vrot.slane %v4097_v5, 7 }
 0x425   :  { %v4216_v63 = vsel %vm2019_vm7, %v2020_v25, %v2018_v21  ;;  %2040 = vst.msk [vmem:[#allocation9 + $0x10] sm:$0xff] %vm4899_vm5, %v4211_v30  ;;  %2087 = vrot.lane.b32.xlu0 %v4211_v30, %s2698_s11  ;;  %v971_v14 = vsel %vm969_vm9, 4.0, %v4964_v45  ;;  %v972_v34 = vsel %vm970_vm11, 4.0, %v4964_v45  ;;  %v997_v41 = vrot.slane %v4097_v5, 1 }
 0x426   :  { %2041 = vst.msk [vmem:[#allocation9 + $0x18] sm:$0xff] %vm4899_vm5, %v4216_v63  ;;  %2090 = vrot.lane.b32.xlu1 %v4216_v63, %s2698_s11  ;;  %v4235_v50 = vsel %vm4183_vm14, %v971_v14, %v983_v39  ;;  %v4239_v49 = vsel %vm4193_vm15, %v972_v34, %v984_v47  ;;  %v4243_v62 = vsel %vm124_vm4, %v991_v4, %v992_v13  ;;  %v996_v12 = vrot.slane %v4093_v42, 1 }
 0x427   :  { %v4249_v24 = vsel %vm124_vm4, %v992_v13, %v993_v23  ;;  %v998_v59 = vrot.slane %v4964_v45, 1  ;;  %v987_v18 = vmul.f32 45.0, %v4235_v50  ;;  %v988_v29 = vmul.f32 45.0, %v4239_v49 }
 0x428   :  { %v2072_v48 = vmul.f32 45.0, %v4161_v27  ;;  %v2073_v37 = vmul.f32 45.0, %v4165_v7  ;;  %v4262_v31 = vsel %vm131_vm3, %v996_v12, %v997_v41  ;;  %v2078_v22 = vrot.slane %v4211_v30, 7 }
 0x429   :  { %1047 = vrot.lane.b32.xlu0 %v4243_v62, %s2698_s11  ;;  %989 = vst.msk [vmem:[#allocation11] sm:$0xff] %vm4899_vm5, %v987_v18  ;;  %990 = vst.msk [vmem:[#allocation11 + $0x8] sm:$0xff] %vm4899_vm5, %v988_v29  ;;  %v4271_v58 = vsel %vm131_vm3, %v997_v41, %v998_v59  ;;  %v2079_v40 = vrot.slane %v4216_v63, 7  ;;  %v2082_v20 = vrot.slane %v4211_v30, 1  ;;  %v2083_v17 = vrot.slane %v4216_v63, 1 }
 0x42a   :  { %1050 = vrot.lane.b32.xlu1 %v4249_v24, %s2698_s11  ;;  %2075 = vst.msk [vmem:[#allocation11 + $0x10] sm:$0xff] %vm4899_vm5, %v2072_v48  ;;  %2076 = vst.msk [vmem:[#allocation11 + $0x18] sm:$0xff] %vm4899_vm5, %v2073_v37  ;;  %v4280_v3 = vsel %vm124_vm4, %v991_v4, %v2078_v22 }
 0x42b   :  { %v4288_v46 = vsel %vm124_vm4, %v2078_v22, %v2079_v40  ;;  %v4294_v9 = vsel %vm131_vm3, %v2082_v20, %v2083_v17  ;;  %v4300_v2 = vsel %vm131_vm3, %v2083_v17, %v998_v59 }
 0x42d   :  { %1071 = vrot.lane.b32.xlu0 %v4262_v31, %s2698_s11 }
 0x42e   :  { %1074 = vrot.lane.b32.xlu1 %v4271_v58, %s2698_s11 }
 0x431   :  { %2133 = vrot.lane.b32.xlu0 %v4280_v3, %s2698_s11 }
 0x432   :  { %2136 = vrot.lane.b32.xlu1 %v4288_v46, %s2698_s11 }
 0x435   :  { %2157 = vrot.lane.b32.xlu0 %v4294_v9, %s2698_s11 }
 0x436   :  { %2160 = vrot.lane.b32.xlu1 %v4300_v2, %s2698_s11 }
 0x481   :  { %v1002_v8 = vpop.permute.xlu0 %1001 }
 0x482   :  { %v1005_v57 = vpop.permute.xlu1 %1004  ;;  %v1003_v28 = vsel %vm64_vm0, %v1002_v8, %v4093_v42 }
 0x483   :  { %v1006_v45 = vsel %vm64_vm0, %v1005_v57, %v4097_v5  ;;  %1007 = vrot.lane.b32.xlu0 %v1003_v28, %s2698_s11 }
 0x484   :  { %1009 = vrot.lane.b32.xlu1 %v1006_v45, %s2698_s11 }
 0x497   :  { %v2088_v61 = vpop.permute.xlu0 %2087 }
 0x498   :  { %v2091_v56 = vpop.permute.xlu1 %2090  ;;  %v2089_v52 = vsel %vm64_vm0, %v2088_v61, %v4211_v30 }
 0x499   :  { %v2092_v55 = vsel %vm64_vm0, %v2091_v56, %v4216_v63  ;;  %2093 = vrot.lane.b32.xlu0 %v2089_v52, %s2698_s11 }
 0x49a   :  { %2095 = vrot.lane.b32.xlu1 %v2092_v55, %s2698_s11 }
 0x49b   :  { %v1048_v60 = vpop.permute.xlu0 %1047 }
 0x49c   :  { %v1051_v43 = vpop.permute.xlu1 %1050  ;;  %v1049_v10 = vsel %vm64_vm0, %v1048_v60, %v4243_v62 }
 0x49d   :  { %v1052_v26 = vsel %vm64_vm0, %v1051_v43, %v4249_v24  ;;  %1053 = vrot.lane.b32.xlu0 %v1049_v10, %s2698_s11 }
 0x49e   :  { %1055 = vrot.lane.b32.xlu1 %v1052_v26, %s2698_s11 }
 0x49f   :  { %v1072_v6 = vpop.permute.xlu0 %1071 }
 0x4a0   :  { %v1075_v51 = vpop.permute.xlu1 %1074  ;;  %v1073_v54 = vsel %vm64_vm0, %v1072_v6, %v4262_v31 }
 0x4a1   :  { %v1076_v4 = vsel %vm64_vm0, %v1075_v51, %v4271_v58  ;;  %1077 = vrot.lane.b32.xlu0 %v1073_v54, %s2698_s11 }
 0x4a2   :  { %1079 = vrot.lane.b32.xlu1 %v1076_v4, %s2698_s11 }
 0x4a3   :  { %v2134_v32 = vpop.permute.xlu0 %2133 }
 0x4a4   :  { %v2135_v19 = vsel %vm64_vm0, %v2134_v32, %v4280_v3  ;;  %v2137_v0 = vpop.permute.xlu1 %2136 }
 0x4a5   :  { %v2138_v33 = vsel %vm64_vm0, %v2137_v0, %v4288_v46  ;;  %2139 = vrot.lane.b32.xlu0 %v2135_v19, %s2698_s11 }
 0x4a6   :  { %2141 = vrot.lane.b32.xlu1 %v2138_v33, %s2698_s11 }
 0x4a7   :  { %v2158_v15 = vpop.permute.xlu0 %2157 }
 0x4a8   :  { %v2159_v35 = vsel %vm64_vm0, %v2158_v15, %v4294_v9  ;;  %v2161_v38 = vpop.permute.xlu1 %2160 }
 0x4a9   :  { %v2162_v36 = vsel %vm64_vm0, %v2161_v38, %v4300_v2  ;;  %2163 = vrot.lane.b32.xlu0 %v2159_v35, %s2698_s11 }
 0x4aa   :  { %2165 = vrot.lane.b32.xlu1 %v2162_v36, %s2698_s11 }
 0x4f5   :  { %v1008_v39 = vpop.permute.xlu0 %1007 }
 0x4f6   :  { %v1011_v53 = vsel %vm64_vm0, %v1008_v39, %v4093_v42  ;;  %v1010_v47 = vpop.permute.xlu1 %1009 }
 0x4f7   :  { %v1012_v1 = vsel %vm64_vm0, %v1010_v47, %v4097_v5  ;;  %1015 = vrot.lane.b32.xlu0 %v1011_v53, %s2701_s12 }
 0x4f8   :  { %1017 = vrot.lane.b32.xlu1 %v1012_v1, %s2701_s12 }
 0x4fb   :  { %1025 = vrot.lane.b32.xlu0 %v1011_v53, %s2700_s0 }
 0x4fc   :  { %1027 = vrot.lane.b32.xlu1 %v1012_v1, %s2700_s0 }
 0x50b   :  { %v2094_v16 = vpop.permute.xlu0 %2093 }
 0x50c   :  { %v2097_v11 = vsel %vm64_vm0, %v2094_v16, %v4211_v30  ;;  %v2096_v25 = vpop.permute.xlu1 %2095 }
 0x50d   :  { %v2098_v21 = vsel %vm64_vm0, %v2096_v25, %v4216_v63  ;;  %2101 = vrot.lane.b32.xlu0 %v2097_v11, %s2701_s12 }
 0x50e   :  { %2103 = vrot.lane.b32.xlu1 %v2098_v21, %s2701_s12 }
 0x50f   :  { %v1054_v13 = vpop.permute.xlu0 %1053 }
 0x510   :  { %v1056_v23 = vpop.permute.xlu1 %1055  ;;  %v1057_v34 = vsel %vm64_vm0, %v1054_v13, %v4243_v62 }
 0x511   :  { %2111 = vrot.lane.b32.xlu0 %v2097_v11, %s2700_s0  ;;  %v1058_v12 = vsel %vm64_vm0, %v1056_v23, %v4249_v24 }
 0x512   :  { %2113 = vrot.lane.b32.xlu1 %v2098_v21, %s2700_s0 }
 0x513   :  { %v1078_v14 = vpop.permute.xlu0 %1077 }
 0x514   :  { %v1080_v41 = vpop.permute.xlu1 %1079  ;;  %v1081_v18 = vsel %vm64_vm0, %v1078_v14, %v4262_v31 }
 0x515   :  { %1061 = vrot.lane.b32.xlu0 %v1057_v34, %s2701_s12  ;;  %v1082_v48 = vsel %vm64_vm0, %v1080_v41, %v4271_v58 }
 0x516   :  { %1063 = vrot.lane.b32.xlu1 %v1058_v12, %s2701_s12 }
 0x517   :  { %v2140_v59 = vpop.permute.xlu0 %2139 }
 0x518   :  { %v2142_v29 = vpop.permute.xlu1 %2141  ;;  %v2143_v37 = vsel %vm64_vm0, %v2140_v59, %v4280_v3 }
 0x519   :  { %1085 = vrot.lane.b32.xlu0 %v1081_v18, %s2700_s0  ;;  %v2144_v22 = vsel %vm64_vm0, %v2142_v29, %v4288_v46 }
 0x51a   :  { %1087 = vrot.lane.b32.xlu1 %v1082_v48, %s2700_s0 }
 0x51b   :  { %v2164_v40 = vpop.permute.xlu0 %2163 }
 0x51c   :  { %v2166_v20 = vpop.permute.xlu1 %2165  ;;  %v2167_v17 = vsel %vm64_vm0, %v2164_v40, %v4294_v9 }
 0x51d   :  { %2147 = vrot.lane.b32.xlu0 %v2143_v37, %s2701_s12  ;;  %v2168_v8 = vsel %vm64_vm0, %v2166_v20, %v4300_v2 }
 0x51e   :  { %2149 = vrot.lane.b32.xlu1 %v2144_v22, %s2701_s12 }
 0x521   :  { %2171 = vrot.lane.b32.xlu0 %v2167_v17, %s2700_s0 }
 0x522   :  { %2173 = vrot.lane.b32.xlu1 %v2168_v8, %s2700_s0 }
 0x525   :  { %1127 = vrot.lane.b32.xlu0 %v1057_v34, %s2700_s0 }
 0x526   :  { %1129 = vrot.lane.b32.xlu1 %v1058_v12, %s2700_s0 }
 0x529   :  { %1137 = vrot.lane.b32.xlu0 %v1081_v18, %s2701_s12 }
 0x52a   :  { %1139 = vrot.lane.b32.xlu1 %v1082_v48, %s2701_s12 }
 0x52d   :  { %2213 = vrot.lane.b32.xlu0 %v2143_v37, %s2700_s0 }
 0x52e   :  { %2215 = vrot.lane.b32.xlu1 %v2144_v22, %s2700_s0 }
 0x531   :  { %2223 = vrot.lane.b32.xlu0 %v2167_v17, %s2701_s12 }
 0x532   :  { %2225 = vrot.lane.b32.xlu1 %v2168_v8, %s2701_s12 }
 0x533   :  { %2564 = shalt.err (!%p2561_p12)
}
 0x534   :  { %s2565_s20 = scalar_lea.hbm %s4876_s2, 512 }
 0x535   :  { %p2566_p13 = scmp.ne.s32.totalorder %s4876_s2, %s2565_s20  ;;  %p2569_p0 = scmp.lt.u32.totalorder %s2565_s20, %s4876_s2 }
 0x537   :  { %p2571_p1 = pnand %p2569_p0, %p2566_p13 }
 0x539   :  { %2574 = shalt.err (!%p2571_p1)
}
 0x53a   :  { %2275 = dma.vmem_to_hbm [thread:$0]  %s2270_s14, 512, %s4876_s2, [#allocation7], %s2696_s7, %s2696_s7, %s2697_s8  }
 0x53b   :  { %s2575_s27 = scalar_lea.vmem %s4387_s16, 512  ;;  %p2580_p3 = scmp.lt.s32.totalorder %s4387_s16, %s4387_s16 }
 0x53c   :  { %p2576_p2 = scmp.ne.s32.totalorder %s4387_s16, %s2575_s27  ;;  %p2581_p4 = scmp.lt.s32.totalorder %s2575_s27, %s2575_s27 }
 0x53e   :  { %p2582_p5 = por %p2581_p4, %p2580_p3 }
 0x540   :  { %p2583_p6 = pnand %p2582_p5, %p2576_p2 }
 0x542   :  { %2586 = shalt.err (!%p2583_p6)
}
 0x543   :  { %s2587_s30 = scalar_lea.hbm %s4878_s4, 512 }
 0x544   :  { %p2588_p7 = scmp.ne.s32.totalorder %s4878_s4, %s2587_s30  ;;  %p2591_p8 = scmp.lt.u32.totalorder %s2587_s30, %s4878_s4 }
 0x546   :  { %p2593_p9 = pnand %p2591_p8, %p2588_p7 }
 0x548   :  { %2596 = shalt.err (!%p2593_p9)
}
 0x549   :  { %2299 = dma.vmem_to_hbm [thread:$0]  %s4387_s16, 512, %s4878_s4, [#allocation10], %s2696_s7, %s2696_s7, %s2697_s8  }
 0x54a   :  { %s2707_s13 = smov [#allocation5]   ;;  %s2708_s15 = smov [#allocation8]  }
 0x54b   :  { %s2257_s14 = sshll.u32 %s2707_s13, 4  ;;  %s2281_s17 = sshll.u32 %s2708_s15, 4  ;;  %s2258_s14 = int_to_ptr.vmem [resolvable:$true] %s2257_s14  ;;  %s4425_s17 = int_to_ptr.vmem [resolvable:$true] %s2281_s17 }
 0x54c   :  { %s2597_s18 = scalar_lea.vmem %s2258_s14, 2048  ;;  %p2602_p11 = scmp.lt.s32.totalorder %s2258_s14, %s2258_s14 }
 0x54d   :  { %p2598_p10 = scmp.ne.s32.totalorder %s2258_s14, %s2597_s18  ;;  %p2603_p12 = scmp.lt.s32.totalorder %s2597_s18, %s2597_s18 }
 0x54f   :  { %p2604_p13 = por %p2603_p12, %p2602_p11 }
 0x551   :  { %p2605_p0 = pnand %p2604_p13, %p2598_p10 }
 0x553   :  { %2608 = shalt.err (!%p2605_p0)
}
 0x554   :  { %s2609_s21 = scalar_lea.hbm %s4875_s1, 2048 }
 0x555   :  { %p2610_p1 = scmp.ne.s32.totalorder %s4875_s1, %s2609_s21  ;;  %p2613_p2 = scmp.lt.u32.totalorder %s2609_s21, %s4875_s1 }
 0x557   :  { %p2615_p3 = pnand %p2613_p2, %p2610_p1 }
 0x559   :  { %2618 = shalt.err (!%p2615_p3)
}
 0x55a   :  { %2263 = dma.vmem_to_hbm [thread:$0]  %s2258_s14, 2048, %s4875_s1, [#allocation4], %s2696_s7, %s2696_s7, %s2697_s8  }
 0x55b   :  { %s2619_s26 = scalar_lea.vmem %s4425_s17, 512  ;;  %p2624_p5 = scmp.lt.s32.totalorder %s4425_s17, %s4425_s17 }
 0x55c   :  { %p2620_p4 = scmp.ne.s32.totalorder %s4425_s17, %s2619_s26  ;;  %p2625_p6 = scmp.lt.s32.totalorder %s2619_s26, %s2619_s26 }
 0x55e   :  { %p2626_p7 = por %p2625_p6, %p2624_p5 }
 0x560   :  { %p2627_p8 = pnand %p2626_p7, %p2620_p4 }
 0x562   :  { %2630 = shalt.err (!%p2627_p8)
}
 0x563   :  { %s2631_s29 = scalar_lea.hbm %s4877_s3, 512 }
 0x564   :  { %p2632_p9 = scmp.ne.s32.totalorder %s4877_s3, %s2631_s29  ;;  %p2635_p10 = scmp.lt.u32.totalorder %s2631_s29, %s4877_s3 }
 0x566   :  { %p2637_p11 = pnand %p2635_p10, %p2632_p9 }
 0x568   :  { %2640 = shalt.err (!%p2637_p11)
}
 0x569   :  { %2287 = dma.vmem_to_hbm [thread:$0]  %s4425_s17, 512, %s4877_s3, [#allocation7], %s2696_s7, %s2696_s7, %s2697_s8  }
 0x56a   :  { %s2709_s2 = smov [#allocation11]  }
 0x56b   :  { %s2305_s12 = sshll.u32 %s2709_s2, 4  ;;  %s2306_s12 = int_to_ptr.vmem [resolvable:$true] %s2305_s12 }
 0x56c   :  { %s2641_s13 = scalar_lea.vmem %s2306_s12, 512  ;;  %p2646_p13 = scmp.lt.s32.totalorder %s2306_s12, %s2306_s12 }
 0x56d   :  { %p2642_p12 = scmp.ne.s32.totalorder %s2306_s12, %s2641_s13  ;;  %p2647_p0 = scmp.lt.s32.totalorder %s2641_s13, %s2641_s13 }
 0x56f   :  { %p2648_p1 = por %p2647_p0, %p2646_p13 }
 0x571   :  { %p2649_p2 = pnand %p2648_p1, %p2642_p12 }
 0x573   :  { %2652 = shalt.err (!%p2649_p2)
}
 0x574   :  { %s2653_s18 = scalar_lea.hbm %s4879_s5, 512 }
 0x575   :  { %p2654_p3 = scmp.ne.s32.totalorder %s4879_s5, %s2653_s18  ;;  %p2657_p4 = scmp.lt.u32.totalorder %s2653_s18, %s4879_s5 }
 0x577   :  { %p2659_p5 = pnand %p2657_p4, %p2654_p3 }
 0x579   :  { %2662 = shalt.err (!%p2659_p5)
}
 0x57a   :  { %2311 = dma.vmem_to_hbm [thread:$0]  %s2306_s12, 512, %s4879_s5, [#allocation10], %s2696_s7, %s2696_s7, %s2697_s8   ;;  %v1016_v57 = vpop.permute.xlu0 %1015  ;;  %v1018_v28 = vpop.permute.xlu1 %1017  ;;  %vm1039_vm0 = vcmp.eq.f32.partialorder %v4235_v50, 0.0  ;;  %vm1041_vm3 = vcmp.eq.f32.partialorder %v4235_v50, 4.0  ;;  %vm1040_vm4 = vcmp.eq.f32.partialorder %v4239_v49, 0.0  ;;  %vm1042_vm8 = vcmp.eq.f32.partialorder %v4239_v49, 4.0 }
 0x57b   :  { %v1109_v43 = vsub.f32 %v4093_v42, %v4243_v62  ;;  %v1111_v10 = vsub.f32 %v4093_v42, %v4262_v31  ;;  %vm1099_vm9 = vcmp.eq.f32.partialorder %v4235_v50, 1.0  ;;  %vm1101_vm1 = vcmp.eq.f32.partialorder %v4235_v50, 5.0  ;;  %vm4548_vm11 = vmor %vm1040_vm4, %vm1042_vm8  ;;  %s2710_s5 = smov [#allocation12]  }
 0x57c   :  { %v1110_v26 = vsub.f32 %v4097_v5, %v4249_v24  ;;  %v1112_v6 = vsub.f32 %v4097_v5, %v4271_v58  ;;  %vm1102_vm13 = vcmp.eq.f32.partialorder %v4239_v49, 5.0  ;;  %vm2127_vm12 = vcmp.eq.f32.partialorder %v4161_v27, 4.0  ;;  %s2317_s4 = sshll.u32 %s2710_s5, 4  ;;  %s2318_s4 = int_to_ptr.vmem [resolvable:$true] %s2317_s4 }
 0x57d   :  { %vm2126_vm6 = vcmp.eq.f32.partialorder %v4165_v7, 0.0  ;;  %vm2128_vm7 = vcmp.eq.f32.partialorder %v4165_v7, 4.0  ;;  %vm4973_vm5 = vcmp.le.s32.totalorder %v2966_v44, 14  ;;  %vm2187_vm14 = vcmp.eq.f32.partialorder %v4161_v27, 5.0  ;;  %s2663_s16 = scalar_lea.vmem %s2318_s4, 512  ;;  %p2668_p7 = scmp.lt.s32.totalorder %s2318_s4, %s2318_s4 }
 0x57e   :  { %v1026_v45 = vpop.permute.xlu0 %1025  ;;  %v1028_v61 = vpop.permute.xlu1 %1027  ;;  %v1021_v58 = vsel %vm4973_vm5, %v1016_v57, 0.0  ;;  %v1113_v54 = vmin.f32 %v1109_v43, %v1111_v10  ;;  %vm4974_vm15 = vmmov %vm4973_vm5  ;;  %v4514_v33 = vmin.f32 %v1110_v26, %v1112_v6  ;;  %vm4990_vm4 = vcmp.eq.f32.partialorder %v4235_v50, 2.0  ;;  %p2664_p6 = scmp.ne.s32.totalorder %s2318_s4, %s2663_s16  ;;  %p2669_p8 = scmp.lt.s32.totalorder %s2663_s16, %s2663_s16 }
 0x57f   :  { %v1031_v62 = vsel %vm4900_vm2, %v1026_v45, 0.0  ;;  %v1032_v24 = vsel %vm4900_vm2, %v1028_v61, 0.0  ;;  %v1022_v4 = vsel %vm4974_vm15, %v1018_v28, 0.0  ;;  %vm4975_vm10 = vmmov %vm4973_vm5  ;;  %v1023_v39 = vsub.f32 %v4093_v42, %v1021_v58 }
 0x580   :  { %v1033_v32 = vsub.f32 %v4093_v42, %v1031_v62  ;;  %v1034_v15 = vsub.f32 %v4097_v5, %v1032_v24  ;;  %vm4976_vm15 = vmmov %vm4973_vm5  ;;  %v1024_v16 = vsub.f32 %v4097_v5, %v1022_v4  ;;  %v2195_v45 = vsub.f32 %v4211_v30, %v4280_v3  ;;  %p2670_p9 = por %p2669_p8, %p2668_p7 }
 0x581   :  { %vm4535_vm5 = vmor %vm1039_vm0, %vm1041_vm3  ;;  %v2197_v61 = vsub.f32 %v4211_v30, %v4294_v9  ;;  %v4996_v3 = vmov 0  ;;  %v4999_v9 = vmov 0  ;;  %v5012_v4 = vmov 0 }
 0x582   :  { %v2102_v56 = vpop.permute.xlu0 %2101  ;;  %v4477_v52 = vpop.permute.xlu1 %2103  ;;  %v1035_v23 = vmin.f32 %v1023_v39, %v1033_v32  ;;  %v1036_v59 = vmin.f32 %v1024_v16, %v1034_v15  ;;  %vm4561_vm3 = vmor %vm1099_vm9, %vm1101_vm1  ;;  %v5016_v32 = vmov 0  ;;  %v5062_v20 = vmov 0  ;;  %p2671_p10 = pnand %p2670_p9, %p2664_p6 }
 0x583   :  { %vm4984_vm8 = vmmov %vm4975_vm10  ;;  %v2199_v39 = vmin.f32 %v2195_v45, %v2197_v61  ;;  %v5066_v28 = vmov 0 }
 0x584   :  { %v2108_v40 = vsel %vm4984_vm8, %v4477_v52, 0.0  ;;  %vm4988_vm0 = vmmov %vm4984_vm8  ;;  %vm4989_vm8 = vcmp.eq.f32.partialorder %v4235_v50, 6.0 }
 0x586   :  { %v2112_v55 = vpop.permute.xlu0 %2111  ;;  %v2114_v60 = vpop.permute.xlu1 %2113 }
 0x587   :  { %v2117_v35 = vsel %vm4900_vm2, %v2112_v55, 0.0  ;;  %v2118_v41 = vsel %vm4900_vm2, %v2114_v60, 0.0  ;;  %v2110_v60 = vsub.f32 %v4216_v63, %v2108_v40 }
 0x588   :  { %v2119_v34 = vsub.f32 %v4211_v30, %v2117_v35  ;;  %v2120_v17 = vsub.f32 %v4216_v63, %v2118_v41 }
 0x58a   :  { %v1062_v51 = vpop.permute.xlu0 %1061  ;;  %v1064_v31 = vpop.permute.xlu1 %1063  ;;  %v2122_v58 = vmin.f32 %v2110_v60, %v2120_v17 }
 0x58b   :  { %v1067_v19 = vsel %vm4975_vm10, %v1062_v51, 0.0  ;;  %v1068_v53 = vsel %vm4976_vm15, %v1064_v31, 0.0  ;;  %vm4979_vm15 = vmmov %vm4975_vm10  ;;  %v5005_v31 = vmov 0 }
 0x58c   :  { %v2107_v25 = vsel %vm4979_vm15, %v2102_v56, 0.0  ;;  %v1069_v21 = vsub.f32 %v4093_v42, %v1067_v19  ;;  %v1070_v18 = vsub.f32 %v4097_v5, %v1068_v53  ;;  %vm4985_vm15 = vcmp.eq.f32.partialorder %v4239_v49, 1.0 }
 0x58d   :  { %v2109_v22 = vsub.f32 %v4211_v30, %v2107_v25  ;;  %vm4573_vm10 = vmor %vm4985_vm15, %vm1102_vm13  ;;  %vm1037_vm15 = vcmp.le.f32.partialorder %v1035_v23, 0.0  ;;  %vm5008_vm13 = vcmp.eq.f32.partialorder %v4239_v49, 2.0 }
 0x58e   :  { %v1086_v0 = vpop.permute.xlu0 %1085  ;;  %v1088_v36 = vpop.permute.xlu1 %1087 }
 0x58f   :  { %v1091_v38 = vsel %vm4900_vm2, %v1086_v0, 0.0  ;;  %v1092_v1 = vsel %vm4900_vm2, %v1088_v36, 0.0  ;;  %vm4586_vm2 = vmor %vm4990_vm4, %vm4989_vm8  ;;  %v2121_v52 = vmin.f32 %v2109_v22, %v2119_v34  ;;  %vm5001_vm4 = vcmp.ge.s32.totalorder %v2966_v44, 1 }
 0x590   :  { %v1093_v47 = vsub.f32 %v4093_v42, %v1091_v38  ;;  %v1094_v13 = vsub.f32 %v4097_v5, %v1092_v1  ;;  %vm4608_vm8 = vmor %vm2126_vm6, %vm2128_vm7  ;;  %vm5002_vm6 = vcmp.le.s32.totalorder %v2966_v44, 14  ;;  %v5026_v38 = vmov 0 }
 0x591   :  { %v4997_v3 = vsel %vm4608_vm8, 4294967295, %v4996_v3  ;;  %vm5003_vm7 = vmmov %vm5001_vm4  ;;  %v5043_v34 = vmov 0 }
 0x592   :  { %v2148_v12 = vpop.permute.xlu0 %2147  ;;  %v1095_v48 = vmin.f32 %v1069_v21, %v1093_v47  ;;  %v2150_v37 = vpop.permute.xlu1 %2149  ;;  %v1096_v8 = vmin.f32 %v1070_v18, %v1094_v13  ;;  %v2196_v21 = vsub.f32 %v4216_v63, %v4288_v46  ;;  %v2198_v13 = vsub.f32 %v4216_v63, %v4300_v2 }
 0x593   :  { %v2153_v57 = vsel %vm4988_vm0, %v2148_v12, 0.0  ;;  %vm4993_vm0 = vcmp.eq.f32.partialorder %v4161_v27, 0.0  ;;  %v2154_v6 = vsel %vm5002_vm6, %v2150_v37, 0.0  ;;  %vm4642_vm6 = vmand %vm1037_vm15, %vm4535_vm5  ;;  %vm5018_vm15 = vcmp.le.f32.partialorder %v1036_v59, 0.0 }
 0x594   :  { %vm4599_vm1 = vmor %vm4993_vm0, %vm2127_vm12  ;;  %vm4998_vm12 = vcmp.eq.f32.partialorder %v4161_v27, 1.0  ;;  %v2155_v26 = vsub.f32 %v4211_v30, %v2153_v57  ;;  %v2156_v35 = vsub.f32 %v4216_v63, %v2154_v6  ;;  %v5046_v46 = vmov 0 }
 0x595   :  { %vm4616_vm0 = vmor %vm4998_vm12, %vm2187_vm14  ;;  %vm5004_vm14 = vcmp.le.f32.partialorder %v1113_v54, 0.0  ;;  %v2200_v57 = vmin.f32 %v2196_v21, %v2198_v13 }
 0x596   :  { %v2172_v55 = vpop.permute.xlu0 %2171  ;;  %v5000_v9 = vsel %vm4616_vm0, 4294967295, %v4999_v9  ;;  %v2174_v10 = vpop.permute.xlu1 %2173  ;;  %vm4631_vm12 = vmand %vm5004_vm14, %vm4586_vm2  ;;  %vm5011_vm14 = vcmp.le.f32.partialorder %v4514_v33, 0.0  ;;  %vm2123_vm2 = vcmp.le.f32.partialorder %v2121_v52, 0.0  ;;  %vm2124_vm0 = vcmp.le.f32.partialorder %v2122_v58, 0.0 }
 0x597   :  { %v2177_v43 = vsel %vm5001_vm4, %v2172_v55, 0.0  ;;  %v2178_v62 = vsel %vm5003_vm7, %v2174_v10, 0.0  ;;  %v5006_v31 = vsel %vm4631_vm12, 4294967295, %v5005_v31  ;;  %vm5007_vm4 = vcmp.eq.f32.partialorder %v4239_v49, 6.0  ;;  %vm4665_vm7 = vmand %vm5018_vm15, %vm4548_vm11 }
 0x598   :  { %v2179_v51 = vsub.f32 %v4211_v30, %v2177_v43  ;;  %vm1122_vm9 = vmor %vm5008_vm13, %vm5007_vm4  ;;  %v2180_v54 = vsub.f32 %v4216_v63, %v2178_v62  ;;  %vm5014_vm13 = vcmp.eq.f32.partialorder %v4161_v27, 6.0  ;;  %vm5015_vm4 = vcmp.eq.f32.partialorder %v4161_v27, 2.0 }
 0x599   :  { %vm4650_vm12 = vmand %vm5011_vm14, %vm1122_vm9  ;;  %vm5021_vm9 = vcmp.le.f32.partialorder %v1095_v48, 0.0  ;;  %vm1152_vm15 = vcmp.eq.f32.partialorder %v4239_v49, 3.0  ;;  %v5054_v48 = vmov 0 }
 0x59a   :  { %v5013_v4 = vsel %vm4650_vm12, 4294967295, %v5012_v4  ;;  %vm4658_vm5 = vmor %vm5015_vm4, %vm5014_vm13  ;;  %v2181_v0 = vmin.f32 %v2155_v26, %v2179_v51  ;;  %v1128_v33 = vpop.permute.xlu0 %1127  ;;  %vm5024_vm13 = vcmp.eq.f32.partialorder %v4165_v7, 5.0  ;;  %vm5025_vm4 = vcmp.eq.f32.partialorder %v4165_v7, 1.0  ;;  %v1130_v36 = vpop.permute.xlu1 %1129 }
 0x59b   :  { %v5017_v32 = vsel %vm4658_vm5, 4294967295, %v5016_v32  ;;  %vm4672_vm14 = vmand %vm5021_vm9, %vm4561_vm3  ;;  %vm1154_vm5 = vcmp.eq.f32.partialorder %v4239_v49, 7.0  ;;  %vm5028_vm3 = vcmp.le.f32.partialorder %v1096_v8, 0.0  ;;  %vm5031_vm12 = vcmp.eq.f32.partialorder %v4235_v50, 7.0 }
 0x59c   :  { %vm4681_vm11 = vmor %vm5025_vm4, %vm5024_vm13  ;;  %vm5032_vm13 = vcmp.eq.f32.partialorder %v4235_v50, 3.0  ;;  %v5035_v49 = vmov 0  ;;  %vm2183_vm8 = vcmp.le.f32.partialorder %v2181_v0, 0.0  ;;  %v2182_v1 = vmin.f32 %v2156_v35, %v2180_v54 }
 0x59d   :  { %v5027_v38 = vsel %vm4681_vm11, 4294967295, %v5026_v38  ;;  %vm4690_vm9 = vmand %vm5028_vm3, %vm4573_vm10  ;;  %vm5037_vm10 = vcmp.ge.s32.totalorder %v2966_v44, 1 }
 0x59e   :  { %vm4698_vm4 = vmor %vm5032_vm13, %vm5031_vm12  ;;  %v1133_v16 = vsel %vm5037_vm10, %v1128_v33, 0.0  ;;  %v1138_v11 = vpop.permute.xlu0 %1137  ;;  %v1140_v14 = vpop.permute.xlu1 %1139 }
 0x59f   :  { %vm4704_vm11 = vmand %vm2123_vm2, %vm4599_vm1  ;;  %vm5045_vm2 = vnez %v5000_v9  ;;  %v1135_v2 = vsub.f32 %v4093_v42, %v1133_v16 }
 0x5a0   :  { %v5036_v49 = vsel %vm4704_vm11, 4294967295, %v5035_v49  ;;  %vm5038_vm3 = vmmov %vm5037_vm10  ;;  %vm5071_vm11 = vcmp.ge.s32.totalorder %v2966_v44, 1 }
 0x5a1   :  { %v1134_v50 = vsel %vm5038_vm3, %v1130_v36, 0.0  ;;  %vm4716_vm13 = vmor %vm1152_vm15, %vm1154_vm5  ;;  %vm5041_vm5 = vcmp.le.s32.totalorder %v2966_v44, 14  ;;  %vm5042_vm3 = vnez %v4997_v3  ;;  %vm5052_vm15 = vcmp.eq.f32.partialorder %v4165_v7, 6.0 }
 0x5a2   :  { %v1143_v23 = vsel %vm5041_vm5, %v1138_v11, 0.0  ;;  %vm4735_vm1 = vmand %vm2124_vm0, %vm5042_vm3  ;;  %v1144_v12 = vsel %vm5041_vm5, %v1140_v14, 0.0  ;;  %v1136_v59 = vsub.f32 %v4097_v5, %v1134_v50  ;;  %vm5048_vm3 = vnez %v5006_v31  ;;  %v2214_v40 = vpop.permute.xlu0 %2213  ;;  %v2216_v8 = vpop.permute.xlu1 %2215 }
 0x5a3   :  { %v5044_v34 = vsel %vm4735_vm1, 4294967295, %v5043_v34  ;;  %vm4742_vm12 = vmand %vm2183_vm8, %vm5045_vm2  ;;  %v1145_v41 = vsub.f32 %v4093_v42, %v1143_v23  ;;  %v1146_v29 = vsub.f32 %v4097_v5, %v1144_v12  ;;  %vm2239_vm5 = vcmp.eq.f32.partialorder %v4161_v27, 7.0 }
 0x5a4   :  { %v5047_v46 = vsel %vm4742_vm12, 4294967295, %v5046_v46  ;;  %vm5049_vm8 = vmor %vm4642_vm6, %vm4672_vm14  ;;  %vm5053_vm0 = vcmp.eq.f32.partialorder %v4165_v7, 2.0  ;;  %vm5056_vm1 = vnez %v5013_v4 }
 0x5a5   :  { %vm4759_vm2 = vmor %vm5049_vm8, %vm5048_vm3  ;;  %v1147_v37 = vmin.f32 %v1135_v2, %v1145_v41  ;;  %vm5060_vm3 = vnez %v5017_v32  ;;  %vm5061_vm8 = vcmp.le.f32.partialorder %v2199_v39, 0.0  ;;  %v1148_v17 = vmin.f32 %v1136_v59, %v1146_v29 }
 0x5a6   :  { %vm4769_vm10 = vmor %vm5053_vm0, %vm5052_vm15  ;;  %v2224_v56 = vpop.permute.xlu0 %2223  ;;  %v2226_v60 = vpop.permute.xlu1 %2225 }
 0x5a7   :  { %v5055_v48 = vsel %vm4769_vm10, 4294967295, %v5054_v48  ;;  %vm5057_vm6 = vmor %vm4665_vm7, %vm4690_vm9  ;;  %vm2238_vm7 = vcmp.eq.f32.partialorder %v4165_v7, 3.0  ;;  %vm2240_vm9 = vcmp.eq.f32.partialorder %v4165_v7, 7.0  ;;  %vm1150_vm12 = vcmp.le.f32.partialorder %v1148_v17, 0.0 }
 0x5a8   :  { %vm4780_vm14 = vmor %vm5057_vm6, %vm5056_vm1  ;;  %vm5064_vm1 = vnez %v5027_v38  ;;  %vm5065_vm6 = vcmp.le.f32.partialorder %v2182_v1, 0.0  ;;  %v2219_v7 = vsel %vm5071_vm11, %v2214_v40, 0.0 }
 0x5a9   :  { %vm4787_vm15 = vmand %vm5061_vm8, %vm5060_vm3  ;;  %vm1149_vm3 = vcmp.le.f32.partialorder %v1147_v37, 0.0  ;;  %vm5068_vm8 = vcmp.eq.f32.partialorder %v4161_v27, 3.0  ;;  %v2221_v3 = vsub.f32 %v4211_v30, %v2219_v7 }
 0x5aa   :  { %v5063_v20 = vsel %vm4787_vm15, 4294967295, %v5062_v20  ;;  %vm4800_vm10 = vmand %vm5065_vm6, %vm5064_vm1 }
 0x5ab   :  { %v5067_v28 = vsel %vm4800_vm10, 4294967295, %v5066_v28  ;;  %vm4806_vm15 = vmor %vm5068_vm8, %vm2239_vm5  ;;  %vm5075_vm5 = vcmp.le.s32.totalorder %v2966_v44, 14 }
 0x5ac   :  { %vm1157_vm0 = vmand %vm1149_vm3, %vm4698_vm4  ;;  %v2229_v55 = vsel %vm5075_vm5, %v2224_v56, 0.0  ;;  %vm5076_vm3 = vcmask 130048  }
 0x5ad   :  { %vm1159_vm1 = vmor %vm4759_vm2, %vm1157_vm0  ;;  %v2231_v9 = vsub.f32 %v4211_v30, %v2229_v55 }
 0x5ae   :  { %vm5072_vm6 = vmmov %vm5071_vm11  ;;  %v1161_v52 = vsel %vm1159_vm1, 0.0, %v4093_v42  ;;  %vm2202_vm11 = vcmp.le.f32.partialorder %v2200_v57, 0.0  ;;  %vm5082_vm1 = vnez %v5063_v20 }
 0x5af   :  { %v2220_v61 = vsel %vm5072_vm6, %v2216_v8, 0.0  ;;  %vm4818_vm10 = vmor %vm2238_vm7, %vm2240_vm9  ;;  %1163 = vst.msk [vmem:[#allocation12] sm:$0xff] %vm5076_vm3, %v1161_v52  ;;  %vm5078_vm7 = vnez %v5067_v28  ;;  %v2233_v6 = vmin.f32 %v2221_v3, %v2231_v9  ;;  %vm5083_vm6 = vnez %v5036_v49 }
 0x5b0   :  { %vm1158_vm4 = vmand %vm1150_vm12, %vm4716_vm13  ;;  %vm5079_vm12 = vnez %v5044_v34  ;;  %v2222_v10 = vsub.f32 %v4216_v63, %v2220_v61 }
 0x5b1   :  { %vm1160_vm2 = vmor %vm4780_vm14, %vm1158_vm4  ;;  %vm5081_vm14 = vnez %v5055_v48  ;;  %vm5084_vm4 = vnez %v5047_v46 }
 0x5b2   :  { %vm5077_vm0 = vmmov %vm5075_vm5  ;;  %v1162_v43 = vsel %vm1160_vm2, 0.0, %v4097_v5  ;;  %vm2235_vm2 = vcmp.le.f32.partialorder %v2233_v6, 0.0 }
 0x5b3   :  { %v2230_v42 = vsel %vm5077_vm0, %v2226_v60, 0.0  ;;  %vm2194_vm13 = vmor %vm5079_vm12, %vm5078_vm7 }
 0x5b4   :  { %v2232_v26 = vsub.f32 %v4216_v63, %v2230_v42  ;;  %vm5080_vm9 = vmmov %vm5076_vm3 }
 0x5b5   :  { %1164 = vst.msk [vmem:[#allocation12 + $0x8] sm:$0xff] %vm5080_vm9, %v1162_v43  ;;  %vm2210_vm8 = vmand %vm2202_vm11, %vm5081_vm14  ;;  %vm5086_vm14 = vcmask 130048  }
 0x5b6   :  { %vm5085_vm5 = vmor %vm5083_vm6, %vm5084_vm4  ;;  %v2234_v44 = vmin.f32 %v2222_v10, %v2232_v26 }
 0x5b7   :  { %vm2211_vm3 = vmor %vm5085_vm5, %vm5082_vm1 }
 0x5b8   :  { %vm2212_vm0 = vmor %vm2194_vm13, %vm2210_vm8  ;;  %vm2236_vm12 = vcmp.le.f32.partialorder %v2234_v44, 0.0 }
 0x5b9   :  { %vm2243_vm7 = vmand %vm2235_vm2, %vm4806_vm15 }
 0x5ba   :  { %vm2245_vm9 = vmor %vm2211_vm3, %vm2243_vm7 }
 0x5bb   :  { %v2247_v5 = vsel %vm2245_vm9, 0.0, %v4211_v30  ;;  %vm2244_vm11 = vmand %vm2236_vm12, %vm4818_vm10 }
 0x5bc   :  { %2250 = vst.msk [vmem:[#allocation12 + $0x10] sm:$0xff] %vm5086_vm14, %v2247_v5  ;;  %vm2246_vm4 = vmor %vm2212_vm0, %vm2244_vm11 }
 0x5bd   :  { %v2248_v51 = vsel %vm2246_vm4, 0.0, %v4216_v63  ;;  %vm5087_vm1 = vmmov %vm5086_vm14 }
 0x5be   :  { %2251 = vst.msk [vmem:[#allocation12 + $0x18] sm:$0xff] %vm5087_vm1, %v2248_v51 }
 0x5bf   :  { %2674 = shalt.err (!%p2671_p10)
}
 0x5c0   :  { %s2675_s25 = scalar_lea.hbm %s4880_s6, 512 }
 0x5c1   :  { %p2676_p11 = scmp.ne.s32.totalorder %s4880_s6, %s2675_s25  ;;  %p2679_p12 = scmp.lt.u32.totalorder %s2675_s25, %s4880_s6 }
 0x5c3   :  { %p2681_p13 = pnand %p2679_p12, %p2676_p11 }
 0x5c5   :  { %2684 = shalt.err (!%p2681_p13)
}
 0x5c6   :  { %2323 = dma.vmem_to_hbm [thread:$0]  %s2318_s4, 512, %s4880_s6, [#allocation13], %s2696_s7, %s2696_s7, %s2697_s8  }
 0x5c7   :  { %2687 = dma.done.wait [#allocation4], 2048  }
 0x5c8   :  { %2688 = vsyncadd [#allocation4], 4294965248 }
 0x5c9   :  { %2689 = dma.done.wait [#allocation7], 1024  }
 0x5ca   :  { %2690 = vsyncadd [#allocation7], 4294966272 }
 0x5cb   :  { %2691 = dma.done.wait [#allocation10], 1024  }
 0x5cc   :  { %2692 = vsyncadd [#allocation10], 4294966272 }
 0x5cd   :  { %2693 = dma.done.wait [#allocation13], 512  }
 0x5ce   :  { %2694 = vsyncadd [#allocation13], 4294966784 }
 0x5cf   :  { %2342 = vsyncpa [#allocation3], 1 }
 0x5d0   :  { %2343 = vsyncpa [#allocation4], 1 }
 0x5d1   :  { %2344 = vsyncpa [#allocation7], 1 }
 0x5d2   :  { %2345 = vsyncpa [#allocation10], 1 }
 0x5d3   :  { %2346 = vsyncpa [#allocation13], 1 }

</bundles_post_ra>
